<compile_context>
chip_gen: v5e
topology: v5e:2x2
jax: 0.10.0
libtpu: 0.0.40
codegen_flags: <defaults>
</compile_context>

<pallas_src>
import functools

import jax
import jax.numpy as jnp
from jax.experimental import pallas as pl
from jax.experimental.pallas import tpu as pltpu


def _round_up(x, m):
    return ((x + m - 1) // m) * m


# ----------------------------------------------------------------------------
# Fused kernel: proj_head + L2 norm + per-dataset masked CE partial sums.
# One grid step processes one tile of TN points.
# ----------------------------------------------------------------------------
def _fused_kernel(feat_ref, dsidx_ref, label_ref, w_ref, b_ref, emb_ref,
                  out_ref, *, k_sizes):
    # --- proj_head (Linear) + L2 normalize (D already zero-padded to 128) ---
    x = jnp.dot(feat_ref[...], w_ref[...], preferred_element_type=jnp.float32)
    x = x + b_ref[...]                                           # [TN, Dp]
    inv_norm = jax.lax.rsqrt(jnp.sum(x * x, axis=-1, keepdims=True) + 1e-12)
    feat_n = x * inv_norm                                        # [TN, Dp]

    tn = feat_n.shape[0]
    num_ds, _, k_pad = emb_ref.shape
    col = jax.lax.broadcasted_iota(jnp.int32, (tn, k_pad), 1)
    onehot = col == label_ref[...]                               # [TN, Kp]
    dsidx = dsidx_ref[...]                                       # [TN, 1] int32

    out_col = jax.lax.broadcasted_iota(jnp.int32, (1, 128), 1)
    row = jnp.zeros((1, 128), jnp.float32)

    for d in range(num_ds):                 # static loop over dataset conditions
        k_d = k_sizes[d]                    # static Python int
        # logit_scale is folded into emb on the host.
        logits = jnp.dot(feat_n, emb_ref[d],
                         preferred_element_type=jnp.float32)     # [TN, Kp]
        # finite large-negative bias on padded columns (never -inf -> no NaN)
        logits = jnp.where(col < k_d, logits, -1e30)

        m = jnp.max(logits, axis=-1, keepdims=True)
        lse = m + jnp.log(jnp.sum(jnp.exp(logits - m), axis=-1, keepdims=True))
        picked = jnp.sum(jnp.where(onehot, logits, 0.0), axis=-1, keepdims=True)
        ce = lse - picked                                        # [TN, 1]

        mask = (dsidx == d).astype(jnp.float32)                  # in-kernel mask
        ce_sum = jnp.sum(ce * mask, axis=0, keepdims=True)       # [1, 1]
        cnt = jnp.sum(mask, axis=0, keepdims=True)               # [1, 1]

        row = jnp.where(out_col == d, ce_sum, row)
        row = jnp.where(out_col == (num_ds + d), cnt, row)

    out_ref[...] = row.reshape(out_ref.shape)   # lane-dense [1, 1, 128] store


# ----------------------------------------------------------------------------
# Host-side preprocessing: pad D to 128, gather/transpose/pad/stack the
# per-dataset class embeddings into [num_ds, D_pad, K_pad], fold logit_scale.
# ----------------------------------------------------------------------------
def _build_tables(class_embedding, proj_w, proj_b, source_index, logit_scale):
    c_in, d = proj_w.shape
    d_pad = _round_up(d, 128)
    k_sizes = tuple(len(s) for s in source_index)
    k_pad = _round_up(max(k_sizes), 128)
    num_ds = len(source_index)

    w_p = jnp.zeros((c_in, d_pad), jnp.float32).at[:, :d].set(
        proj_w.astype(jnp.float32))
    b_p = jnp.zeros((1, d_pad), jnp.float32).at[0, :d].set(
        proj_b.astype(jnp.float32))

    emb = jnp.zeros((num_ds, d_pad, k_pad), jnp.float32)
    ls = jnp.float32(logit_scale)
    for di, idx in enumerate(source_index):
        sub = class_embedding[jnp.asarray(idx, jnp.int32)]        # [K_d, D]
        emb = emb.at[di, :d, :len(idx)].set(ls * sub.astype(jnp.float32).T)
    return w_p, b_p, emb, k_sizes


# ----------------------------------------------------------------------------
# Module "forward" (training path with 'segment' labels present).
# ----------------------------------------------------------------------------
def point_prompt_training_forward(feat, proj_w, proj_b, class_embedding,
                                  logit_scale, source_index, dataset_idx,
                                  segment, tile_n=1024):
    # TODO(synk): only the training 'segment' path is implemented; the
    #             'instance' and eval seg_logits branches are out of scope.
    w_p, b_p, emb, k_sizes = _build_tables(class_embedding, proj_w, proj_b,
                                           source_index, logit_scale)
    num_ds = len(source_index)
    assert 2 * num_ds <= 128

    n, c_in = feat.shape
    d_pad = w_p.shape[1]
    k_pad = emb.shape[2]

    tn = min(tile_n, _round_up(n, 8))
    n_pad = _round_up(n, tn)
    n_tiles = n_pad // tn

    dataset_idx = dataset_idx.astype(jnp.int32)
    segment = segment.astype(jnp.int32)
    if n_pad != n:
        feat = jnp.pad(feat, ((0, n_pad - n), (0, 0)))
        dataset_idx = jnp.pad(dataset_idx, (0, n_pad - n), constant_values=-1)
        segment = jnp.pad(segment, (0, n_pad - n))

    kernel = functools.partial(_fused_kernel, k_sizes=k_sizes)
    partials = pl.pallas_call(
        kernel,
        out_shape=jax.ShapeDtypeStruct((n_tiles, 1, 128), jnp.float32),
        grid_spec=pltpu.PrefetchScalarGridSpec(
            num_scalar_prefetch=0,
            grid=(n_tiles,),
            in_specs=[
                pl.BlockSpec((tn, c_in), lambda i: (i, 0)),           # feat tile
                pl.BlockSpec((tn, 1), lambda i: (i, 0)),              # dataset_idx
                pl.BlockSpec((tn, 1), lambda i: (i, 0)),              # labels
                pl.BlockSpec((c_in, d_pad), lambda i: (0, 0)),        # proj W
                pl.BlockSpec((1, d_pad), lambda i: (0, 0)),           # proj b
                pl.BlockSpec((num_ds, d_pad, k_pad),
                             lambda i: (0, 0, 0)),                    # embeddings
            ],
            out_specs=pl.BlockSpec((1, 1, 128), lambda i: (i, 0, 0)),
        ),
        compiler_params=pltpu.CompilerParams(
            dimension_semantics=("parallel",)),
    )(feat, dataset_idx.reshape(n_pad, 1), segment.reshape(n_pad, 1),
      w_p, b_p, emb)

    totals = jnp.sum(partials, axis=(0, 1))                     # [128]
    ce_sums = totals[:num_ds]
    cnts = totals[num_ds:2 * num_ds]
    present = cnts > 0                    # mirrors torch.unique(dataset_idx)
    per_ds = jnp.where(present, ce_sums / jnp.maximum(cnts, 1.0), 0.0)
    num_present = jnp.maximum(jnp.sum(present.astype(jnp.float32)), 1.0)
    loss = jnp.sum(per_ds) / num_present
    return dict(loss=loss)


if __name__ == "__main__":
    key = jax.random.PRNGKey(0)
    N, C_IN, D = 256, 96, 64          # points, backbone_out_channels, clip dim
    conditions = ("Structured3D", "ScanNet", "S3DIS")
    source_index = (
        (0, 1, 2, 3, 4, 5, 6, 7, 8, 11, 13, 14, 15, 16, 17, 18, 19, 20, 21,
         23, 25, 26, 33, 34, 35),
        (0, 1, 2, 3, 4, 5, 6, 7, 8, 9, 11, 12, 13, 15, 20, 22, 24, 25, 27, 34),
        (0, 1, 4, 5, 6, 7, 8, 10, 19, 29, 30, 31, 32),
    )
    num_classes = 36

    k_feat, k_w, k_b, k_emb, k_seg = jax.random.split(key, 5)

    # synthetic backbone output
    feat = jax.random.normal(k_feat, (N, C_IN), jnp.float32)
    # proj_head = nn.Linear(C_IN, D)
    proj_w = jax.random.normal(k_w, (C_IN, D), jnp.float32) / jnp.sqrt(C_IN)
    proj_b = jax.random.normal(k_b, (D,), jnp.float32) * 0.01
    # synthetic (normalized) CLIP class embeddings
    class_embedding = jax.random.normal(k_emb, (num_classes, D), jnp.float32)
    class_embedding = class_embedding / jnp.linalg.norm(
        class_embedding, axis=-1, keepdims=True)
    # CLIP logit_scale param = ln(1/0.07); forward uses .exp()
    logit_scale = float(jnp.exp(jnp.log(1.0 / 0.07)))

    # every dataset condition appears (mirrors torch.unique over dataset_idx)
    dataset_idx = jnp.arange(N, dtype=jnp.int32) % len(conditions)
    min_k = min(len(s) for s in source_index)
    segment = jax.random.randint(k_seg, (N,), 0, min_k, dtype=jnp.int32)

    out = point_prompt_training_forward(feat, proj_w, proj_b, class_embedding,
                                        logit_scale, source_index, dataset_idx,
                                        segment)
    loss = jax.block_until_ready(out["loss"])

    # pure-JAX reference for correctness
    ref_feat = feat @ proj_w + proj_b
    ref_feat = ref_feat / jnp.linalg.norm(ref_feat, axis=-1, keepdims=True)
    present_ds = [d for d in range(len(conditions))
                  if bool(jnp.any(dataset_idx == d))]
    ref_loss = 0.0
    for d in present_ds:
        idx = jnp.asarray(source_index[d], jnp.int32)
        m = dataset_idx == d
        logits = logit_scale * (ref_feat[m] @ class_embedding[idx].T)
        lab = segment[m]
        lse = jax.nn.logsumexp(logits, axis=-1)
        picked = jnp.take_along_axis(logits, lab[:, None], axis=-1)[:, 0]
        ref_loss = ref_loss + jnp.mean(lse - picked) / len(present_ds)

    assert jnp.allclose(loss, ref_loss, rtol=1e-4, atol=1e-4), (loss, ref_loss)
    print("KERNEL_OK")
</pallas_src>

<mosaic_0001>
module attributes {stable_mosaic.version = 11 : i64} {
  func.func @_fused_kernel(%arg0: i32, %arg1: memref<256x96xf32, #tpu.memory_space<vmem>>, %arg2: memref<256x1xi32, #tpu.memory_space<vmem>>, %arg3: memref<256x1xi32, #tpu.memory_space<vmem>>, %arg4: memref<96x128xf32, #tpu.memory_space<vmem>>, %arg5: memref<1x128xf32, #tpu.memory_space<vmem>>, %arg6: memref<3x128x128xf32, #tpu.memory_space<vmem>>, %arg7: memref<1x1x128xf32, #tpu.memory_space<vmem>>) attributes {dimension_semantics = [#tpu.dimension_semantics<parallel>], iteration_bounds = array<i64: 1>, scalar_prefetch = 0 : i64, scratch_operands = 0 : i64, tpu.core_type = #tpu.core_type<tc>, window_params = [{transform_indices = @transform_0, window_bounds = array<i64: 256, 96>}, {transform_indices = @transform_1, window_bounds = array<i64: 256, 1>}, {transform_indices = @transform_2, window_bounds = array<i64: 256, 1>}, {pipeline_mode = #tpu.pipeline_mode<synchronous>, transform_indices = @transform_3, window_bounds = array<i64: 96, 128>}, {pipeline_mode = #tpu.pipeline_mode<synchronous>, transform_indices = @transform_4, window_bounds = array<i64: 1, 128>}, {pipeline_mode = #tpu.pipeline_mode<synchronous>, transform_indices = @transform_5, window_bounds = array<i64: 3, 128, 128>}, {transform_indices = @transform_6, window_bounds = array<i64: 1, 1, 128>}]} {
    %c0 = arith.constant 0 : index
    %c0_0 = arith.constant 0 : index
    %0 = vector.load %arg1[%c0, %c0_0] : memref<256x96xf32, #tpu.memory_space<vmem>>, vector<256x96xf32>
    %c0_1 = arith.constant 0 : index
    %c0_2 = arith.constant 0 : index
    %1 = vector.load %arg4[%c0_1, %c0_2] : memref<96x128xf32, #tpu.memory_space<vmem>>, vector<96x128xf32>
    %cst = arith.constant dense<0.000000e+00> : vector<256x128xf32>
    %2 = tpu.matmul %0, %1, %cst {dimension_numbers = #tpu.dot_dimension_numbers<[1], [0], [0], [1], [0, 0, 1, 1], [], []>} : vector<256x96xf32>, vector<96x128xf32>, vector<256x128xf32> -> vector<256x128xf32>
    %c0_3 = arith.constant 0 : index
    %c0_4 = arith.constant 0 : index
    %3 = vector.load %arg5[%c0_3, %c0_4] : memref<1x128xf32, #tpu.memory_space<vmem>>, vector<1x128xf32>
    %4 = vector.broadcast %3 : vector<1x128xf32> to vector<256x128xf32>
    %5 = arith.addf %2, %4 : vector<256x128xf32>
    %6 = arith.mulf %5, %5 : vector<256x128xf32>
    %cst_5 = arith.constant dense<0.000000e+00> : vector<256xf32>
    %7 = vector.multi_reduction <add>, %6, %cst_5 [1] : vector<256x128xf32> to vector<256xf32>
    %8 = vector.shape_cast %7 : vector<256xf32> to vector<256x1xf32>
    %cst_6 = arith.constant 9.99999996E-13 : f32
    %9 = vector.broadcast %cst_6 : f32 to vector<256x1xf32>
    %10 = arith.addf %8, %9 : vector<256x1xf32>
    %11 = math.rsqrt %10 : vector<256x1xf32>
    %12 = vector.broadcast %11 : vector<256x1xf32> to vector<256x128xf32>
    %13 = arith.mulf %5, %12 : vector<256x128xf32>
    %14 = tpu.iota {dimensions = array<i32: 1>} : vector<256x128xi32>
    %c0_7 = arith.constant 0 : index
    %c0_8 = arith.constant 0 : index
    %15 = vector.load %arg3[%c0_7, %c0_8] : memref<256x1xi32, #tpu.memory_space<vmem>>, vector<256x1xi32>
    %16 = vector.broadcast %15 : vector<256x1xi32> to vector<256x128xi32>
    %17 = arith.cmpi eq, %14, %16 : vector<256x128xi32>
    %c0_9 = arith.constant 0 : index
    %c0_10 = arith.constant 0 : index
    %18 = vector.load %arg2[%c0_9, %c0_10] : memref<256x1xi32, #tpu.memory_space<vmem>>, vector<256x1xi32>
    %19 = tpu.iota {dimensions = array<i32: 1>} : vector<1x128xi32>
    %cst_11 = arith.constant 0.000000e+00 : f32
    %20 = vector.broadcast %cst_11 : f32 to vector<1x128xf32>
    %c0_12 = arith.constant 0 : index
    %c0_13 = arith.constant 0 : index
    %c0_14 = arith.constant 0 : index
    %21 = vector.load %arg6[%c0_12, %c0_13, %c0_14] : memref<3x128x128xf32, #tpu.memory_space<vmem>>, vector<1x128x128xf32>
    %22 = vector.shape_cast %21 : vector<1x128x128xf32> to vector<128x128xf32>
    %cst_15 = arith.constant dense<0.000000e+00> : vector<256x128xf32>
    %23 = tpu.matmul %13, %22, %cst_15 {dimension_numbers = #tpu.dot_dimension_numbers<[1], [0], [0], [1], [0, 0, 1, 1], [], []>} : vector<256x128xf32>, vector<128x128xf32>, vector<256x128xf32> -> vector<256x128xf32>
    %c25_i32 = arith.constant 25 : i32
    %24 = vector.broadcast %c25_i32 : i32 to vector<256x128xi32>
    %25 = arith.cmpi slt, %14, %24 : vector<256x128xi32>
    %cst_16 = arith.constant -1.000000e+30 : f32
    %26 = vector.broadcast %cst_16 : f32 to vector<256x128xf32>
    %27 = arith.select %25, %23, %26 : vector<256x128xi1>, vector<256x128xf32>
    %cst_17 = arith.constant dense<0xFF800000> : vector<256xf32>
    %28 = vector.multi_reduction <maximumf>, %27, %cst_17 [1] : vector<256x128xf32> to vector<256xf32>
    %29 = vector.shape_cast %28 : vector<256xf32> to vector<256x1xf32>
    %30 = vector.broadcast %29 : vector<256x1xf32> to vector<256x128xf32>
    %31 = arith.subf %27, %30 : vector<256x128xf32>
    %32 = math.exp %31 : vector<256x128xf32>
    %cst_18 = arith.constant dense<0.000000e+00> : vector<256xf32>
    %33 = vector.multi_reduction <add>, %32, %cst_18 [1] : vector<256x128xf32> to vector<256xf32>
    %34 = vector.shape_cast %33 : vector<256xf32> to vector<256x1xf32>
    %35 = math.log %34 : vector<256x1xf32>
    %36 = arith.addf %29, %35 : vector<256x1xf32>
    %cst_19 = arith.constant 0.000000e+00 : f32
    %37 = vector.broadcast %cst_19 : f32 to vector<256x128xf32>
    %38 = arith.select %17, %27, %37 : vector<256x128xi1>, vector<256x128xf32>
    %cst_20 = arith.constant dense<0.000000e+00> : vector<256xf32>
    %39 = vector.multi_reduction <add>, %38, %cst_20 [1] : vector<256x128xf32> to vector<256xf32>
    %40 = vector.shape_cast %39 : vector<256xf32> to vector<256x1xf32>
    %41 = arith.subf %36, %40 : vector<256x1xf32>
    %c0_i32 = arith.constant 0 : i32
    %42 = vector.broadcast %c0_i32 : i32 to vector<256x1xi32>
    %43 = arith.cmpi eq, %18, %42 : vector<256x1xi32>
    %44 = arith.extui %43 : vector<256x1xi1> to vector<256x1xi32>
    %45 = arith.sitofp %44 : vector<256x1xi32> to vector<256x1xf32>
    %46 = arith.mulf %41, %45 : vector<256x1xf32>
    %cst_21 = arith.constant dense<0.000000e+00> : vector<1xf32>
    %47 = vector.multi_reduction <add>, %46, %cst_21 [0] : vector<256x1xf32> to vector<1xf32>
    %48 = vector.shape_cast %47 : vector<1xf32> to vector<1x1xf32>
    %cst_22 = arith.constant dense<0.000000e+00> : vector<1xf32>
    %49 = vector.multi_reduction <add>, %45, %cst_22 [0] : vector<256x1xf32> to vector<1xf32>
    %50 = vector.shape_cast %49 : vector<1xf32> to vector<1x1xf32>
    %c0_i32_23 = arith.constant 0 : i32
    %51 = vector.broadcast %c0_i32_23 : i32 to vector<1x128xi32>
    %52 = arith.cmpi eq, %19, %51 : vector<1x128xi32>
    %53 = vector.shape_cast %48 : vector<1x1xf32> to vector<1x1xf32>
    %54 = vector.broadcast %53 : vector<1x1xf32> to vector<1x128xf32>
    %55 = arith.select %52, %54, %20 : vector<1x128xi1>, vector<1x128xf32>
    %c3_i32 = arith.constant 3 : i32
    %56 = vector.broadcast %c3_i32 : i32 to vector<1x128xi32>
    %57 = arith.cmpi eq, %19, %56 : vector<1x128xi32>
    %58 = vector.shape_cast %50 : vector<1x1xf32> to vector<1x1xf32>
    %59 = vector.broadcast %58 : vector<1x1xf32> to vector<1x128xf32>
    %60 = arith.select %57, %59, %55 : vector<1x128xi1>, vector<1x128xf32>
    %c1 = arith.constant 1 : index
    %c0_24 = arith.constant 0 : index
    %c0_25 = arith.constant 0 : index
    %61 = vector.load %arg6[%c1, %c0_24, %c0_25] : memref<3x128x128xf32, #tpu.memory_space<vmem>>, vector<1x128x128xf32>
    %62 = vector.shape_cast %61 : vector<1x128x128xf32> to vector<128x128xf32>
    %cst_26 = arith.constant dense<0.000000e+00> : vector<256x128xf32>
    %63 = tpu.matmul %13, %62, %cst_26 {dimension_numbers = #tpu.dot_dimension_numbers<[1], [0], [0], [1], [0, 0, 1, 1], [], []>} : vector<256x128xf32>, vector<128x128xf32>, vector<256x128xf32> -> vector<256x128xf32>
    %c20_i32 = arith.constant 20 : i32
    %64 = vector.broadcast %c20_i32 : i32 to vector<256x128xi32>
    %65 = arith.cmpi slt, %14, %64 : vector<256x128xi32>
    %cst_27 = arith.constant -1.000000e+30 : f32
    %66 = vector.broadcast %cst_27 : f32 to vector<256x128xf32>
    %67 = arith.select %65, %63, %66 : vector<256x128xi1>, vector<256x128xf32>
    %cst_28 = arith.constant dense<0xFF800000> : vector<256xf32>
    %68 = vector.multi_reduction <maximumf>, %67, %cst_28 [1] : vector<256x128xf32> to vector<256xf32>
    %69 = vector.shape_cast %68 : vector<256xf32> to vector<256x1xf32>
    %70 = vector.broadcast %69 : vector<256x1xf32> to vector<256x128xf32>
    %71 = arith.subf %67, %70 : vector<256x128xf32>
    %72 = math.exp %71 : vector<256x128xf32>
    %cst_29 = arith.constant dense<0.000000e+00> : vector<256xf32>
    %73 = vector.multi_reduction <add>, %72, %cst_29 [1] : vector<256x128xf32> to vector<256xf32>
    %74 = vector.shape_cast %73 : vector<256xf32> to vector<256x1xf32>
    %75 = math.log %74 : vector<256x1xf32>
    %76 = arith.addf %69, %75 : vector<256x1xf32>
    %cst_30 = arith.constant 0.000000e+00 : f32
    %77 = vector.broadcast %cst_30 : f32 to vector<256x128xf32>
    %78 = arith.select %17, %67, %77 : vector<256x128xi1>, vector<256x128xf32>
    %cst_31 = arith.constant dense<0.000000e+00> : vector<256xf32>
    %79 = vector.multi_reduction <add>, %78, %cst_31 [1] : vector<256x128xf32> to vector<256xf32>
    %80 = vector.shape_cast %79 : vector<256xf32> to vector<256x1xf32>
    %81 = arith.subf %76, %80 : vector<256x1xf32>
    %c1_i32 = arith.constant 1 : i32
    %82 = vector.broadcast %c1_i32 : i32 to vector<256x1xi32>
    %83 = arith.cmpi eq, %18, %82 : vector<256x1xi32>
    %84 = arith.extui %83 : vector<256x1xi1> to vector<256x1xi32>
    %85 = arith.sitofp %84 : vector<256x1xi32> to vector<256x1xf32>
    %86 = arith.mulf %81, %85 : vector<256x1xf32>
    %cst_32 = arith.constant dense<0.000000e+00> : vector<1xf32>
    %87 = vector.multi_reduction <add>, %86, %cst_32 [0] : vector<256x1xf32> to vector<1xf32>
    %88 = vector.shape_cast %87 : vector<1xf32> to vector<1x1xf32>
    %cst_33 = arith.constant dense<0.000000e+00> : vector<1xf32>
    %89 = vector.multi_reduction <add>, %85, %cst_33 [0] : vector<256x1xf32> to vector<1xf32>
    %90 = vector.shape_cast %89 : vector<1xf32> to vector<1x1xf32>
    %c1_i32_34 = arith.constant 1 : i32
    %91 = vector.broadcast %c1_i32_34 : i32 to vector<1x128xi32>
    %92 = arith.cmpi eq, %19, %91 : vector<1x128xi32>
    %93 = vector.shape_cast %88 : vector<1x1xf32> to vector<1x1xf32>
    %94 = vector.broadcast %93 : vector<1x1xf32> to vector<1x128xf32>
    %95 = arith.select %92, %94, %60 : vector<1x128xi1>, vector<1x128xf32>
    %c4_i32 = arith.constant 4 : i32
    %96 = vector.broadcast %c4_i32 : i32 to vector<1x128xi32>
    %97 = arith.cmpi eq, %19, %96 : vector<1x128xi32>
    %98 = vector.shape_cast %90 : vector<1x1xf32> to vector<1x1xf32>
    %99 = vector.broadcast %98 : vector<1x1xf32> to vector<1x128xf32>
    %100 = arith.select %97, %99, %95 : vector<1x128xi1>, vector<1x128xf32>
    %c2 = arith.constant 2 : index
    %c0_35 = arith.constant 0 : index
    %c0_36 = arith.constant 0 : index
    %101 = vector.load %arg6[%c2, %c0_35, %c0_36] : memref<3x128x128xf32, #tpu.memory_space<vmem>>, vector<1x128x128xf32>
    %102 = vector.shape_cast %101 : vector<1x128x128xf32> to vector<128x128xf32>
    %cst_37 = arith.constant dense<0.000000e+00> : vector<256x128xf32>
    %103 = tpu.matmul %13, %102, %cst_37 {dimension_numbers = #tpu.dot_dimension_numbers<[1], [0], [0], [1], [0, 0, 1, 1], [], []>} : vector<256x128xf32>, vector<128x128xf32>, vector<256x128xf32> -> vector<256x128xf32>
    %c13_i32 = arith.constant 13 : i32
    %104 = vector.broadcast %c13_i32 : i32 to vector<256x128xi32>
    %105 = arith.cmpi slt, %14, %104 : vector<256x128xi32>
    %cst_38 = arith.constant -1.000000e+30 : f32
    %106 = vector.broadcast %cst_38 : f32 to vector<256x128xf32>
    %107 = arith.select %105, %103, %106 : vector<256x128xi1>, vector<256x128xf32>
    %cst_39 = arith.constant dense<0xFF800000> : vector<256xf32>
    %108 = vector.multi_reduction <maximumf>, %107, %cst_39 [1] : vector<256x128xf32> to vector<256xf32>
    %109 = vector.shape_cast %108 : vector<256xf32> to vector<256x1xf32>
    %110 = vector.broadcast %109 : vector<256x1xf32> to vector<256x128xf32>
    %111 = arith.subf %107, %110 : vector<256x128xf32>
    %112 = math.exp %111 : vector<256x128xf32>
    %cst_40 = arith.constant dense<0.000000e+00> : vector<256xf32>
    %113 = vector.multi_reduction <add>, %112, %cst_40 [1] : vector<256x128xf32> to vector<256xf32>
    %114 = vector.shape_cast %113 : vector<256xf32> to vector<256x1xf32>
    %115 = math.log %114 : vector<256x1xf32>
    %116 = arith.addf %109, %115 : vector<256x1xf32>
    %cst_41 = arith.constant 0.000000e+00 : f32
    %117 = vector.broadcast %cst_41 : f32 to vector<256x128xf32>
    %118 = arith.select %17, %107, %117 : vector<256x128xi1>, vector<256x128xf32>
    %cst_42 = arith.constant dense<0.000000e+00> : vector<256xf32>
    %119 = vector.multi_reduction <add>, %118, %cst_42 [1] : vector<256x128xf32> to vector<256xf32>
    %120 = vector.shape_cast %119 : vector<256xf32> to vector<256x1xf32>
    %121 = arith.subf %116, %120 : vector<256x1xf32>
    %c2_i32 = arith.constant 2 : i32
    %122 = vector.broadcast %c2_i32 : i32 to vector<256x1xi32>
    %123 = arith.cmpi eq, %18, %122 : vector<256x1xi32>
    %124 = arith.extui %123 : vector<256x1xi1> to vector<256x1xi32>
    %125 = arith.sitofp %124 : vector<256x1xi32> to vector<256x1xf32>
    %126 = arith.mulf %121, %125 : vector<256x1xf32>
    %cst_43 = arith.constant dense<0.000000e+00> : vector<1xf32>
    %127 = vector.multi_reduction <add>, %126, %cst_43 [0] : vector<256x1xf32> to vector<1xf32>
    %128 = vector.shape_cast %127 : vector<1xf32> to vector<1x1xf32>
    %cst_44 = arith.constant dense<0.000000e+00> : vector<1xf32>
    %129 = vector.multi_reduction <add>, %125, %cst_44 [0] : vector<256x1xf32> to vector<1xf32>
    %130 = vector.shape_cast %129 : vector<1xf32> to vector<1x1xf32>
    %c2_i32_45 = arith.constant 2 : i32
    %131 = vector.broadcast %c2_i32_45 : i32 to vector<1x128xi32>
    %132 = arith.cmpi eq, %19, %131 : vector<1x128xi32>
    %133 = vector.shape_cast %128 : vector<1x1xf32> to vector<1x1xf32>
    %134 = vector.broadcast %133 : vector<1x1xf32> to vector<1x128xf32>
    %135 = arith.select %132, %134, %100 : vector<1x128xi1>, vector<1x128xf32>
    %c5_i32 = arith.constant 5 : i32
    %136 = vector.broadcast %c5_i32 : i32 to vector<1x128xi32>
    %137 = arith.cmpi eq, %19, %136 : vector<1x128xi32>
    %138 = vector.shape_cast %130 : vector<1x1xf32> to vector<1x1xf32>
    %139 = vector.broadcast %138 : vector<1x1xf32> to vector<1x128xf32>
    %140 = arith.select %137, %139, %135 : vector<1x128xi1>, vector<1x128xf32>
    %141 = vector.shape_cast %140 : vector<1x128xf32> to vector<1x1x128xf32>
    %c0_46 = arith.constant 0 : index
    %c0_47 = arith.constant 0 : index
    %c0_48 = arith.constant 0 : index
    %142 = vector.load %arg7[%c0_46, %c0_47, %c0_48] : memref<1x1x128xf32, #tpu.memory_space<vmem>>, vector<1x1x128xf32>
    tpu.vector_store %arg7[%c0_46, %c0_47, %c0_48], %141 {strides = array<i32>} : memref<1x1x128xf32, #tpu.memory_space<vmem>>, vector<1x1x128xf32>,
    return
  }
  func.func @transform_0(%arg0: i32) -> (i32, i32) {
    %c0_i32 = arith.constant 0 : i32
    %c0_i32_0 = arith.constant 0 : i32
    return %arg0, %c0_i32 : i32, i32
  }
  func.func @transform_1(%arg0: i32) -> (i32, i32) {
    %c0_i32 = arith.constant 0 : i32
    %c0_i32_0 = arith.constant 0 : i32
    return %arg0, %c0_i32 : i32, i32
  }
  func.func @transform_2(%arg0: i32) -> (i32, i32) {
    %c0_i32 = arith.constant 0 : i32
    %c0_i32_0 = arith.constant 0 : i32
    return %arg0, %c0_i32 : i32, i32
  }
  func.func @transform_3(%arg0: i32) -> (i32, i32) {
    %c0_i32 = arith.constant 0 : i32
    %c0_i32_0 = arith.constant 0 : i32
    %c0_i32_1 = arith.constant 0 : i32
    return %c0_i32, %c0_i32_0 : i32, i32
  }
  func.func @transform_4(%arg0: i32) -> (i32, i32) {
    %c0_i32 = arith.constant 0 : i32
    %c0_i32_0 = arith.constant 0 : i32
    %c0_i32_1 = arith.constant 0 : i32
    return %c0_i32, %c0_i32_0 : i32, i32
  }
  func.func @transform_5(%arg0: i32) -> (i32, i32, i32) {
    %c0_i32 = arith.constant 0 : i32
    %c0_i32_0 = arith.constant 0 : i32
    %c0_i32_1 = arith.constant 0 : i32
    %c0_i32_2 = arith.constant 0 : i32
    return %c0_i32, %c0_i32_0, %c0_i32_1 : i32, i32, i32
  }
  func.func @transform_6(%arg0: i32) -> (i32, i32, i32) {
    %c0_i32 = arith.constant 0 : i32
    %c0_i32_0 = arith.constant 0 : i32
    %c0_i32_1 = arith.constant 0 : i32
    return %arg0, %c0_i32, %c0_i32_0 : i32, i32, i32
  }
}

</mosaic_0001>

<bundles_post_ra>
// kernel: tpu_custom_call.1
= control target key start
LH: loop header
LB: loop body
LE: loop exit
PB: predicated region body
PF: predicated region fallthrough
CT: control target
= control target key end

     0   :  { %v4317_v3 = vmov 0   ;;  %s7985_s0 = inlined_call_operand.vmem [shape: f32[256,96], index: 0, kind: input, shape index: {}]   ;;  %s7986_s1 = inlined_call_operand.vmem [shape: s32[256,1], index: 1, kind: input, shape index: {}]   ;;  %s7987_s2 = inlined_call_operand.vmem [shape: s32[256,1], index: 2, kind: input, shape index: {}]   ;;  %s7988_s3 = inlined_call_operand.vmem [shape: f32[96,128], index: 3, kind: input, shape index: {}]   ;;  %s7989_s4 = inlined_call_operand.vmem [shape: f32[1,128], index: 4, kind: input, shape index: {}]   ;;  %s7990_s5 = inlined_call_operand.vmem [shape: f32[3,128,128], index: 5, kind: input, shape index: {}]   ;;  %s7991_s6 = inlined_call_operand.hbm [shape: f32[1,1,128], index: 6, kind: output, shape index: {}]  }
   0x1   :  { %v67_v0 = vld [vmem:[%s7988_s3 + $0x58] sm:$0xff]  ;;  %v766_v1 = vld [vmem:[%s7987_s2 + $0x10] sm:$0xff]  ;;  %v765_v2 = vld [vmem:[%s7987_s2 + $0x8] sm:$0xff]  ;;  %3811 = vset.pattern.permute.xlu1 %v4317_v3  ;;  %3810 = vset.pattern.permute.xlu0 %v4317_v3 }
   0x2   :  { %v764_v4 = vld [vmem:[%s7987_s2] sm:$0xff]  ;;  %v66_v5 = vld [vmem:[%s7988_s3 + $0x50] sm:$0xff]  ;;  %3809 = vset.pattern.permute.xlu2 %v4317_v3  ;;  %173 = vmatpush.msra.mxu0 %v67_v0  ;;  %v65_v6 = vld [vmem:[%s7988_s3 + $0x48] sm:$0xff] }
   0x3   :  { %803 = vperm.xlu1 %3811, %v766_v1   ;;  %800 = vperm.xlu0 %3810, %v765_v2   ;;  %v64_v7 = vld [vmem:[%s7988_s3 + $0x40] sm:$0xff]  ;;  %v63_v8 = vld [vmem:[%s7988_s3 + $0x38] sm:$0xff]  ;;  %v769_v9 = vld [vmem:[%s7987_s2 + $0x28] sm:$0xff] }
   0x4   :  { %797 = vperm.xlu2 %3809, %v764_v4   ;;  %174 = vmatpush.msra.mxu0 %v66_v5  ;;  %v772_v10 = vld [vmem:[%s7987_s2 + $0x40] sm:$0xff]  ;;  %v767_v11 = vld [vmem:[%s7987_s2 + $0x18] sm:$0xff]  ;;  %v62_v12 = vld [vmem:[%s7988_s3 + $0x30] sm:$0xff] }
   0x6   :  { %175 = vmatpush.msra.mxu0 %v65_v6 }
   0x8   :  { %176 = vmatpush.msra.mxu0 %v64_v7 }
   0xa   :  { %177 = vmatpush.msra.mxu0 %v63_v8 }
   0xb   :  { %11 = vsyncpa [#allocation3], 0  ;;  %812 = vperm.xlu1 %3811, %v769_v9   ;;  %821 = vperm.xlu0 %3810, %v772_v10   ;;  %v61_v13 = vld [vmem:[%s7988_s3 + $0x28] sm:$0xff]  ;;  %v60_v14 = vld [vmem:[%s7988_s3 + $0x20] sm:$0xff]  ;;  %vm72_vm0 = vcmask 785408   ;;  %s3637_s24 = sshll.u32 %s7991_s6, 4  ;;  %s3638_s24 = int_to_ptr.hbm [resolvable:$true] %s3637_s24 }
   0xc   :  { %806 = vperm.xlu2 %3809, %v767_v11   ;;  %178 = vmatpush.msra.mxu0 %v62_v12  ;;  %v59_v15 = vld [vmem:[%s7988_s3 + $0x18] sm:$0xff]  ;;  %v768_v18 = vld [vmem:[%s7987_s2 + $0x20] sm:$0xff]  ;;  %v58_v19 = vld [vmem:[%s7988_s3 + $0x10] sm:$0xff] }
   0xd   :  { %v771_v16 = vld [vmem:[%s7987_s2 + $0x38] sm:$0xff]  ;;  %v57_v20 = vld [vmem:[%s7988_s3 + $0x8] sm:$0xff]  ;;  %v56_v21 = vld [vmem:[%s7988_s3] sm:$0xff] }
   0xe   :  { %179 = vmatpush.msra.mxu0 %v61_v13  ;;  %v775_v17 = vld [vmem:[%s7987_s2 + $0x58] sm:$0xff]  ;;  %v24_v22 = vld [vmem:[%s7985_s0] sm:$0xff]  ;;  %v774_v23 = vld [vmem:[%s7987_s2 + $0x50] sm:$0xff] }
   0xf   :  { %v778_v24 = vld [vmem:[%s7987_s2 + $0x70] sm:$0xff]  ;;  %v25_v26 = vld [vmem:[%s7985_s0 + $0x8] sm:$0xff]  ;;  %v780_v31 = vld [vmem:[%s7987_s2 + $0x80] sm:$0xff] }
  0x10   :  { %180 = vmatpush.msra.mxu0 %v60_v14  ;;  %v770_v25 = vld [vmem:[%s7987_s2 + $0x30] sm:$0xff]  ;;  %v777_v27 = vld [vmem:[%s7987_s2 + $0x68] sm:$0xff]  ;;  %v784_v32 = vld [vmem:[%s7987_s2 + $0xa0] sm:$0xff] }
  0x11   :  { %v781_v28 = vld [vmem:[%s7987_s2 + $0x88] sm:$0xff]  ;;  %v26_v30 = vld [vmem:[%s7985_s0 + $0x10] sm:$0xff]  ;;  %v776_v33 = vld [vmem:[%s7987_s2 + $0x60] sm:$0xff] }
  0x12   :  { %181 = vmatpush.msra.mxu0 %v59_v15  ;;  %v773_v29 = vld [vmem:[%s7987_s2 + $0x48] sm:$0xff]  ;;  %v27_v34 = vld [vmem:[%s7985_s0 + $0x18] sm:$0xff]  ;;  %v28_v38 = vld [vmem:[%s7985_s0 + $0x20] sm:$0xff] }
  0x13   :  { %818 = vperm.xlu1 %3811, %v771_v16   ;;  %830 = vperm.xlu0 %3810, %v775_v17   ;;  %v783_v35 = vld [vmem:[%s7987_s2 + $0x98] sm:$0xff]  ;;  %v786_v39 = vld [vmem:[%s7987_s2 + $0xb0] sm:$0xff]  ;;  %v29_v42 = vld [vmem:[%s7985_s0 + $0x28] sm:$0xff] }
  0x14   :  { %809 = vperm.xlu2 %3809, %v768_v18   ;;  %182 = vmatpush.msra.mxu0 %v58_v19  ;;  %v787_v36 = vld [vmem:[%s7987_s2 + $0xb8] sm:$0xff]  ;;  %v790_v40 = vld [vmem:[%s7987_s2 + $0xd0] sm:$0xff]  ;;  %v789_v43 = vld [vmem:[%s7987_s2 + $0xc8] sm:$0xff] }
  0x15   :  { %v779_v37 = vld [vmem:[%s7987_s2 + $0x78] sm:$0xff]  ;;  %v782_v41 = vld [vmem:[%s7987_s2 + $0x90] sm:$0xff]  ;;  %v793_v44 = vld [vmem:[%s7987_s2 + $0xe8] sm:$0xff] }
  0x16   :  { %183 = vmatpush.msra.mxu0 %v57_v20  ;;  %v785_v45 = vld [vmem:[%s7987_s2 + $0xa8] sm:$0xff]  ;;  %v30_v46 = vld [vmem:[%s7985_s0 + $0x30] sm:$0xff]  ;;  %v792_v47 = vld [vmem:[%s7987_s2 + $0xe0] sm:$0xff] }
  0x17   :  { %v788_v48 = vld [vmem:[%s7987_s2 + $0xc0] sm:$0xff]  ;;  %v31_v49 = vld [vmem:[%s7985_s0 + $0x38] sm:$0xff]  ;;  %v794_v53 = vld [vmem:[%s7987_s2 + $0xf0] sm:$0xff] }
  0x18   :  { %184 = vmatpush.msra.mxu0 %v56_v21  ;;  %v795_v50 = vld [vmem:[%s7987_s2 + $0xf8] sm:$0xff]  ;;  %v32_v52 = vld [vmem:[%s7985_s0 + $0x40] sm:$0xff]  ;;  %v33_v54 = vld [vmem:[%s7985_s0 + $0x48] sm:$0xff] }
  0x19   :  { %3646 = vmatmul.msk.f32.vlgmr.msra.gmra.mxu0 %vm72_vm0, %v24_v22  ;;  %v791_v51 = vld [vmem:[%s7987_s2 + $0xd8] sm:$0xff]  ;;  %v34_v55 = vld [vmem:[%s7985_s0 + $0x50] sm:$0xff]  ;;  %v36_v57 = vld [vmem:[%s7985_s0 + $0x60] sm:$0xff] }
  0x1a   :  { %v35_v56 = vld [vmem:[%s7985_s0 + $0x58] sm:$0xff]  ;;  %v37_v58 = vld [vmem:[%s7985_s0 + $0x68] sm:$0xff]  ;;  %v38_v59 = vld [vmem:[%s7985_s0 + $0x70] sm:$0xff] }
  0x1b   :  { %827 = vperm.xlu1 %3811, %v774_v23   ;;  %839 = vperm.xlu0 %3810, %v778_v24   ;;  %v39_v60 = vld [vmem:[%s7985_s0 + $0x78] sm:$0xff]  ;;  %v4554_v61 = vld [vmem:[%s7989_s4] ss:$0 sm:$0xff]  ;;  %v41_v3 = vld [vmem:[%s7985_s0 + $0x88] sm:$0xff] }
  0x1c   :  { %815 = vperm.xlu2 %3809, %v770_v25   ;;  %v40_v63 = vld [vmem:[%s7985_s0 + $0x80] sm:$0xff]  ;;  %v42_v7 = vld [vmem:[%s7985_s0 + $0x90] sm:$0xff]  ;;  %v43_v11 = vld [vmem:[%s7985_s0 + $0x98] sm:$0xff] }
  0x1d   :  { %v44_v17 = vld [vmem:[%s7985_s0 + $0xa0] sm:$0xff]  ;;  %v45_v23 = vld [vmem:[%s7985_s0 + $0xa8] sm:$0xff] }
  0x21   :  { %3647 = vmatmul.msk.f32.gmra.mxu0 %vm72_vm0, %v25_v26 }
  0x23   :  { %836 = vperm.xlu1 %3811, %v777_v27   ;;  %848 = vperm.xlu0 %3810, %v781_v28  }
  0x24   :  { %824 = vperm.xlu2 %3809, %v773_v29  }
  0x29   :  { %3648 = vmatmul.msk.f32.gmra.mxu0 %vm72_vm0, %v26_v30  ;;  %v46_v30 = vld [vmem:[%s7985_s0 + $0xb0] sm:$0xff] }
  0x2b   :  { %845 = vperm.xlu1 %3811, %v780_v31   ;;  %857 = vperm.xlu0 %3810, %v784_v32  }
  0x2c   :  { %833 = vperm.xlu2 %3809, %v776_v33  }
  0x31   :  { %3649 = vmatmul.msk.f32.gmra.mxu0 %vm72_vm0, %v27_v34 }
  0x33   :  { %854 = vperm.xlu1 %3811, %v783_v35   ;;  %866 = vperm.xlu0 %3810, %v787_v36   ;;  %v47_v36 = vld [vmem:[%s7985_s0 + $0xb8] sm:$0xff] }
  0x34   :  { %842 = vperm.xlu2 %3809, %v779_v37  }
  0x39   :  { %3650 = vmatmul.msk.f32.gmra.mxu0 %vm72_vm0, %v28_v38 }
  0x3b   :  { %863 = vperm.xlu1 %3811, %v786_v39   ;;  %875 = vperm.xlu0 %3810, %v790_v40  }
  0x3c   :  { %851 = vperm.xlu2 %3809, %v782_v41  }
  0x41   :  { %3651 = vmatmul.msk.f32.gmra.mxu0 %vm72_vm0, %v29_v42 }
  0x43   :  { %872 = vperm.xlu1 %3811, %v789_v43   ;;  %884 = vperm.xlu0 %3810, %v793_v44   ;;  %v48_v43 = vld [vmem:[%s7985_s0 + $0xc0] sm:$0xff] }
  0x44   :  { %860 = vperm.xlu2 %3809, %v785_v45  }
  0x49   :  { %3652 = vmatmul.msk.f32.gmra.mxu0 %vm72_vm0, %v30_v46 }
  0x4b   :  { %881 = vperm.xlu1 %3811, %v792_v47  }
  0x4c   :  { %869 = vperm.xlu2 %3809, %v788_v48  }
  0x51   :  { %3653 = vmatmul.msk.f32.gmra.mxu0 %vm72_vm0, %v31_v49  ;;  %v49_v49 = vld [vmem:[%s7985_s0 + $0xc8] sm:$0xff] }
  0x53   :  { %890 = vperm.xlu1 %3811, %v795_v50  }
  0x54   :  { %878 = vperm.xlu2 %3809, %v791_v51  }
  0x59   :  { %3654 = vmatmul.msk.f32.gmra.mxu0 %vm72_vm0, %v32_v52 }
  0x5c   :  { %887 = vperm.xlu2 %3809, %v794_v53  }
  0x5e   :  { %v4599_v18 = vpop.permute.xlu2 %797 }
  0x5f   :  { %8240 = vst [vmem:[#allocation7_spill] sm:$0xff] %v4599_v18 }
  0x61   :  { %3655 = vmatmul.msk.f32.gmra.mxu0 %vm72_vm0, %v33_v54  ;;  %v50_v54 = vld [vmem:[%s7985_s0 + $0xd0] sm:$0xff] }
  0x66   :  { %v4617_v26 = vpop.permute.xlu2 %806 }
  0x67   :  { %8243 = vst [vmem:[#allocation10_spill] sm:$0xff] %v4617_v26 }
  0x69   :  { %3656 = vmatmul.msk.f32.gmra.mxu0 %vm72_vm0, %v34_v55 }
  0x6e   :  { %v4635_v34 = vpop.permute.xlu2 %809 }
  0x6f   :  { %8246 = vst [vmem:[#allocation13_spill] sm:$0xff] %v4635_v34 }
  0x71   :  { %3657 = vmatmul.msk.f32.gmra.mxu0 %vm72_vm0, %v35_v56  ;;  %v971_v56 = vld [vmem:[%s7990_s5 + $0x78] sm:$0xff] }
  0x72   :  { %972 = vmatpush.msra.mxu1 %v971_v56  ;;  %v963_v56 = vld [vmem:[%s7990_s5 + $0x38] sm:$0xff] }
  0x75   :  { %v4589_v13 = vpop.permute.xlu1 %803  ;;  %v4594_v15 = vpop.permute.xlu0 %800 }
  0x76   :  { %8238 = vst [vmem:[#allocation5_spill] sm:$0xff] %v4589_v13  ;;  %v4650_v41 = vpop.permute.xlu2 %815 }
  0x77   :  { %8239 = vst [vmem:[#allocation6_spill] sm:$0xff] %v4594_v15 }
  0x78   :  { %8249 = vst [vmem:[#allocation16_spill] sm:$0xff] %v4650_v41 }
  0x79   :  { %3658 = vmatmul.msk.f32.gmra.mxu0 %vm72_vm0, %v36_v57  ;;  %v3725_v57 = vld [vmem:[%s7990_s5 + $0xf8] sm:$0xff] }
  0x7a   :  { %1864 = vmatpush.msra.mxu2 %v3725_v57  ;;  %v3717_v57 = vld [vmem:[%s7990_s5 + $0xb8] sm:$0xff] }
  0x7d   :  { %v4607_v21 = vpop.permute.xlu1 %812  ;;  %v4615_v25 = vpop.permute.xlu0 %821 }
  0x7e   :  { %8241 = vst [vmem:[#allocation8_spill] sm:$0xff] %v4607_v21  ;;  %v4668_v50 = vpop.permute.xlu2 %824 }
  0x7f   :  { %8242 = vst [vmem:[#allocation9_spill] sm:$0xff] %v4615_v25 }
  0x80   :  { %8252 = vst [vmem:[#allocation19_spill] sm:$0xff] %v4668_v50 }
  0x81   :  { %3659 = vmatmul.msk.f32.gmra.mxu0 %vm72_vm0, %v37_v58  ;;  %v3773_v58 = vld [vmem:[%s7990_s5 + $0x178] sm:$0xff] }
  0x82   :  { %2755 = vmatpush.msra.mxu3 %v3773_v58  ;;  %v3765_v58 = vld [vmem:[%s7990_s5 + $0x138] sm:$0xff] }
  0x85   :  { %v4622_v28 = vpop.permute.xlu1 %818  ;;  %v4633_v33 = vpop.permute.xlu0 %830 }
  0x86   :  { %8244 = vst [vmem:[#allocation11_spill] sm:$0xff] %v4622_v28 }
  0x87   :  { %8245 = vst [vmem:[#allocation12_spill] sm:$0xff] %v4633_v33 }
  0x89   :  { %3660 = vmatmul.msk.f32.gmra.mxu0 %vm72_vm0, %v38_v59 }
  0x8d   :  { %v4640_v37 = vpop.permute.xlu1 %827  ;;  %v4648_v40 = vpop.permute.xlu0 %839 }
  0x8e   :  { %8247 = vst [vmem:[#allocation14_spill] sm:$0xff] %v4640_v37 }
  0x8f   :  { %8248 = vst [vmem:[#allocation15_spill] sm:$0xff] %v4648_v40 }
  0x91   :  { %3661 = vmatmul.msk.f32.gmra.mxu0 %vm72_vm0, %v39_v60  ;;  %v970_v60 = vld [vmem:[%s7990_s5 + $0x70] sm:$0xff] }
  0x92   :  { %973 = vmatpush.msra.mxu1 %v970_v60 }
  0x95   :  { %v4658_v45 = vpop.permute.xlu1 %836  ;;  %v4663_v47 = vpop.permute.xlu0 %848 }
  0x96   :  { %v186_v62 = vpop.f32.mrf.mxu0  ;;  %8250 = vst [vmem:[#allocation17_spill] sm:$0xff] %v4658_v45 }
  0x97   :  { %v4560_v0 = vadd.f32 %v4554_v61, %v186_v62  ;;  %8251 = vst [vmem:[#allocation18_spill] sm:$0xff] %v4663_v47  ;;  %v3724_v62 = vld [vmem:[%s7990_s5 + $0xf0] sm:$0xff] }
  0x98   :  { %1865 = vmatpush.msra.mxu2 %v3724_v62 }
  0x99   :  { %3662 = vmatmul.msk.f32.gmra.mxu0 %vm72_vm0, %v40_v63  ;;  %v282_v1 = vmul.f32 %v4560_v0, %v4560_v0  ;;  %v3772_v63 = vld [vmem:[%s7990_s5 + $0x170] sm:$0xff] }
  0x9a   :  { %2756 = vmatpush.msra.mxu3 %v3772_v63  ;;  %v962_v63 = vld [vmem:[%s7990_s5 + $0x30] sm:$0xff] }
  0x9b   :  { %314 = vadd.xlane.f32.xlu0 %v282_v1 }
  0x9d   :  { %v4676_v53 = vpop.permute.xlu1 %845  ;;  %v4702_v1 = vpop.permute.xlu0 %857 }
  0x9e   :  { %v189_v2 = vpop.f32.mrf.mxu0  ;;  %8253 = vst [vmem:[#allocation20_spill] sm:$0xff] %v4676_v53 }
  0x9f   :  { %v4569_v4 = vadd.f32 %v4554_v61, %v189_v2  ;;  %8254 = vst [vmem:[#allocation21_spill] sm:$0xff] %v4702_v1  ;;  %v4704_v2 = vpop.permute.xlu2 %833 }
  0xa0   :  { %8255 = vst [vmem:[#allocation22_spill] sm:$0xff] %v4704_v2 }
  0xa1   :  { %3663 = vmatmul.msk.f32.gmra.mxu0 %vm72_vm0, %v41_v3  ;;  %v283_v5 = vmul.f32 %v4569_v4, %v4569_v4 }
  0xa3   :  { %316 = vadd.xlane.f32.xlu0 %v283_v5  ;;  %v969_v5 = vld [vmem:[%s7990_s5 + $0x68] sm:$0xff] }
  0xa4   :  { %974 = vmatpush.msra.mxu1 %v969_v5  ;;  %v3764_v5 = vld [vmem:[%s7990_s5 + $0x130] sm:$0xff] }
  0xa6   :  { %v192_v6 = vpop.f32.mrf.mxu0 }
  0xa7   :  { %v4578_v8 = vadd.f32 %v4554_v61, %v192_v6  ;;  %v3723_v6 = vld [vmem:[%s7990_s5 + $0xe8] sm:$0xff] }
  0xa8   :  { %1866 = vmatpush.msra.mxu2 %v3723_v6 }
  0xa9   :  { %3664 = vmatmul.msk.f32.gmra.mxu0 %vm72_vm0, %v42_v7  ;;  %v284_v9 = vmul.f32 %v4578_v8, %v4578_v8  ;;  %v3771_v7 = vld [vmem:[%s7990_s5 + $0x168] sm:$0xff] }
  0xaa   :  { %2757 = vmatpush.msra.mxu3 %v3771_v7  ;;  %v961_v7 = vld [vmem:[%s7990_s5 + $0x28] sm:$0xff] }
  0xab   :  { %318 = vadd.xlane.f32.xlu1 %v284_v9  ;;  %v968_v9 = vld [vmem:[%s7990_s5 + $0x60] sm:$0xff] }
  0xac   :  { %975 = vmatpush.msra.mxu1 %v968_v9  ;;  %v3715_v9 = vld [vmem:[%s7990_s5 + $0xa8] sm:$0xff] }
  0xae   :  { %v195_v10 = vpop.f32.mrf.mxu0 }
  0xaf   :  { %v4587_v12 = vadd.f32 %v4554_v61, %v195_v10  ;;  %v3722_v10 = vld [vmem:[%s7990_s5 + $0xe0] sm:$0xff] }
  0xb0   :  { %1867 = vmatpush.msra.mxu2 %v3722_v10  ;;  %v3763_v10 = vld [vmem:[%s7990_s5 + $0x128] sm:$0xff] }
  0xb1   :  { %3665 = vmatmul.msk.f32.gmra.mxu0 %vm72_vm0, %v43_v11  ;;  %v285_v14 = vmul.f32 %v4587_v12, %v4587_v12  ;;  %v3770_v11 = vld [vmem:[%s7990_s5 + $0x160] sm:$0xff] }
  0xb2   :  { %2758 = vmatpush.msra.mxu3 %v3770_v11 }
  0xb3   :  { %320 = vadd.xlane.f32.xlu1 %v285_v14  ;;  %v4727_v14 = vpop.permute.xlu1 %854 }
  0xb4   :  { %8256 = vst [vmem:[#allocation23_spill] sm:$0xff] %v4727_v14 }
  0xb6   :  { %v198_v16 = vpop.f32.mrf.mxu0 }
  0xb7   :  { %v4602_v19 = vadd.f32 %v4554_v61, %v198_v16  ;;  %v51_v16 = vld [vmem:[%s7985_s0 + $0xd8] sm:$0xff] }
  0xb9   :  { %3666 = vmatmul.msk.f32.gmra.mxu0 %vm72_vm0, %v44_v17  ;;  %v286_v20 = vmul.f32 %v4602_v19, %v4602_v19 }
  0xbb   :  { %322 = vadd.xlane.f32.xlu2 %v286_v20  ;;  %v967_v20 = vld [vmem:[%s7990_s5 + $0x58] sm:$0xff]  ;;  %v4790_v60 = vpop.permute.xlu1 %863 }
  0xbc   :  { %976 = vmatpush.msra.mxu1 %v967_v20  ;;  %8259 = vst [vmem:[#allocation26_spill] sm:$0xff] %v4790_v60  ;;  %v3762_v20 = vld [vmem:[%s7990_s5 + $0x120] sm:$0xff] }
  0xbe   :  { %v201_v22 = vpop.f32.mrf.mxu0 }
  0xbf   :  { %v4613_v24 = vadd.f32 %v4554_v61, %v201_v22  ;;  %v3721_v22 = vld [vmem:[%s7990_s5 + $0xd8] sm:$0xff] }
  0xc0   :  { %1868 = vmatpush.msra.mxu2 %v3721_v22 }
  0xc1   :  { %3667 = vmatmul.msk.f32.gmra.mxu0 %vm72_vm0, %v45_v23  ;;  %v287_v27 = vmul.f32 %v4613_v24, %v4613_v24  ;;  %v3769_v23 = vld [vmem:[%s7990_s5 + $0x158] sm:$0xff] }
  0xc2   :  { %2759 = vmatpush.msra.mxu3 %v3769_v23  ;;  %v53_v23 = vld [vmem:[%s7985_s0 + $0xe8] sm:$0xff] }
  0xc3   :  { %324 = vadd.xlane.f32.xlu2 %v287_v27 }
  0xc6   :  { %v204_v29 = vpop.f32.mrf.mxu0 }
  0xc7   :  { %v4628_v31 = vadd.f32 %v4554_v61, %v204_v29  ;;  %v966_v29 = vld [vmem:[%s7990_s5 + $0x50] sm:$0xff] }
  0xc8   :  { %977 = vmatpush.msra.mxu1 %v966_v29 }
  0xc9   :  { %3668 = vmatmul.msk.f32.gmra.mxu0 %vm72_vm0, %v46_v30  ;;  %v288_v32 = vmul.f32 %v4628_v31, %v4628_v31  ;;  %v3720_v30 = vld [vmem:[%s7990_s5 + $0xd0] sm:$0xff] }
  0xca   :  { %1869 = vmatpush.msra.mxu2 %v3720_v30  ;;  %v959_v30 = vld [vmem:[%s7990_s5 + $0x18] sm:$0xff] }
  0xcb   :  { %326 = vadd.xlane.f32.xlu0 %v288_v32  ;;  %v3768_v32 = vld [vmem:[%s7990_s5 + $0x150] sm:$0xff] }
  0xcc   :  { %2760 = vmatpush.msra.mxu3 %v3768_v32  ;;  %v3713_v32 = vld [vmem:[%s7990_s5 + $0x98] sm:$0xff] }
  0xce   :  { %v207_v35 = vpop.f32.mrf.mxu0 }
  0xcf   :  { %v4643_v38 = vadd.f32 %v4554_v61, %v207_v35 }
  0xd1   :  { %3669 = vmatmul.msk.f32.gmra.mxu0 %vm72_vm0, %v47_v36  ;;  %v289_v39 = vmul.f32 %v4643_v38, %v4643_v38  ;;  %v4756_v36 = vpop.permute.xlu0 %866 }
  0xd2   :  { %8257 = vst [vmem:[#allocation24_spill] sm:$0xff] %v4756_v36 }
  0xd3   :  { %328 = vadd.xlane.f32.xlu1 %v289_v39  ;;  %v965_v39 = vld [vmem:[%s7990_s5 + $0x48] sm:$0xff] }
  0xd4   :  { %978 = vmatpush.msra.mxu1 %v965_v39 }
  0xd6   :  { %v210_v42 = vpop.f32.mrf.mxu0 }
  0xd7   :  { %v4656_v44 = vadd.f32 %v4554_v61, %v210_v42  ;;  %v3719_v42 = vld [vmem:[%s7990_s5 + $0xc8] sm:$0xff] }
  0xd8   :  { %1870 = vmatpush.msra.mxu2 %v3719_v42  ;;  %v958_v42 = vld [vmem:[%s7990_s5 + $0x10] sm:$0xff] }
  0xd9   :  { %3670 = vmatmul.msk.f32.gmra.mxu0 %vm72_vm0, %v48_v43  ;;  %v290_v46 = vmul.f32 %v4656_v44, %v4656_v44  ;;  %v3767_v43 = vld [vmem:[%s7990_s5 + $0x148] sm:$0xff]  ;;  %v4816_v11 = vpop.permute.xlu0 %875 }
  0xda   :  { %2761 = vmatpush.msra.mxu3 %v3767_v43  ;;  %8260 = vst [vmem:[#allocation27_spill] sm:$0xff] %v4816_v11  ;;  %v3712_v43 = vld [vmem:[%s7990_s5 + $0x90] sm:$0xff] }
  0xdb   :  { %330 = vadd.xlane.f32.xlu2 %v290_v46  ;;  %v4767_v46 = vpop.permute.xlu2 %842 }
  0xdc   :  { %8258 = vst [vmem:[#allocation25_spill] sm:$0xff] %v4767_v46 }
  0xde   :  { %v213_v48 = vpop.f32.mrf.mxu0 }
  0xdf   :  { %v4671_v51 = vadd.f32 %v4554_v61, %v213_v48  ;;  %v964_v48 = vld [vmem:[%s7990_s5 + $0x40] sm:$0xff] }
  0xe0   :  { %979 = vmatpush.msra.mxu1 %v964_v48  ;;  %v3760_v48 = vld [vmem:[%s7990_s5 + $0x110] sm:$0xff] }
  0xe1   :  { %3671 = vmatmul.msk.f32.gmra.mxu0 %vm72_vm0, %v49_v49  ;;  %v291_v52 = vmul.f32 %v4671_v51, %v4671_v51  ;;  %v3718_v49 = vld [vmem:[%s7990_s5 + $0xc0] sm:$0xff] }
  0xe2   :  { %1871 = vmatpush.msra.mxu2 %v3718_v49  ;;  %980 = vmatpush.msra.mxu1 %v963_v56  ;;  %v4853_v49 = vpop.permute.xlu1 %872  ;;  %v3759_v56 = vld [vmem:[%s7990_s5 + $0x108] sm:$0xff] }
  0xe3   :  { %332 = vadd.xlane.f32.xlu0 %v291_v52  ;;  %v3766_v52 = vld [vmem:[%s7990_s5 + $0x140] sm:$0xff]  ;;  %v4827_v22 = vpop.permute.xlu2 %851  ;;  %8262 = vst [vmem:[#allocation29_spill] sm:$0xff] %v4853_v49 }
  0xe4   :  { %2762 = vmatpush.msra.mxu3 %v3766_v52  ;;  %1872 = vmatpush.msra.mxu2 %v3717_v57  ;;  %8261 = vst [vmem:[#allocation28_spill] sm:$0xff] %v4827_v22  ;;  %v956_v57 = vld [vmem:[%s7990_s5] sm:$0xff] }
  0xe5   :  { %981 = vmatpush.msra.mxu1 %v962_v63  ;;  %v3758_v63 = vld [vmem:[%s7990_s5 + $0x100] sm:$0xff] }
  0xe6   :  { %v216_v55 = vpop.f32.mrf.mxu0  ;;  %2763 = vmatpush.msra.mxu3 %v3765_v58  ;;  %v3710_v58 = vld [vmem:[%s7990_s5 + $0x80] sm:$0xff] }
  0xe7   :  { %v4691_v59 = vadd.f32 %v4554_v61, %v216_v55  ;;  %982 = vmatpush.msra.mxu1 %v961_v7 }
  0xe8   :  { %2764 = vmatpush.msra.mxu3 %v3764_v5 }
  0xe9   :  { %3672 = vmatmul.msk.f32.gmra.mxu0 %vm72_vm0, %v50_v54  ;;  %v292_v3 = vmul.f32 %v4691_v59, %v4691_v59  ;;  %v52_v54 = vld [vmem:[%s7985_s0 + $0xe0] sm:$0xff] }
  0xea   :  { %2765 = vmatpush.msra.mxu3 %v3763_v10 }
  0xeb   :  { %334 = vadd.xlane.f32.xlu1 %v292_v3  ;;  %v3716_v3 = vld [vmem:[%s7990_s5 + $0xb0] sm:$0xff]  ;;  %v4881_v7 = vpop.permute.xlu2 %860 }
  0xec   :  { %1873 = vmatpush.msra.mxu2 %v3716_v3  ;;  %2766 = vmatpush.msra.mxu3 %v3762_v20  ;;  %v4876_v3 = vpop.permute.xlu0 %884  ;;  %8264 = vst [vmem:[#allocation31_spill] sm:$0xff] %v4881_v7 }
  0xed   :  { %8263 = vst [vmem:[#allocation30_spill] sm:$0xff] %v4876_v3 }
  0xee   :  { %v219_v17 = vpop.f32.mrf.mxu0  ;;  %1874 = vmatpush.msra.mxu2 %v3715_v9 }
  0xef   :  { %v4742_v27 = vadd.f32 %v4554_v61, %v219_v17  ;;  %v3714_v17 = vld [vmem:[%s7990_s5 + $0xa0] sm:$0xff] }
  0xf0   :  { %1875 = vmatpush.msra.mxu2 %v3714_v17 }
  0xf1   :  { %3673 = vmatmul.msk.f32.gmra.mxu0 %vm72_vm0, %v51_v16  ;;  %v293_v35 = vmul.f32 %v4742_v27, %v4742_v27  ;;  %v960_v16 = vld [vmem:[%s7990_s5 + $0x20] sm:$0xff] }
  0xf2   :  { %983 = vmatpush.msra.mxu1 %v960_v16  ;;  %1876 = vmatpush.msra.mxu2 %v3713_v32  ;;  %v4889_v16 = vpop.permute.xlu1 %881 }
  0xf3   :  { %336 = vadd.xlane.f32.xlu2 %v293_v35  ;;  %v3761_v35 = vld [vmem:[%s7990_s5 + $0x118] sm:$0xff]  ;;  %8265 = vst [vmem:[#allocation32_spill] sm:$0xff] %v4889_v16  ;;  %v4897_v32 = vpop.permute.xlu2 %869 }
  0xf4   :  { %984 = vmatpush.msra.mxu1 %v959_v30  ;;  %2767 = vmatpush.msra.mxu3 %v3761_v35  ;;  %8266 = vst [vmem:[#allocation33_spill] sm:$0xff] %v4897_v32 }
  0xf5   :  { %1877 = vmatpush.msra.mxu2 %v3712_v43 }
  0xf6   :  { %v222_v55 = vpop.f32.mrf.mxu0  ;;  %985 = vmatpush.msra.mxu1 %v958_v42  ;;  %2768 = vmatpush.msra.mxu3 %v3760_v48 }
  0xf7   :  { %v4793_v62 = vadd.f32 %v4554_v61, %v222_v55  ;;  %v3711_v55 = vld [vmem:[%s7990_s5 + $0x88] sm:$0xff] }
  0xf8   :  { %1878 = vmatpush.msra.mxu2 %v3711_v55  ;;  %2769 = vmatpush.msra.mxu3 %v3759_v56 }
  0xf9   :  { %3674 = vmatmul.msk.f32.gmra.mxu0 %vm72_vm0, %v52_v54  ;;  %v294_v6 = vmul.f32 %v4793_v62, %v4793_v62  ;;  %v957_v54 = vld [vmem:[%s7990_s5 + $0x8] sm:$0xff] }
  0xfa   :  { %986 = vmatpush.msra.mxu1 %v957_v54  ;;  %1879 = vmatpush.msra.mxu2 %v3710_v58  ;;  %v4902_v42 = vpop.permute.xlu1 %890 }
  0xfb   :  { %338 = vadd.xlane.f32.xlu0 %v294_v6  ;;  %v54_v6 = vld [vmem:[%s7985_s0 + $0xf0] sm:$0xff]  ;;  %2770 = vmatpush.msra.mxu3 %v3758_v63  ;;  %8267 = vst [vmem:[#allocation34_spill] sm:$0xff] %v4902_v42  ;;  %v4909_v63 = vpop.permute.xlu2 %878 }
  0xfc   :  { %987 = vmatpush.msra.mxu1 %v956_v57  ;;  %8268 = vst [vmem:[#allocation35_spill] sm:$0xff] %v4909_v63 }
  0xfe   :  { %v225_v29 = vpop.f32.mrf.mxu0 }
  0xff   :  { %v4842_v39 = vadd.f32 %v4554_v61, %v225_v29 }
 0x101   :  { %3675 = vmatmul.msk.f32.gmra.mxu0 %vm72_vm0, %v53_v23  ;;  %v295_v52 = vmul.f32 %v4842_v39, %v4842_v39  ;;  %v55_v23 = vld [vmem:[%s7985_s0 + $0xf8] sm:$0xff] }
 0x103   :  { %340 = vadd.xlane.f32.xlu1 %v295_v52  ;;  %v4917_v3 = vpop.permute.xlu2 %887 }
 0x104   :  { %8269 = vst [vmem:[#allocation36_spill] sm:$0xff] %v4917_v3 }
 0x106   :  { %v228_v5 = vpop.f32.mrf.mxu0 }
 0x107   :  { %v4884_v9 = vadd.f32 %v4554_v61, %v228_v5 }
 0x109   :  { %3676 = vmatmul.msk.f32.gmra.mxu0 %vm72_vm0, %v54_v6  ;;  %v296_v10 = vmul.f32 %v4884_v9, %v4884_v9 }
 0x10b   :  { %342 = vadd.xlane.f32.xlu2 %v296_v10 }
 0x10e   :  { %v231_v17 = vpop.f32.mrf.mxu0  ;;  %v315_v20 = vpop.xlane.xlu0 %314 }
 0x10f   :  { %v4895_v29 = vadd.f32 %v4554_v61, %v231_v17  ;;  %v378_v30 = vadd.f32 1e-12, %v315_v20 }
 0x111   :  { %3813 = vrsqrt.f32 %v378_v30  ;;  %3677 = vmatmul.msk.f32.gmra.mxu0 %vm72_vm0, %v55_v23  ;;  %v297_v35 = vmul.f32 %v4895_v29, %v4895_v29  ;;  %vm416_vm2 = vweird.f32 %v378_v30 }
 0x113   :  { %344 = vadd.xlane.f32.xlu0 %v297_v35 }
 0x116   :  { %v234_v43 = vpop.f32.mrf.mxu0  ;;  %v317_v48 = vpop.xlane.xlu0 %316 }
 0x117   :  { %v3814_v52 = vpop.eup %3813  ;;  %v4905_v54 = vadd.f32 %v4554_v61, %v234_v43  ;;  %v379_v55 = vadd.f32 1e-12, %v317_v48 }
 0x118   :  { %v411_v56 = vmul.f32 %v3814_v52, %v378_v30  ;;  %vm417_vm1 = vweird.f32 %v3814_v52 }
 0x119   :  { %3815 = vrsqrt.f32 %v379_v55  ;;  %v298_v57 = vmul.f32 %v4905_v54, %v4905_v54  ;;  %vm418_vm3 = vmor %vm416_vm2, %vm417_vm1  ;;  %vm426_vm5 = vweird.f32 %v379_v55 }
 0x11a   :  { %v412_v58 = vmul.f32 %v3814_v52, %v411_v56 }
 0x11b   :  { %346 = vadd.xlane.f32.xlu1 %v298_v57 }
 0x11c   :  { %v413_v5 = vmul.f32 0.5, %v412_v58 }
 0x11e   :  { %v414_v6 = vsub.f32 1.5, %v413_v5  ;;  %v237_v10 = vpop.f32.mrf.mxu0  ;;  %v319_v17 = vpop.xlane.xlu1 %318 }
 0x11f   :  { %v3816_v20 = vpop.eup %3815  ;;  %v4912_v23 = vadd.f32 %v4554_v61, %v237_v10  ;;  %v380_v35 = vadd.f32 1e-12, %v319_v17 }
 0x120   :  { %v421_v43 = vmul.f32 %v3816_v20, %v379_v55  ;;  %v415_v48 = vmul.f32 %v3814_v52, %v414_v6  ;;  %vm427_vm4 = vweird.f32 %v3816_v20 }
 0x121   :  { %3817 = vrsqrt.f32 %v380_v35  ;;  %v299_v56 = vmul.f32 %v4912_v23, %v4912_v23  ;;  %vm428_vm6 = vmor %vm426_vm5, %vm427_vm4  ;;  %vm436_vm7 = vweird.f32 %v380_v35 }
 0x122   :  { %v422_v42 = vmul.f32 %v3816_v20, %v421_v43  ;;  %v419_v57 = vsel %vm418_vm3, %v3814_v52, %v415_v48 }
 0x123   :  { %348 = vadd.xlane.f32.xlu2 %v299_v56  ;;  %v730_v58 = vmul.f32 %v419_v57, %v4560_v0 }
 0x124   :  { %v423_v5 = vmul.f32 0.5, %v422_v42 }
 0x125   :  { %988 = vmatmul.f32.vlgmr.msra.gmra.mxu1 %v730_v58  ;;  %1880 = vmatmul.f32.vlgmr.msra.gmra.mxu2 %v730_v58 }
 0x126   :  { %v424_v10 = vsub.f32 1.5, %v423_v5  ;;  %2771 = vmatmul.f32.vlgmr.msra.gmra.mxu3 %v730_v58  ;;  %v240_v30 = vpop.f32.mrf.mxu0  ;;  %v321_v17 = vpop.xlane.xlu1 %320 }
 0x127   :  { %v3818_v6 = vpop.eup %3817  ;;  %v4920_v16 = vadd.f32 %v4554_v61, %v240_v30  ;;  %v381_v63 = vadd.f32 1e-12, %v321_v17 }
 0x128   :  { %v431_v52 = vmul.f32 %v3818_v6, %v380_v35  ;;  %v425_v43 = vmul.f32 %v3816_v20, %v424_v10  ;;  %vm437_vm8 = vweird.f32 %v3818_v6 }
 0x129   :  { %3819 = vrsqrt.f32 %v381_v63  ;;  %v300_v0 = vmul.f32 %v4920_v16, %v4920_v16  ;;  %vm438_vm9 = vmor %vm436_vm7, %vm437_vm8  ;;  %vm446_vm10 = vweird.f32 %v381_v63 }
 0x12a   :  { %v432_v42 = vmul.f32 %v3818_v6, %v431_v52  ;;  %v429_v48 = vsel %vm428_vm6, %v3816_v20, %v425_v43 }
 0x12b   :  { %350 = vadd.xlane.f32.xlu0 %v300_v0  ;;  %v731_v56 = vmul.f32 %v429_v48, %v4569_v4 }
 0x12c   :  { %v433_v57 = vmul.f32 0.5, %v432_v42 }
 0x12d   :  { %991 = vmatmul.f32.gmra.mxu1 %v731_v56  ;;  %1883 = vmatmul.f32.gmra.mxu2 %v731_v56 }
 0x12e   :  { %v434_v58 = vsub.f32 1.5, %v433_v57  ;;  %2774 = vmatmul.f32.gmra.mxu3 %v731_v56  ;;  %v243_v55 = vpop.f32.mrf.mxu0  ;;  %v323_v5 = vpop.xlane.xlu2 %322 }
 0x12f   :  { %v3820_v10 = vpop.eup %3819  ;;  %v4926_v30 = vadd.f32 %v4554_v61, %v243_v55  ;;  %v382_v17 = vadd.f32 1e-12, %v323_v5 }
 0x130   :  { %v441_v52 = vmul.f32 %v3820_v10, %v381_v63  ;;  %v435_v20 = vmul.f32 %v3818_v6, %v434_v58  ;;  %vm447_vm11 = vweird.f32 %v3820_v10 }
 0x131   :  { %3821 = vrsqrt.f32 %v382_v17  ;;  %v301_v4 = vmul.f32 %v4926_v30, %v4926_v30  ;;  %vm448_vm12 = vmor %vm446_vm10, %vm447_vm11  ;;  %vm456_vm13 = vweird.f32 %v382_v17 }
 0x132   :  { %v442_v35 = vmul.f32 %v3820_v10, %v441_v52  ;;  %v439_v43 = vsel %vm438_vm9, %v3818_v6, %v435_v20 }
 0x133   :  { %352 = vadd.xlane.f32.xlu1 %v301_v4  ;;  %v732_v0 = vmul.f32 %v439_v43, %v4578_v8 }
 0x134   :  { %v443_v42 = vmul.f32 0.5, %v442_v35 }
 0x135   :  { %994 = vmatmul.f32.gmra.mxu1 %v732_v0  ;;  %1886 = vmatmul.f32.gmra.mxu2 %v732_v0 }
 0x136   :  { %v444_v48 = vsub.f32 1.5, %v443_v42  ;;  %2777 = vmatmul.f32.gmra.mxu3 %v732_v0  ;;  %v246_v56 = vpop.f32.mrf.mxu0  ;;  %v325_v57 = vpop.xlane.xlu2 %324 }
 0x137   :  { %v3822_v55 = vpop.eup %3821  ;;  %v4932_v58 = vadd.f32 %v4554_v61, %v246_v56  ;;  %v383_v5 = vadd.f32 1e-12, %v325_v57 }
 0x138   :  { %v451_v52 = vmul.f32 %v3822_v55, %v382_v17  ;;  %v445_v6 = vmul.f32 %v3820_v10, %v444_v48  ;;  %vm457_vm14 = vweird.f32 %v3822_v55 }
 0x139   :  { %3823 = vrsqrt.f32 %v383_v5  ;;  %v302_v8 = vmul.f32 %v4932_v58, %v4932_v58  ;;  %vm458_vm15 = vmor %vm456_vm13, %vm457_vm14  ;;  %vm466_vm0 = vweird.f32 %v383_v5 }
 0x13a   :  { %v452_v63 = vmul.f32 %v3822_v55, %v451_v52  ;;  %v449_v20 = vsel %vm448_vm12, %v3820_v10, %v445_v6 }
 0x13b   :  { %354 = vadd.xlane.f32.xlu2 %v302_v8  ;;  %v733_v4 = vmul.f32 %v449_v20, %v4587_v12 }
 0x13c   :  { %v453_v35 = vmul.f32 0.5, %v452_v63 }
 0x13d   :  { %997 = vmatmul.f32.gmra.mxu1 %v733_v4  ;;  %1889 = vmatmul.f32.gmra.mxu2 %v733_v4 }
 0x13e   :  { %v454_v43 = vsub.f32 1.5, %v453_v35  ;;  %2780 = vmatmul.f32.gmra.mxu3 %v733_v4  ;;  %v249_v0 = vpop.f32.mrf.mxu0  ;;  %v327_v42 = vpop.xlane.xlu0 %326 }
 0x13f   :  { %v3824_v56 = vpop.eup %3823  ;;  %v4938_v48 = vadd.f32 %v4554_v61, %v249_v0  ;;  %v384_v57 = vadd.f32 1e-12, %v327_v42 }
 0x140   :  { %v461_v52 = vmul.f32 %v3824_v56, %v383_v5  ;;  %v455_v10 = vmul.f32 %v3822_v55, %v454_v43  ;;  %vm467_vm1 = vweird.f32 %v3824_v56 }
 0x141   :  { %3825 = vrsqrt.f32 %v384_v57  ;;  %v303_v12 = vmul.f32 %v4938_v48, %v4938_v48  ;;  %vm468_vm2 = vmor %vm466_vm0, %vm467_vm1  ;;  %vm476_vm3 = vweird.f32 %v384_v57 }
 0x142   :  { %v462_v17 = vmul.f32 %v3824_v56, %v461_v52  ;;  %v459_v6 = vsel %vm458_vm15, %v3822_v55, %v455_v10 }
 0x143   :  { %356 = vadd.xlane.f32.xlu0 %v303_v12  ;;  %v734_v8 = vmul.f32 %v459_v6, %v4602_v19 }
 0x144   :  { %v463_v63 = vmul.f32 0.5, %v462_v17 }
 0x145   :  { %1000 = vmatmul.f32.gmra.mxu1 %v734_v8  ;;  %1892 = vmatmul.f32.gmra.mxu2 %v734_v8 }
 0x146   :  { %v464_v20 = vsub.f32 1.5, %v463_v63  ;;  %2783 = vmatmul.f32.gmra.mxu3 %v734_v8  ;;  %v252_v4 = vpop.f32.mrf.mxu0  ;;  %v329_v35 = vpop.xlane.xlu1 %328 }
 0x147   :  { %v3826_v0 = vpop.eup %3825  ;;  %v4944_v43 = vadd.f32 %v4554_v61, %v252_v4  ;;  %v385_v42 = vadd.f32 1e-12, %v329_v35 }
 0x148   :  { %v471_v52 = vmul.f32 %v3826_v0, %v384_v57  ;;  %v465_v55 = vmul.f32 %v3824_v56, %v464_v20  ;;  %vm477_vm4 = vweird.f32 %v3826_v0 }
 0x149   :  { %3827 = vrsqrt.f32 %v385_v42  ;;  %v304_v19 = vmul.f32 %v4944_v43, %v4944_v43  ;;  %vm478_vm5 = vmor %vm476_vm3, %vm477_vm4  ;;  %vm486_vm6 = vweird.f32 %v385_v42 }
 0x14a   :  { %v472_v5 = vmul.f32 %v3826_v0, %v471_v52  ;;  %v469_v10 = vsel %vm468_vm2, %v3824_v56, %v465_v55 }
 0x14b   :  { %358 = vadd.xlane.f32.xlu1 %v304_v19  ;;  %v735_v12 = vmul.f32 %v469_v10, %v4613_v24 }
 0x14c   :  { %v473_v17 = vmul.f32 0.5, %v472_v5 }
 0x14d   :  { %1003 = vmatmul.f32.gmra.mxu1 %v735_v12  ;;  %1895 = vmatmul.f32.gmra.mxu2 %v735_v12 }
 0x14e   :  { %v474_v6 = vsub.f32 1.5, %v473_v17  ;;  %2786 = vmatmul.f32.gmra.mxu3 %v735_v12  ;;  %v255_v8 = vpop.f32.mrf.mxu0  ;;  %v331_v63 = vpop.xlane.xlu2 %330 }
 0x14f   :  { %v3828_v4 = vpop.eup %3827  ;;  %v4950_v20 = vadd.f32 %v4554_v61, %v255_v8  ;;  %v386_v35 = vadd.f32 1e-12, %v331_v63 }
 0x150   :  { %v481_v52 = vmul.f32 %v3828_v4, %v385_v42  ;;  %v475_v56 = vmul.f32 %v3826_v0, %v474_v6  ;;  %vm487_vm7 = vweird.f32 %v3828_v4 }
 0x151   :  { %3829 = vrsqrt.f32 %v386_v35  ;;  %v305_v24 = vmul.f32 %v4950_v20, %v4950_v20  ;;  %vm488_vm8 = vmor %vm486_vm6, %vm487_vm7  ;;  %vm496_vm9 = vweird.f32 %v386_v35 }
 0x152   :  { %v482_v57 = vmul.f32 %v3828_v4, %v481_v52  ;;  %v479_v55 = vsel %vm478_vm5, %v3826_v0, %v475_v56 }
 0x153   :  { %360 = vadd.xlane.f32.xlu2 %v305_v24  ;;  %v736_v19 = vmul.f32 %v479_v55, %v4628_v31 }
 0x154   :  { %v483_v5 = vmul.f32 0.5, %v482_v57 }
 0x155   :  { %1006 = vmatmul.f32.gmra.mxu1 %v736_v19  ;;  %1898 = vmatmul.f32.gmra.mxu2 %v736_v19 }
 0x156   :  { %v484_v10 = vsub.f32 1.5, %v483_v5  ;;  %2789 = vmatmul.f32.gmra.mxu3 %v736_v19  ;;  %v258_v12 = vpop.f32.mrf.mxu0  ;;  %v333_v17 = vpop.xlane.xlu0 %332 }
 0x157   :  { %v3830_v8 = vpop.eup %3829  ;;  %v4956_v6 = vadd.f32 %v4554_v61, %v258_v12  ;;  %v387_v63 = vadd.f32 1e-12, %v333_v17 }
 0x158   :  { %v491_v52 = vmul.f32 %v3830_v8, %v386_v35  ;;  %v485_v0 = vmul.f32 %v3828_v4, %v484_v10  ;;  %vm497_vm10 = vweird.f32 %v3830_v8 }
 0x159   :  { %3831 = vrsqrt.f32 %v387_v63  ;;  %v306_v31 = vmul.f32 %v4956_v6, %v4956_v6  ;;  %vm498_vm11 = vmor %vm496_vm9, %vm497_vm10  ;;  %vm506_vm12 = vweird.f32 %v387_v63 }
 0x15a   :  { %v492_v42 = vmul.f32 %v3830_v8, %v491_v52  ;;  %v489_v56 = vsel %vm488_vm8, %v3828_v4, %v485_v0 }
 0x15b   :  { %362 = vadd.xlane.f32.xlu0 %v306_v31  ;;  %v737_v24 = vmul.f32 %v489_v56, %v4643_v38 }
 0x15c   :  { %v493_v57 = vmul.f32 0.5, %v492_v42 }
 0x15d   :  { %1009 = vmatmul.f32.gmra.mxu1 %v737_v24  ;;  %1901 = vmatmul.f32.gmra.mxu2 %v737_v24 }
 0x15e   :  { %v494_v55 = vsub.f32 1.5, %v493_v57  ;;  %2792 = vmatmul.f32.gmra.mxu3 %v737_v24  ;;  %v261_v19 = vpop.f32.mrf.mxu0  ;;  %v335_v5 = vpop.xlane.xlu1 %334 }
 0x15f   :  { %v3832_v12 = vpop.eup %3831  ;;  %v4962_v10 = vadd.f32 %v4554_v61, %v261_v19  ;;  %v388_v17 = vadd.f32 1e-12, %v335_v5 }
 0x160   :  { %v501_v52 = vmul.f32 %v3832_v12, %v387_v63  ;;  %v495_v4 = vmul.f32 %v3830_v8, %v494_v55  ;;  %vm507_vm13 = vweird.f32 %v3832_v12 }
 0x161   :  { %3833 = vrsqrt.f32 %v388_v17  ;;  %v307_v38 = vmul.f32 %v4962_v10, %v4962_v10  ;;  %vm508_vm14 = vmor %vm506_vm12, %vm507_vm13  ;;  %vm516_vm15 = vweird.f32 %v388_v17 }
 0x162   :  { %v502_v35 = vmul.f32 %v3832_v12, %v501_v52  ;;  %v499_v0 = vsel %vm498_vm11, %v3830_v8, %v495_v4 }
 0x163   :  { %364 = vadd.xlane.f32.xlu1 %v307_v38  ;;  %v738_v31 = vmul.f32 %v499_v0, %v4656_v44 }
 0x164   :  { %v503_v42 = vmul.f32 0.5, %v502_v35 }
 0x165   :  { %1012 = vmatmul.f32.gmra.mxu1 %v738_v31  ;;  %1904 = vmatmul.f32.gmra.mxu2 %v738_v31 }
 0x166   :  { %v504_v56 = vsub.f32 1.5, %v503_v42  ;;  %2795 = vmatmul.f32.gmra.mxu3 %v738_v31  ;;  %v264_v24 = vpop.f32.mrf.mxu0  ;;  %v337_v57 = vpop.xlane.xlu2 %336 }
 0x167   :  { %v3834_v19 = vpop.eup %3833  ;;  %v4968_v55 = vadd.f32 %v4554_v61, %v264_v24  ;;  %v389_v5 = vadd.f32 1e-12, %v337_v57 }
 0x168   :  { %v511_v52 = vmul.f32 %v3834_v19, %v388_v17  ;;  %v505_v8 = vmul.f32 %v3832_v12, %v504_v56  ;;  %vm517_vm0 = vweird.f32 %v3834_v19 }
 0x169   :  { %3835 = vrsqrt.f32 %v389_v5  ;;  %v308_v44 = vmul.f32 %v4968_v55, %v4968_v55  ;;  %vm518_vm1 = vmor %vm516_vm15, %vm517_vm0  ;;  %vm526_vm2 = vweird.f32 %v389_v5 }
 0x16a   :  { %v512_v63 = vmul.f32 %v3834_v19, %v511_v52  ;;  %v509_v4 = vsel %vm508_vm14, %v3832_v12, %v505_v8 }
 0x16b   :  { %366 = vadd.xlane.f32.xlu2 %v308_v44  ;;  %v739_v38 = vmul.f32 %v509_v4, %v4671_v51 }
 0x16c   :  { %v513_v35 = vmul.f32 0.5, %v512_v63 }
 0x16d   :  { %1015 = vmatmul.f32.gmra.mxu1 %v739_v38  ;;  %1907 = vmatmul.f32.gmra.mxu2 %v739_v38 }
 0x16e   :  { %v514_v0 = vsub.f32 1.5, %v513_v35  ;;  %2798 = vmatmul.f32.gmra.mxu3 %v739_v38  ;;  %v267_v31 = vpop.f32.mrf.mxu0  ;;  %v339_v42 = vpop.xlane.xlu0 %338 }
 0x16f   :  { %v3836_v24 = vpop.eup %3835  ;;  %v4974_v56 = vadd.f32 %v4554_v61, %v267_v31  ;;  %v390_v57 = vadd.f32 1e-12, %v339_v42 }
 0x170   :  { %v521_v52 = vmul.f32 %v3836_v24, %v389_v5  ;;  %v515_v12 = vmul.f32 %v3834_v19, %v514_v0  ;;  %vm527_vm3 = vweird.f32 %v3836_v24 }
 0x171   :  { %3837 = vrsqrt.f32 %v390_v57  ;;  %v309_v51 = vmul.f32 %v4974_v56, %v4974_v56  ;;  %vm528_vm4 = vmor %vm526_vm2, %vm527_vm3  ;;  %vm536_vm5 = vweird.f32 %v390_v57 }
 0x172   :  { %v522_v17 = vmul.f32 %v3836_v24, %v521_v52  ;;  %v519_v8 = vsel %vm518_vm1, %v3834_v19, %v515_v12 }
 0x173   :  { %368 = vadd.xlane.f32.xlu0 %v309_v51  ;;  %v740_v44 = vmul.f32 %v519_v8, %v4691_v59 }
 0x174   :  { %v523_v63 = vmul.f32 0.5, %v522_v17 }
 0x175   :  { %1018 = vmatmul.f32.gmra.mxu1 %v740_v44  ;;  %1910 = vmatmul.f32.gmra.mxu2 %v740_v44 }
 0x176   :  { %v524_v4 = vsub.f32 1.5, %v523_v63  ;;  %2801 = vmatmul.f32.gmra.mxu3 %v740_v44  ;;  %v270_v38 = vpop.f32.mrf.mxu0  ;;  %v341_v35 = vpop.xlane.xlu1 %340 }
 0x177   :  { %v3838_v31 = vpop.eup %3837  ;;  %v4980_v0 = vadd.f32 %v4554_v61, %v270_v38  ;;  %v391_v42 = vadd.f32 1e-12, %v341_v35 }
 0x178   :  { %v531_v52 = vmul.f32 %v3838_v31, %v390_v57  ;;  %v525_v19 = vmul.f32 %v3836_v24, %v524_v4  ;;  %vm537_vm6 = vweird.f32 %v3838_v31 }
 0x179   :  { %3839 = vrsqrt.f32 %v391_v42  ;;  %v310_v59 = vmul.f32 %v4980_v0, %v4980_v0  ;;  %vm538_vm7 = vmor %vm536_vm5, %vm537_vm6  ;;  %vm546_vm8 = vweird.f32 %v391_v42 }
 0x17a   :  { %v532_v5 = vmul.f32 %v3838_v31, %v531_v52  ;;  %v529_v12 = vsel %vm528_vm4, %v3836_v24, %v525_v19 }
 0x17b   :  { %370 = vadd.xlane.f32.xlu1 %v310_v59  ;;  %v741_v51 = vmul.f32 %v529_v12, %v4742_v27 }
 0x17c   :  { %v533_v17 = vmul.f32 0.5, %v532_v5 }
 0x17d   :  { %1021 = vmatmul.f32.gmra.mxu1 %v741_v51  ;;  %1913 = vmatmul.f32.gmra.mxu2 %v741_v51 }
 0x17e   :  { %v534_v8 = vsub.f32 1.5, %v533_v17  ;;  %2804 = vmatmul.f32.gmra.mxu3 %v741_v51  ;;  %v273_v44 = vpop.f32.mrf.mxu0  ;;  %v343_v63 = vpop.xlane.xlu2 %342 }
 0x17f   :  { %v3840_v38 = vpop.eup %3839  ;;  %v4986_v4 = vadd.f32 %v4554_v61, %v273_v44  ;;  %v392_v35 = vadd.f32 1e-12, %v343_v63 }
 0x180   :  { %v541_v52 = vmul.f32 %v3840_v38, %v391_v42  ;;  %v535_v24 = vmul.f32 %v3838_v31, %v534_v8  ;;  %vm547_vm9 = vweird.f32 %v3840_v38  ;;  %v4261_v8 = vld [vmem:[%s7989_s4] ss:$0 sm:$0xff] }
 0x181   :  { %3841 = vrsqrt.f32 %v392_v35  ;;  %v311_v27 = vmul.f32 %v4986_v4, %v4986_v4  ;;  %vm548_vm10 = vmor %vm546_vm8, %vm547_vm9  ;;  %vm556_vm11 = vweird.f32 %v392_v35 }
 0x182   :  { %v542_v57 = vmul.f32 %v3840_v38, %v541_v52  ;;  %v539_v19 = vsel %vm538_vm7, %v3838_v31, %v535_v24 }
 0x183   :  { %372 = vadd.xlane.f32.xlu2 %v311_v27  ;;  %v742_v59 = vmul.f32 %v539_v19, %v4793_v62 }
 0x184   :  { %v543_v5 = vmul.f32 0.5, %v542_v57 }
 0x185   :  { %1024 = vmatmul.f32.gmra.mxu1 %v742_v59  ;;  %1916 = vmatmul.f32.gmra.mxu2 %v742_v59 }
 0x186   :  { %v544_v61 = vsub.f32 1.5, %v543_v5  ;;  %2807 = vmatmul.f32.gmra.mxu3 %v742_v59  ;;  %v276_v12 = vpop.f32.mrf.mxu0  ;;  %v345_v51 = vpop.xlane.xlu0 %344 }
 0x187   :  { %v3842_v17 = vpop.eup %3841  ;;  %v4994_v44 = vadd.f32 %v4261_v8, %v276_v12  ;;  %v393_v31 = vadd.f32 1e-12, %v345_v51 }
 0x188   :  { %v551_v63 = vmul.f32 %v3842_v17, %v392_v35  ;;  %v545_v62 = vmul.f32 %v3840_v38, %v544_v61  ;;  %vm557_vm12 = vweird.f32 %v3842_v17 }
 0x189   :  { %3843 = vrsqrt.f32 %v393_v31  ;;  %v312_v42 = vmul.f32 %v4994_v44, %v4994_v44  ;;  %vm558_vm13 = vmor %vm556_vm11, %vm557_vm12  ;;  %vm566_vm14 = vweird.f32 %v393_v31 }
 0x18a   :  { %v552_v52 = vmul.f32 %v3842_v17, %v551_v63  ;;  %v549_v24 = vsel %vm548_vm10, %v3840_v38, %v545_v62 }
 0x18b   :  { %374 = vadd.xlane.f32.xlu0 %v312_v42  ;;  %v743_v27 = vmul.f32 %v549_v24, %v4842_v39 }
 0x18c   :  { %v553_v57 = vmul.f32 0.5, %v552_v52 }
 0x18d   :  { %1027 = vmatmul.f32.gmra.mxu1 %v743_v27  ;;  %1919 = vmatmul.f32.gmra.mxu2 %v743_v27 }
 0x18e   :  { %v554_v19 = vsub.f32 1.5, %v553_v57  ;;  %2810 = vmatmul.f32.gmra.mxu3 %v743_v27  ;;  %v279_v59 = vpop.f32.mrf.mxu0  ;;  %v347_v5 = vpop.xlane.xlu1 %346 }
 0x18f   :  { %v3844_v12 = vpop.eup %3843  ;;  %v4999_v61 = vadd.f32 %v4261_v8, %v279_v59  ;;  %v394_v51 = vadd.f32 1e-12, %v347_v5  ;;  %v762_v59 = vlaneseq }
 0x190   :  { %v561_v3 = vmul.f32 %v3844_v12, %v393_v31  ;;  %v555_v63 = vmul.f32 %v3842_v17, %v554_v19  ;;  %vm567_vm15 = vweird.f32 %v3844_v12 }
 0x191   :  { %3845 = vrsqrt.f32 %v394_v51  ;;  %v313_v39 = vmul.f32 %v4999_v61, %v4999_v61  ;;  %vm568_vm0 = vmor %vm566_vm14, %vm567_vm15  ;;  %vm576_vm1 = vweird.f32 %v394_v51  ;;  %v5005_v31 = vand.u32 127, %v762_v59 }
 0x192   :  { %v562_v38 = vmul.f32 %v3844_v12, %v561_v3  ;;  %v559_v35 = vsel %vm558_vm13, %v3842_v17, %v555_v63 }
 0x193   :  { %376 = vadd.xlane.f32.xlu1 %v313_v39  ;;  %v744_v62 = vmul.f32 %v559_v35, %v4884_v9  ;;  %8270 = vst [vmem:[#allocation37_spill] sm:$0xff] %v5005_v31  ;;  %vm1085_vm4 = vcmp.lt.s32.totalorder %v5005_v31, 25  ;;  %vm1977_vm7 = vcmp.lt.s32.totalorder %v5005_v31, 20  ;;  %vm892_vm9 = vcmp.eq.s32.totalorder %v5005_v31, %v4599_v18 }
 0x194   :  { %v563_v42 = vmul.f32 0.5, %v562_v38  ;;  %vm893_vm13 = vcmp.eq.s32.totalorder %v5005_v31, %v4594_v15 }
 0x195   :  { %1030 = vmatmul.f32.gmra.mxu1 %v744_v62  ;;  %1922 = vmatmul.f32.gmra.mxu2 %v744_v62 }
 0x196   :  { %v564_v8 = vsub.f32 1.5, %v563_v42  ;;  %2813 = vmatmul.f32.gmra.mxu3 %v744_v62  ;;  %v349_v52 = vpop.xlane.xlu2 %348 }
 0x197   :  { %v3846_v24 = vpop.eup %3845  ;;  %v395_v27 = vadd.f32 1e-12, %v349_v52 }
 0x198   :  { %v571_v57 = vmul.f32 %v3846_v24, %v394_v51  ;;  %v565_v19 = vmul.f32 %v3844_v12, %v564_v8  ;;  %vm577_vm2 = vweird.f32 %v3846_v24 }
 0x199   :  { %3847 = vrsqrt.f32 %v395_v27  ;;  %vm578_vm3 = vmor %vm576_vm1, %vm577_vm2  ;;  %vm586_vm5 = vweird.f32 %v395_v27  ;;  %vm894_vm1 = vcmp.eq.s32.totalorder %v5005_v31, %v4589_v13  ;;  %vm895_vm2 = vcmp.eq.s32.totalorder %v5005_v31, %v4617_v26 }
 0x19a   :  { %v572_v3 = vmul.f32 %v3846_v24, %v571_v57  ;;  %v569_v17 = vsel %vm568_vm0, %v3844_v12, %v565_v19 }
 0x19b   :  { %v745_v5 = vmul.f32 %v569_v17, %v4895_v29 }
 0x19c   :  { %v573_v9 = vmul.f32 0.5, %v572_v3 }
 0x19d   :  { %1033 = vmatmul.f32.gmra.mxu1 %v745_v5  ;;  %1925 = vmatmul.f32.gmra.mxu2 %v745_v5 }
 0x19e   :  { %v574_v63 = vsub.f32 1.5, %v573_v9  ;;  %2816 = vmatmul.f32.gmra.mxu3 %v745_v5  ;;  %v351_v39 = vpop.xlane.xlu0 %350 }
 0x19f   :  { %v3848_v38 = vpop.eup %3847  ;;  %v396_v35 = vadd.f32 1e-12, %v351_v39 }
 0x1a0   :  { %v581_v62 = vmul.f32 %v3848_v38, %v395_v27  ;;  %v575_v42 = vmul.f32 %v3846_v24, %v574_v63  ;;  %vm587_vm6 = vweird.f32 %v3848_v38 }
 0x1a1   :  { %3849 = vrsqrt.f32 %v396_v35  ;;  %vm588_vm8 = vmor %vm586_vm5, %vm587_vm6  ;;  %vm596_vm10 = vweird.f32 %v396_v35 }
 0x1a2   :  { %v582_v12 = vmul.f32 %v3848_v38, %v581_v62  ;;  %v989_v29 = vpop.f32.mrf.mxu1  ;;  %v579_v8 = vsel %vm578_vm3, %v3846_v24, %v575_v42 }
 0x1a3   :  { %v5010_v51 = vsel %vm1085_vm4, %v989_v29, -1e+30  ;;  %v746_v52 = vmul.f32 %v579_v8, %v4905_v54 }
 0x1a4   :  { %v583_v57 = vmul.f32 0.5, %v582_v12  ;;  %1118 = vmax.xlane.f32.xlu0 %v5010_v51  ;;  %v1438_v62 = vsel %vm892_vm9, %v5010_v51, 0.0 }
 0x1a5   :  { %1036 = vmatmul.f32.gmra.mxu1 %v746_v52  ;;  %1928 = vmatmul.f32.gmra.mxu2 %v746_v52 }
 0x1a6   :  { %v584_v19 = vsub.f32 1.5, %v583_v57  ;;  %2819 = vmatmul.f32.gmra.mxu3 %v746_v52  ;;  %v353_v59 = vpop.xlane.xlu1 %352 }
 0x1a7   :  { %v3850_v3 = vpop.eup %3849  ;;  %v397_v24 = vadd.f32 1e-12, %v353_v59 }
 0x1a8   :  { %v591_v17 = vmul.f32 %v3850_v3, %v396_v35  ;;  %v1881_v5 = vpop.f32.mrf.mxu2  ;;  %v585_v9 = vmul.f32 %v3848_v38, %v584_v19  ;;  %vm597_vm11 = vweird.f32 %v3850_v3 }
 0x1a9   :  { %3851 = vrsqrt.f32 %v397_v24  ;;  %v5017_v54 = vsel %vm1977_vm7, %v1881_v5, -1e+30  ;;  %vm598_vm12 = vmor %vm596_vm10, %vm597_vm11  ;;  %vm606_vm14 = vweird.f32 %v397_v24 }
 0x1aa   :  { %v592_v27 = vmul.f32 %v3850_v3, %v591_v17  ;;  %2010 = vmax.xlane.f32.xlu1 %v5017_v54  ;;  %v992_v63 = vpop.f32.mrf.mxu1  ;;  %v589_v39 = vsel %vm588_vm8, %v3848_v38, %v585_v9 }
 0x1ab   :  { %v5028_v42 = vsel %vm1085_vm4, %v992_v63, -1e+30  ;;  %v747_v12 = vmul.f32 %v589_v39, %v4912_v23  ;;  %v2330_v39 = vsel %vm892_vm9, %v5017_v54, 0.0 }
 0x1ac   :  { %v593_v29 = vmul.f32 0.5, %v592_v27  ;;  %1470 = vadd.xlane.f32.xlu0 %v1438_v62  ;;  %1120 = vmax.xlane.f32.xlu2 %v5028_v42  ;;  %v1439_v17 = vsel %vm893_vm13, %v5028_v42, 0.0 }
 0x1ad   :  { %1039 = vmatmul.f32.gmra.mxu1 %v747_v12  ;;  %1931 = vmatmul.f32.gmra.mxu2 %v747_v12 }
 0x1ae   :  { %v594_v38 = vsub.f32 1.5, %v593_v29  ;;  %2822 = vmatmul.f32.gmra.mxu3 %v747_v12  ;;  %v355_v8 = vpop.xlane.xlu2 %354 }
 0x1af   :  { %v3852_v52 = vpop.eup %3851  ;;  %v398_v57 = vadd.f32 1e-12, %v355_v8 }
 0x1b0   :  { %v601_v19 = vmul.f32 %v3852_v52, %v397_v24  ;;  %v1884_v59 = vpop.f32.mrf.mxu2  ;;  %v595_v23 = vmul.f32 %v3850_v3, %v594_v38  ;;  %vm607_vm15 = vweird.f32 %v3852_v52 }
 0x1b1   :  { %3853 = vrsqrt.f32 %v398_v57  ;;  %v5036_v35 = vsel %vm1977_vm7, %v1884_v59, -1e+30  ;;  %vm608_vm0 = vmor %vm606_vm14, %vm607_vm15  ;;  %vm616_vm3 = vweird.f32 %v398_v57 }
 0x1b2   :  { %v602_v5 = vmul.f32 %v3852_v52, %v601_v19  ;;  %1472 = vadd.xlane.f32.xlu1 %v1439_v17  ;;  %v995_v9 = vpop.f32.mrf.mxu1  ;;  %v2331_v27 = vsel %vm893_vm13, %v5036_v35, 0.0  ;;  %v599_v63 = vsel %vm598_vm12, %v3850_v3, %v595_v23 }
 0x1b3   :  { %v748_v62 = vmul.f32 %v599_v63, %v4920_v16  ;;  %v5053_v59 = vsel %vm1085_vm4, %v995_v9, -1e+30 }
 0x1b4   :  { %v603_v12 = vmul.f32 0.5, %v602_v5  ;;  %2362 = vadd.xlane.f32.xlu0 %v2330_v39  ;;  %2364 = vadd.xlane.f32.xlu2 %v2331_v27  ;;  %v1440_v9 = vsel %vm894_vm1, %v5053_v59, 0.0 }
 0x1b5   :  { %1042 = vmatmul.f32.gmra.mxu1 %v748_v62  ;;  %1934 = vmatmul.f32.gmra.mxu2 %v748_v62 }
 0x1b6   :  { %v604_v29 = vsub.f32 1.5, %v603_v12  ;;  %2825 = vmatmul.f32.gmra.mxu3 %v748_v62  ;;  %v357_v38 = vpop.xlane.xlu0 %356 }
 0x1b7   :  { %v3854_v8 = vpop.eup %3853  ;;  %v399_v19 = vadd.f32 1e-12, %v357_v38 }
 0x1b8   :  { %v611_v3 = vmul.f32 %v3854_v8, %v398_v57  ;;  %v1887_v23 = vpop.f32.mrf.mxu2  ;;  %v605_v16 = vmul.f32 %v3852_v52, %v604_v29  ;;  %vm617_vm5 = vweird.f32 %v3854_v8 }
 0x1b9   :  { %3855 = vrsqrt.f32 %v399_v19  ;;  %vm618_vm6 = vmor %vm616_vm3, %vm617_vm5  ;;  %vm626_vm8 = vweird.f32 %v399_v19 }
 0x1ba   :  { %v612_v24 = vmul.f32 %v3854_v8, %v611_v3  ;;  %2012 = vmax.xlane.f32.xlu1 %v5036_v35  ;;  %v998_v17 = vpop.f32.mrf.mxu1  ;;  %v609_v5 = vsel %vm608_vm0, %v3852_v52, %v605_v16  ;;  %vm8007_vm0 = vcmp.eq.s32.totalorder %v5005_v31, %v4635_v34 }
 0x1bb   :  { %v5062_v27 = vsel %vm1085_vm4, %v998_v17, -1e+30  ;;  %v749_v63 = vmul.f32 %v609_v5, %v4926_v30 }
 0x1bc   :  { %v613_v39 = vmul.f32 0.5, %v612_v24  ;;  %1474 = vadd.xlane.f32.xlu2 %v1440_v9  ;;  %v1441_v52 = vsel %vm895_vm2, %v5062_v27, 0.0 }
 0x1bd   :  { %1476 = vadd.xlane.f32.xlu0 %v1441_v52  ;;  %1045 = vmatmul.f32.gmra.mxu1 %v749_v63 }
 0x1be   :  { %v614_v62 = vsub.f32 1.5, %v613_v39  ;;  %1937 = vmatmul.f32.gmra.mxu2 %v749_v63  ;;  %2828 = vmatmul.f32.gmra.mxu3 %v749_v63  ;;  %v359_v12 = vpop.xlane.xlu1 %358 }
 0x1bf   :  { %v3856_v29 = vpop.eup %3855  ;;  %v400_v38 = vadd.f32 1e-12, %v359_v12 }
 0x1c0   :  { %v621_v3 = vmul.f32 %v3856_v29, %v399_v19  ;;  %v1890_v30 = vpop.f32.mrf.mxu2  ;;  %v615_v16 = vmul.f32 %v3854_v8, %v614_v62  ;;  %vm627_vm10 = vweird.f32 %v3856_v29 }
 0x1c1   :  { %3857 = vrsqrt.f32 %v400_v38  ;;  %v5078_v63 = vsel %vm1977_vm7, %v1890_v30, -1e+30  ;;  %vm628_vm11 = vmor %vm626_vm8, %vm627_vm10  ;;  %vm636_vm12 = vweird.f32 %v400_v38  ;;  %vm897_vm8 = vcmp.eq.s32.totalorder %v5005_v31, %v4607_v21 }
 0x1c2   :  { %v622_v57 = vmul.f32 %v3856_v29, %v621_v3  ;;  %1122 = vmax.xlane.f32.xlu1 %v5053_v59  ;;  %v1001_v24 = vpop.f32.mrf.mxu1  ;;  %v619_v17 = vsel %vm618_vm6, %v3854_v8, %v615_v16  ;;  %v5083_v3 = vsel %vm1977_vm7, %v1887_v23, -1e+30  ;;  %v2333_v23 = vsel %vm895_vm2, %v5078_v63, 0.0 }
 0x1c3   :  { %v750_v5 = vmul.f32 %v619_v17, %v4932_v58  ;;  %vm898_vm10 = vcmp.eq.s32.totalorder %v5005_v31, %v4650_v41 }
 0x1c4   :  { %v623_v9 = vmul.f32 0.5, %v622_v57  ;;  %1124 = vmax.xlane.f32.xlu2 %v5062_v27 }
 0x1c5   :  { %2016 = vmax.xlane.f32.xlu0 %v5078_v63  ;;  %1048 = vmatmul.f32.gmra.mxu1 %v750_v5 }
 0x1c6   :  { %v624_v39 = vsub.f32 1.5, %v623_v9  ;;  %1940 = vmatmul.f32.gmra.mxu2 %v750_v5  ;;  %2831 = vmatmul.f32.gmra.mxu3 %v750_v5  ;;  %v361_v52 = vpop.xlane.xlu2 %360 }
 0x1c7   :  { %v3858_v62 = vpop.eup %3857  ;;  %v401_v8 = vadd.f32 1e-12, %v361_v52 }
 0x1c8   :  { %v631_v58 = vmul.f32 %v3858_v62, %v400_v38  ;;  %v1893_v12 = vpop.f32.mrf.mxu2  ;;  %v625_v19 = vmul.f32 %v3856_v29, %v624_v39  ;;  %vm637_vm14 = vweird.f32 %v3858_v62 }
 0x1c9   :  { %3859 = vrsqrt.f32 %v401_v8  ;;  %v5088_v17 = vsel %vm1977_vm7, %v1893_v12, -1e+30  ;;  %vm638_vm15 = vmor %vm636_vm12, %vm637_vm14  ;;  %vm646_vm3 = vweird.f32 %v401_v8 }
 0x1ca   :  { %v632_v30 = vmul.f32 %v3858_v62, %v631_v58  ;;  %2014 = vmax.xlane.f32.xlu1 %v5083_v3  ;;  %v1004_v16 = vpop.f32.mrf.mxu1  ;;  %v629_v57 = vsel %vm628_vm11, %v3856_v29, %v625_v19  ;;  %v2332_v19 = vsel %vm894_vm1, %v5083_v3, 0.0 }
 0x1cb   :  { %v751_v5 = vmul.f32 %v629_v57, %v4938_v48 }
 0x1cc   :  { %v633_v9 = vmul.f32 0.5, %v632_v30  ;;  %2018 = vmax.xlane.f32.xlu2 %v5088_v17 }
 0x1cd   :  { %2368 = vadd.xlane.f32.xlu0 %v2333_v23  ;;  %1051 = vmatmul.f32.gmra.mxu1 %v751_v5 }
 0x1ce   :  { %v634_v39 = vsub.f32 1.5, %v633_v9  ;;  %1943 = vmatmul.f32.gmra.mxu2 %v751_v5  ;;  %2834 = vmatmul.f32.gmra.mxu3 %v751_v5  ;;  %v363_v29 = vpop.xlane.xlu0 %362  ;;  %v2334_v9 = vsel %vm8007_vm0, %v5088_v17, 0.0 }
 0x1cf   :  { %v3860_v52 = vpop.eup %3859  ;;  %v402_v58 = vadd.f32 1e-12, %v363_v29  ;;  %v5111_v29 = vsel %vm1085_vm4, %v1001_v24, -1e+30  ;;  %v5122_v24 = vsel %vm1085_vm4, %v1004_v16, -1e+30 }
 0x1d0   :  { %v641_v48 = vmul.f32 %v3860_v52, %v401_v8  ;;  %v5096_v12 = vpop.f32.mrf.mxu2  ;;  %v635_v38 = vmul.f32 %v3858_v62, %v634_v39  ;;  %vm647_vm5 = vweird.f32 %v3860_v52 }
 0x1d1   :  { %3861 = vrsqrt.f32 %v402_v58  ;;  %vm5114_vm6 = vmor %vm646_vm3, %vm647_vm5  ;;  %vm656_vm11 = vweird.f32 %v402_v58 }
 0x1d2   :  { %v642_v30 = vmul.f32 %v3860_v52, %v641_v48  ;;  %2366 = vadd.xlane.f32.xlu1 %v2332_v19  ;;  %v1007_v57 = vpop.f32.mrf.mxu1  ;;  %v639_v5 = vsel %vm638_vm15, %v3858_v62, %v635_v38 }
 0x1d3   :  { %v752_v23 = vmul.f32 %v639_v5, %v4944_v43  ;;  %v5118_v43 = vpop.f32.mrf.mxu3 }
 0x1d4   :  { %v643_v39 = vmul.f32 0.5, %v642_v30  ;;  %2370 = vadd.xlane.f32.xlu2 %v2334_v9  ;;  %v5126_v9 = vsel %vm1085_vm4, %v1007_v57, -1e+30  ;;  %v1443_v57 = vsel %vm897_vm8, %v5122_v24, 0.0 }
 0x1d5   :  { %1126 = vmax.xlane.f32.xlu0 %v5111_v29  ;;  %1054 = vmatmul.f32.gmra.mxu1 %v752_v23 }
 0x1d6   :  { %v644_v48 = vsub.f32 1.5, %v643_v39  ;;  %1946 = vmatmul.f32.gmra.mxu2 %v752_v23  ;;  %2837 = vmatmul.f32.gmra.mxu3 %v752_v23  ;;  %v365_v62 = vpop.xlane.xlu1 %364  ;;  %v1442_v23 = vsel %vm8007_vm0, %v5111_v29, 0.0  ;;  %vm8017_vm0 = vcmp.eq.s32.totalorder %v5005_v31, %v4704_v2 }
 0x1d7   :  { %v3862_v38 = vpop.eup %3861  ;;  %v403_v19 = vadd.f32 1e-12, %v365_v62 }
 0x1d8   :  { %v651_v8 = vmul.f32 %v3862_v38, %v402_v58  ;;  %v1899_v30 = vpop.f32.mrf.mxu2  ;;  %v645_v5 = vmul.f32 %v3860_v52, %v644_v48  ;;  %vm657_vm12 = vweird.f32 %v3862_v38 }
 0x1d9   :  { %3863 = vrsqrt.f32 %v403_v19  ;;  %vm658_vm14 = vmor %vm656_vm11, %vm657_vm12  ;;  %v5149_v58 = vsel %vm1977_vm7, %v1899_v30, -1e+30  ;;  %vm666_vm15 = vweird.f32 %v403_v19 }
 0x1da   :  { %v652_v39 = vmul.f32 %v3862_v38, %v651_v8  ;;  %1478 = vadd.xlane.f32.xlu1 %v1442_v23  ;;  %v1010_v16 = vpop.f32.mrf.mxu1  ;;  %v649_v62 = vsel %vm5114_vm6, %v3860_v52, %v645_v5  ;;  %v1444_v8 = vsel %vm898_vm10, %v5126_v9, 0.0  ;;  %v2336_v30 = vsel %vm898_vm10, %v5149_v58, 0.0 }
 0x1db   :  { %v753_v48 = vmul.f32 %v649_v62, %v4950_v20  ;;  %v5151_v62 = vpop.f32.mrf.mxu3  ;;  %vm8005_vm6 = vcmp.eq.s32.totalorder %v5005_v31, %v4622_v28 }
 0x1dc   :  { %v653_v34 = vmul.f32 0.5, %v652_v39  ;;  %1480 = vadd.xlane.f32.xlu2 %v1443_v57  ;;  %8273 = vst [vmem:[#allocation38_spill] sm:$0xff] %v5151_v62 }
 0x1dd   :  { %1482 = vadd.xlane.f32.xlu0 %v1444_v8  ;;  %1057 = vmatmul.f32.gmra.mxu1 %v753_v48 }
 0x1de   :  { %v654_v15 = vsub.f32 1.5, %v653_v34  ;;  %1949 = vmatmul.f32.gmra.mxu2 %v753_v48  ;;  %2840 = vmatmul.f32.gmra.mxu3 %v753_v48  ;;  %v367_v52 = vpop.xlane.xlu2 %366 }
 0x1df   :  { %v3864_v5 = vpop.eup %3863  ;;  %v404_v23 = vadd.f32 1e-12, %v367_v52 }
 0x1e0   :  { %v661_v26 = vmul.f32 %v3864_v5, %v403_v19  ;;  %v1902_v20 = vpop.f32.mrf.mxu2  ;;  %v655_v39 = vmul.f32 %v3862_v38, %v654_v15  ;;  %vm667_vm3 = vweird.f32 %v3864_v5 }
 0x1e1   :  { %3865 = vrsqrt.f32 %v404_v23  ;;  %vm668_vm5 = vmor %vm666_vm15, %vm667_vm3  ;;  %v5162_v19 = vsel %vm1977_vm7, %v1902_v20, -1e+30  ;;  %vm676_vm11 = vweird.f32 %v404_v23  ;;  %vm900_vm15 = vcmp.eq.s32.totalorder %v5005_v31, %v4615_v25 }
 0x1e2   :  { %v662_v57 = vmul.f32 %v3864_v5, %v661_v26  ;;  %1128 = vmax.xlane.f32.xlu1 %v5122_v24  ;;  %v659_v34 = vsel %vm658_vm14, %v3862_v38, %v655_v39  ;;  %v1013_v52 = vpop.f32.mrf.mxu1  ;;  %v2337_v20 = vsel %vm8005_vm6, %v5162_v19, 0.0  ;;  %vm8072_vm3 = vcmp.eq.s32.totalorder %v5005_v31, %v4668_v50 }
 0x1e3   :  { %v754_v48 = vmul.f32 %v659_v34, %v4956_v6 }
 0x1e4   :  { %v663_v8 = vmul.f32 0.5, %v662_v57  ;;  %1130 = vmax.xlane.f32.xlu2 %v5126_v9 }
 0x1e5   :  { %2374 = vadd.xlane.f32.xlu0 %v2336_v30  ;;  %1060 = vmatmul.f32.gmra.mxu1 %v754_v48  ;;  %v5169_v30 = vsel %vm1977_vm7, %v5096_v12, -1e+30  ;;  %v5183_v12 = vsel %vm1085_vm4, %v1010_v16, -1e+30 }
 0x1e6   :  { %v664_v15 = vsub.f32 1.5, %v663_v8  ;;  %1952 = vmatmul.f32.gmra.mxu2 %v754_v48  ;;  %2843 = vmatmul.f32.gmra.mxu3 %v754_v48  ;;  %v369_v26 = vpop.xlane.xlu0 %368 }
 0x1e7   :  { %v3866_v38 = vpop.eup %3865  ;;  %v405_v39 = vadd.f32 1e-12, %v369_v26  ;;  %v5179_v26 = vpop.f32.mrf.mxu3 }
 0x1e8   :  { %v671_v6 = vmul.f32 %v3866_v38, %v404_v23  ;;  %v665_v57 = vmul.f32 %v3864_v5, %v664_v15  ;;  %v5164_v34 = vpop.f32.mrf.mxu2  ;;  %8274 = vst [vmem:[#allocation39_spill] sm:$0xff] %v5179_v26  ;;  %vm677_vm12 = vweird.f32 %v3866_v38  ;;  %v5188_v23 = vsel %vm1085_vm4, %v1013_v52, -1e+30 }
 0x1e9   :  { %3867 = vrsqrt.f32 %v405_v39  ;;  %vm678_vm14 = vmor %vm676_vm11, %vm677_vm12 }
 0x1ea   :  { %v672_v48 = vmul.f32 %v3866_v38, %v671_v6  ;;  %2020 = vmax.xlane.f32.xlu1 %v5169_v30  ;;  %v669_v8 = vsel %vm668_vm5, %v3864_v5, %v665_v57  ;;  %v1016_v6 = vpop.f32.mrf.mxu1  ;;  %vm686_vm5 = vweird.f32 %v405_v39 }
 0x1eb   :  { %v755_v15 = vmul.f32 %v669_v8, %v4962_v10  ;;  %v5192_v16 = vsel %vm1085_vm4, %v1016_v6, -1e+30 }
 0x1ec   :  { %v673_v41 = vmul.f32 0.5, %v672_v48  ;;  %2376 = vadd.xlane.f32.xlu2 %v2337_v20 }
 0x1ed   :  { %1132 = vmax.xlane.f32.xlu0 %v5183_v12  ;;  %1063 = vmatmul.f32.gmra.mxu1 %v755_v15 }
 0x1ee   :  { %v674_v5 = vsub.f32 1.5, %v673_v41  ;;  %1955 = vmatmul.f32.gmra.mxu2 %v755_v15  ;;  %2846 = vmatmul.f32.gmra.mxu3 %v755_v15  ;;  %v371_v57 = vpop.xlane.xlu1 %370  ;;  %v2335_v41 = vsel %vm897_vm8, %v5169_v30, 0.0 }
 0x1ef   :  { %v3868_v13 = vpop.eup %3867  ;;  %v406_v10 = vadd.f32 1e-12, %v371_v57 }
 0x1f0   :  { %v681_v48 = vmul.f32 %v3868_v13, %v405_v39  ;;  %v675_v8 = vmul.f32 %v3866_v38, %v674_v5  ;;  %v1908_v52 = vpop.f32.mrf.mxu2  ;;  %v1446_v5 = vsel %vm900_vm15, %v5188_v23, 0.0  ;;  %vm687_vm11 = vweird.f32 %v3868_v13 }
 0x1f1   :  { %3869 = vrsqrt.f32 %v406_v10  ;;  %vm688_vm12 = vmor %vm686_vm5, %vm687_vm11 }
 0x1f2   :  { %v682_v20 = vmul.f32 %v3868_v13, %v681_v48  ;;  %2372 = vadd.xlane.f32.xlu1 %v2335_v41  ;;  %v679_v15 = vsel %vm678_vm14, %v3866_v38, %v675_v8  ;;  %v1447_v48 = vsel %vm8072_vm3, %v5192_v16, 0.0  ;;  %v5211_v38 = vpop.f32.mrf.mxu3  ;;  %vm696_vm14 = vweird.f32 %v406_v10 }
 0x1f3   :  { %v756_v6 = vmul.f32 %v679_v15, %v4968_v55  ;;  %8275 = vst [vmem:[#allocation40_spill] sm:$0xff] %v5211_v38 }
 0x1f4   :  { %v683_v57 = vmul.f32 0.5, %v682_v20  ;;  %1486 = vadd.xlane.f32.xlu2 %v1446_v5  ;;  %v5215_v20 = vsel %vm1977_vm7, %v1908_v52, -1e+30  ;;  %v1019_v5 = vpop.f32.mrf.mxu1 }
 0x1f5   :  { %1488 = vadd.xlane.f32.xlu0 %v1447_v48  ;;  %1066 = vmatmul.f32.gmra.mxu1 %v756_v6 }
 0x1f6   :  { %v684_v8 = vsub.f32 1.5, %v683_v57  ;;  %1958 = vmatmul.f32.gmra.mxu2 %v756_v6  ;;  %2849 = vmatmul.f32.gmra.mxu3 %v756_v6  ;;  %v373_v41 = vpop.xlane.xlu2 %372  ;;  %v2339_v6 = vsel %vm8072_vm3, %v5215_v20, 0.0 }
 0x1f7   :  { %v3870_v21 = vpop.eup %3869  ;;  %v407_v18 = vadd.f32 1e-12, %v373_v41 }
 0x1f8   :  { %v691_v55 = vmul.f32 %v3870_v21, %v406_v10  ;;  %v685_v39 = vmul.f32 %v3868_v13, %v684_v8  ;;  %vm697_vm5 = vweird.f32 %v3870_v21  ;;  %v1911_v52 = vpop.f32.mrf.mxu2 }
 0x1f9   :  { %3871 = vrsqrt.f32 %v407_v18  ;;  %vm698_vm11 = vmor %vm696_vm14, %vm697_vm5  ;;  %vm706_vm14 = vweird.f32 %v407_v18 }
 0x1fa   :  { %v692_v15 = vmul.f32 %v3870_v21, %v691_v55  ;;  %2022 = vmax.xlane.f32.xlu1 %v5149_v58  ;;  %v689_v48 = vsel %vm688_vm12, %v3868_v13, %v685_v39  ;;  %v5228_v39 = vsel %vm1977_vm7, %v1911_v52, -1e+30  ;;  %vm8018_vm12 = vcmp.eq.s32.totalorder %v5005_v31, %v4640_v37 }
 0x1fb   :  { %v757_v57 = vmul.f32 %v689_v48, %v4974_v56  ;;  %v5224_v56 = vpop.f32.mrf.mxu3 }
 0x1fc   :  { %v693_v38 = vmul.f32 0.5, %v692_v15  ;;  %1136 = vmax.xlane.f32.xlu2 %v5192_v16  ;;  %8276 = vst [vmem:[#allocation41_spill] sm:$0xff] %v5224_v56  ;;  %v1022_v28 = vpop.f32.mrf.mxu1 }
 0x1fd   :  { %2380 = vadd.xlane.f32.xlu0 %v2339_v6  ;;  %1069 = vmatmul.f32.gmra.mxu1 %v757_v57  ;;  %v2340_v6 = vsel %vm8018_vm12, %v5228_v39, 0.0 }
 0x1fe   :  { %v694_v8 = vsub.f32 1.5, %v693_v38  ;;  %1961 = vmatmul.f32.gmra.mxu2 %v757_v57  ;;  %2852 = vmatmul.f32.gmra.mxu3 %v757_v57  ;;  %v375_v41 = vpop.xlane.xlu0 %374  ;;  %v1445_v38 = vsel %vm8005_vm6, %v5183_v12, 0.0  ;;  %vm8061_vm6 = vcmp.eq.s32.totalorder %v5005_v31, %v4633_v33 }
 0x1ff   :  { %v3872_v13 = vpop.eup %3871  ;;  %v408_v55 = vadd.f32 1e-12, %v375_v41 }
 0x200   :  { %v701_v10 = vmul.f32 %v3872_v13, %v407_v18  ;;  %v695_v15 = vmul.f32 %v3870_v21, %v694_v8  ;;  %v5243_v8 = vsel %vm1085_vm4, %v1019_v5, -1e+30  ;;  %vm707_vm5 = vweird.f32 %v3872_v13  ;;  %v1914_v18 = vpop.f32.mrf.mxu2 }
 0x201   :  { %3873 = vrsqrt.f32 %v408_v55 }
 0x202   :  { %v702_v48 = vmul.f32 %v3872_v13, %v701_v10  ;;  %1484 = vadd.xlane.f32.xlu1 %v1445_v38  ;;  %v699_v57 = vsel %vm698_vm11, %v3870_v21, %v695_v15  ;;  %vm708_vm11 = vmor %vm706_vm14, %vm707_vm5  ;;  %vm716_vm14 = vweird.f32 %v408_v55 }
 0x203   :  { %v758_v52 = vmul.f32 %v699_v57, %v4980_v0  ;;  %v5248_v0 = vsel %vm1085_vm4, %v1022_v28, -1e+30  ;;  %v5252_v57 = vpop.f32.mrf.mxu3 }
 0x204   :  { %v703_v41 = vmul.f32 0.5, %v702_v48  ;;  %2382 = vadd.xlane.f32.xlu2 %v2340_v6  ;;  %8277 = vst [vmem:[#allocation42_spill] sm:$0xff] %v5252_v57  ;;  %v1025_v50 = vpop.f32.mrf.mxu1 }
 0x205   :  { %1138 = vmax.xlane.f32.xlu0 %v5243_v8  ;;  %1072 = vmatmul.f32.gmra.mxu1 %v758_v52  ;;  %v5263_v57 = vsel %vm1085_vm4, %v1025_v50, -1e+30 }
 0x206   :  { %v704_v21 = vsub.f32 1.5, %v703_v41  ;;  %1964 = vmatmul.f32.gmra.mxu2 %v758_v52  ;;  %2855 = vmatmul.f32.gmra.mxu3 %v758_v52  ;;  %v377_v10 = vpop.xlane.xlu1 %376  ;;  %v1449_v41 = vsel %vm8061_vm6, %v5248_v0, 0.0  ;;  %v1450_v50 = vsel %vm8017_vm0, %v5263_v57, 0.0 }
 0x207   :  { %v3874_v15 = vpop.eup %3873  ;;  %v409_v38 = vadd.f32 1e-12, %v377_v10 }
 0x208   :  { %v711_v5 = vmul.f32 %v3874_v15, %v408_v55  ;;  %v705_v48 = vmul.f32 %v3872_v13, %v704_v21  ;;  %vm717_vm5 = vweird.f32 %v3874_v15 }
 0x209   :  { %3875 = vrsqrt.f32 %v409_v38 }
 0x20a   :  { %v712_v6 = vmul.f32 %v3874_v15, %v711_v5  ;;  %2024 = vmax.xlane.f32.xlu1 %v5162_v19  ;;  %v709_v52 = vsel %vm708_vm11, %v3872_v13, %v705_v48  ;;  %vm718_vm11 = vmor %vm716_vm14, %vm717_vm5  ;;  %vm726_vm14 = vweird.f32 %v409_v38 }
 0x20b   :  { %v759_v28 = vmul.f32 %v709_v52, %v4986_v4  ;;  %v1917_v52 = vpop.f32.mrf.mxu2 }
 0x20c   :  { %v713_v10 = vmul.f32 0.5, %v712_v6  ;;  %1492 = vadd.xlane.f32.xlu2 %v1449_v41  ;;  %v5270_v6 = vsel %vm1977_vm7, %v1914_v18, -1e+30 }
 0x20d   :  { %2030 = vmax.xlane.f32.xlu0 %v5228_v39  ;;  %1075 = vmatmul.f32.gmra.mxu1 %v759_v28  ;;  %v2341_v26 = vsel %vm8061_vm6, %v5270_v6, 0.0 }
 0x20e   :  { %v714_v21 = vsub.f32 1.5, %v713_v10  ;;  %1967 = vmatmul.f32.gmra.mxu2 %v759_v28  ;;  %2858 = vmatmul.f32.gmra.mxu3 %v759_v28  ;;  %v5273_v28 = vpop.f32.mrf.mxu3 }
 0x20f   :  { %v3876_v5 = vpop.eup %3875  ;;  %8278 = vst [vmem:[#allocation43_spill] sm:$0xff] %v5273_v28 }
 0x210   :  { %v721_v13 = vmul.f32 %v3876_v5, %v409_v38  ;;  %v715_v48 = vmul.f32 %v3874_v15, %v714_v21  ;;  %vm727_vm5 = vweird.f32 %v3876_v5  ;;  %v5285_v38 = vsel %vm1977_vm7, %v5164_v34, -1e+30 }
 0x211   :  { %v5289_v21 = vsel %vm1977_vm7, %v1917_v52, -1e+30 }
 0x212   :  { %v722_v4 = vmul.f32 %v3876_v5, %v721_v13  ;;  %1134 = vmax.xlane.f32.xlu1 %v5188_v23  ;;  %v719_v55 = vsel %vm718_vm11, %v3874_v15, %v715_v48  ;;  %vm728_vm11 = vmor %vm726_vm14, %vm727_vm5  ;;  %v1028_v13 = vpop.f32.mrf.mxu1  ;;  %vm8057_vm14 = vcmp.eq.s32.totalorder %v5005_v31, %v4658_v45  ;;  %vm8030_vm5 = vcmp.eq.s32.totalorder %v5005_v31, %v4648_v40 }
 0x213   :  { %v760_v41 = vmul.f32 %v719_v55, %v4994_v44  ;;  %v2342_v55 = vsel %vm8017_vm0, %v5289_v21, 0.0  ;;  %vm8043_vm0 = vcmp.eq.s32.totalorder %v5005_v31, %v4663_v47 }
 0x214   :  { %v723_v10 = vmul.f32 0.5, %v722_v4  ;;  %2032 = vmax.xlane.f32.xlu2 %v5270_v6 }
 0x215   :  { %1494 = vadd.xlane.f32.xlu0 %v1450_v50  ;;  %1078 = vmatmul.f32.gmra.mxu1 %v760_v41  ;;  %v2338_v50 = vsel %vm900_vm15, %v5285_v38, 0.0 }
 0x216   :  { %v724_v15 = vsub.f32 1.5, %v723_v10  ;;  %1970 = vmatmul.f32.gmra.mxu2 %v760_v41  ;;  %2861 = vmatmul.f32.gmra.mxu3 %v760_v41  ;;  %v1920_v41 = vpop.f32.mrf.mxu2  ;;  %v5300_v52 = vpop.f32.mrf.mxu3 }
 0x217   :  { %v5280_v18 = vpop.xlane.xlu0 %1118  ;;  %8281 = vst [vmem:[#allocation46_spill] sm:$0xff] %v5300_v52 }
 0x218   :  { %8279 = vst [vmem:[#allocation44_spill] sm:$0xff] %v5280_v18  ;;  %v725_v44 = vmul.f32 %v3876_v5, %v724_v15 }
 0x21a   :  { %2026 = vmax.xlane.f32.xlu1 %v5285_v38  ;;  %v729_v48 = vsel %vm728_vm11, %v3876_v5, %v725_v44  ;;  %v5322_v44 = vsel %vm1085_vm4, %v1028_v13, -1e+30  ;;  %vm8015_vm11 = vcmp.eq.s32.totalorder %v5005_v31, %v4767_v46 }
 0x21b   :  { %v761_v4 = vmul.f32 %v729_v48, %v4999_v61  ;;  %v5308_v61 = vsel %vm1977_vm7, %v1920_v41, -1e+30  ;;  %v1031_v48 = vpop.f32.mrf.mxu1 }
 0x21c   :  { %1142 = vmax.xlane.f32.xlu2 %v5263_v57  ;;  %v2343_v15 = vsel %vm8057_vm14, %v5308_v61, 0.0 }
 0x21d   :  { %v5298_v34 = vpop.xlane.xlu1 %2010  ;;  %2386 = vadd.xlane.f32.xlu0 %v2342_v55  ;;  %1081 = vmatmul.f32.gmra.mxu1 %v761_v4 }
 0x21e   :  { %8280 = vst [vmem:[#allocation45_spill] sm:$0xff] %v5298_v34  ;;  %1973 = vmatmul.f32.gmra.mxu2 %v761_v4  ;;  %2864 = vmatmul.f32.gmra.mxu3 %v761_v4 }
 0x21f   :  { %v5302_v10 = vpop.xlane.xlu2 %1120  ;;  %v5304_v5 = vpop.xlane.xlu0 %1470 }
 0x220   :  { %8282 = vst [vmem:[#allocation47_spill] sm:$0xff] %v5302_v10 }
 0x221   :  { %8283 = vst [vmem:[#allocation48_spill] sm:$0xff] %v5304_v5 }
 0x222   :  { %2378 = vadd.xlane.f32.xlu1 %v2338_v50  ;;  %v5333_v50 = vsel %vm1085_vm4, %v1031_v48, -1e+30 }
 0x223   :  { %v1452_v13 = vsel %vm8030_vm5, %v5333_v50, 0.0  ;;  %v1034_v25 = vpop.f32.mrf.mxu1 }
 0x224   :  { %2388 = vadd.xlane.f32.xlu2 %v2343_v15  ;;  %v1923_v15 = vpop.f32.mrf.mxu2  ;;  %v5351_v28 = vsel %vm1085_vm4, %v1034_v25, -1e+30 }
 0x225   :  { %v5324_v4 = vpop.xlane.xlu1 %1472  ;;  %1144 = vmax.xlane.f32.xlu0 %v5322_v44  ;;  %v1453_v25 = vsel %vm8015_vm11, %v5351_v28, 0.0 }
 0x226   :  { %8284 = vst [vmem:[#allocation49_spill] sm:$0xff] %v5324_v4 }
 0x227   :  { %v5327_v55 = vpop.xlane.xlu2 %2364  ;;  %v5329_v41 = vpop.xlane.xlu0 %2362 }
 0x228   :  { %8285 = vst [vmem:[#allocation50_spill] sm:$0xff] %v5327_v55  ;;  %v1448_v55 = vsel %vm8018_vm12, %v5243_v8, 0.0  ;;  %vm8026_vm12 = vcmp.eq.s32.totalorder %v5005_v31, %v4827_v22 }
 0x229   :  { %8286 = vst [vmem:[#allocation51_spill] sm:$0xff] %v5329_v41 }
 0x22a   :  { %2028 = vmax.xlane.f32.xlu1 %v5215_v20 }
 0x22c   :  { %1498 = vadd.xlane.f32.xlu2 %v1452_v13  ;;  %v5361_v13 = vsel %vm1977_vm7, %v1923_v15, -1e+30 }
 0x22d   :  { %v5342_v2 = vpop.xlane.xlu1 %2012  ;;  %2036 = vmax.xlane.f32.xlu0 %v5308_v61 }
 0x22e   :  { %8287 = vst [vmem:[#allocation52_spill] sm:$0xff] %v5342_v2 }
 0x22f   :  { %v5345_v52 = vpop.xlane.xlu2 %1474 }
 0x230   :  { %8288 = vst [vmem:[#allocation53_spill] sm:$0xff] %v5345_v52  ;;  %v5347_v48 = vpop.xlane.xlu0 %1476 }
 0x231   :  { %8289 = vst [vmem:[#allocation54_spill] sm:$0xff] %v5347_v48  ;;  %v2074_v48 = vsub.f32 %v5017_v54, %v5298_v34  ;;  %v1037_v34 = vpop.f32.mrf.mxu1 }
 0x232   :  { %1490 = vadd.xlane.f32.xlu1 %v1448_v55  ;;  %v1926_v55 = vpop.f32.mrf.mxu2 }
 0x233   :  { %v2106_v15 = vmul.f32 1.442695, %v2074_v48  ;;  %v5378_v4 = vsel %vm1977_vm7, %v1926_v55, -1e+30 }
 0x234   :  { %2038 = vmax.xlane.f32.xlu2 %v5361_v13  ;;  %v2345_v54 = vsel %vm8015_vm11, %v5378_v4, 0.0  ;;  %vm8029_vm11 = vcmp.eq.s32.totalorder %v5005_v31, %v4676_v53 }
 0x235   :  { %v5370_v37 = vpop.xlane.xlu1 %1122  ;;  %1500 = vadd.xlane.f32.xlu0 %v1453_v25  ;;  %3877 = vpow2.f32 %v2106_v15  ;;  %v1183_v25 = vsub.f32 %v5028_v42, %v5302_v10  ;;  %v5400_v15 = vsel %vm1085_vm4, %v1037_v34, -1e+30 }
 0x236   :  { %8290 = vst [vmem:[#allocation55_spill] sm:$0xff] %v5370_v37 }
 0x237   :  { %v5372_v5 = vpop.xlane.xlu2 %1124  ;;  %v1216_v56 = vmul.f32 1.442695, %v1183_v25 }
 0x238   :  { %8291 = vst [vmem:[#allocation56_spill] sm:$0xff] %v5372_v5  ;;  %v5374_v52 = vpop.xlane.xlu0 %2016 }
 0x239   :  { %8292 = vst [vmem:[#allocation57_spill] sm:$0xff] %v5374_v52  ;;  %3879 = vpow2.f32 %v1216_v56  ;;  %v1040_v56 = vpop.f32.mrf.mxu1 }
 0x23a   :  { %1140 = vmax.xlane.f32.xlu1 %v5248_v0  ;;  %v1929_v33 = vpop.f32.mrf.mxu2 }
 0x23b   :  { %v3878_v46 = vpop.eup %3877 }
 0x23c   :  { %1148 = vmax.xlane.f32.xlu2 %v5351_v28 }
 0x23d   :  { %v5388_v41 = vpop.xlane.xlu1 %2014  ;;  %2392 = vadd.xlane.f32.xlu0 %v2345_v54  ;;  %v1184_v54 = vsub.f32 %v5053_v59, %v5370_v37 }
 0x23e   :  { %8293 = vst [vmem:[#allocation58_spill] sm:$0xff] %v5388_v41 }
 0x23f   :  { %v5390_v48 = vpop.xlane.xlu2 %2018  ;;  %v3880_v10 = vpop.eup %3879 }
 0x240   :  { %8294 = vst [vmem:[#allocation59_spill] sm:$0xff] %v5390_v48  ;;  %v5392_v55 = vpop.xlane.xlu0 %2368 }
 0x241   :  { %8295 = vst [vmem:[#allocation60_spill] sm:$0xff] %v5392_v55 }
 0x242   :  { %2384 = vadd.xlane.f32.xlu1 %v2341_v26  ;;  %v1218_v26 = vmul.f32 1.442695, %v1184_v54  ;;  %v1451_v54 = vsel %vm8057_vm14, %v5322_v44, 0.0  ;;  %vm1694_vm14 = vcmask 7168  }
 0x244   :  { %2170 = vadd.xlane.f32.xlu2 %v3878_v46  ;;  %v5414_v46 = vsel %vm1977_vm7, %v1929_v33, -1e+30  ;;  %3881 = vpow2.f32 %v1218_v26 }
 0x245   :  { %v5402_v42 = vpop.xlane.xlu1 %2366  ;;  %1150 = vmax.xlane.f32.xlu0 %v5400_v15  ;;  %8299 = vst [vmem:[#allocation64_spill] sm:$0xff] %v5414_v46  ;;  %v2346_v33 = vsel %vm8029_vm11, %v5414_v46, 0.0 }
 0x246   :  { %8296 = vst [vmem:[#allocation61_spill] sm:$0xff] %v5402_v42 }
 0x247   :  { %v5407_v25 = vpop.xlane.xlu2 %2370 }
 0x248   :  { %8297 = vst [vmem:[#allocation62_spill] sm:$0xff] %v5407_v25  ;;  %v5409_v55 = vpop.xlane.xlu0 %1126 }
 0x249   :  { %8298 = vst [vmem:[#allocation63_spill] sm:$0xff] %v5409_v55 }
 0x24a   :  { %2034 = vmax.xlane.f32.xlu1 %v5289_v21 }
 0x24c   :  { %1280 = vadd.xlane.f32.xlu2 %v3880_v10  ;;  %v3882_v10 = vpop.eup %3881 }
 0x24d   :  { %v5416_v34 = vpop.xlane.xlu1 %1478  ;;  %2042 = vmax.xlane.f32.xlu0 %v5414_v46 }
 0x24e   :  { %8300 = vst [vmem:[#allocation65_spill] sm:$0xff] %v5416_v34  ;;  %v5441_v34 = vsel %vm1085_vm4, %v1040_v56, -1e+30  ;;  %v1932_v56 = vpop.f32.mrf.mxu2 }
 0x24f   :  { %v5419_v59 = vpop.xlane.xlu2 %1480  ;;  %v5476_v37 = vsel %vm1977_vm7, %v1932_v56, -1e+30 }
 0x250   :  { %8301 = vst [vmem:[#allocation66_spill] sm:$0xff] %v5419_v59  ;;  %v5421_v25 = vpop.xlane.xlu0 %1482  ;;  %v2076_v59 = vsub.f32 %v5083_v3, %v5388_v41  ;;  %v1455_v3 = vsel %vm8043_vm0, %v5441_v34, 0.0  ;;  %v2344_v41 = vsel %vm8030_vm5, %v5361_v13, 0.0  ;;  %vm8039_vm5 = vcmp.eq.s32.totalorder %v5005_v31, %v4881_v7 }
 0x251   :  { %8302 = vst [vmem:[#allocation67_spill] sm:$0xff] %v5421_v25  ;;  %v1043_v25 = vpop.f32.mrf.mxu1 }
 0x252   :  { %1496 = vadd.xlane.f32.xlu1 %v1451_v54  ;;  %v5447_v42 = vsel %vm1085_vm4, %v1043_v25, -1e+30 }
 0x253   :  { %v1456_v25 = vsel %vm8026_vm12, %v5447_v42, 0.0 }
 0x254   :  { %2394 = vadd.xlane.f32.xlu2 %v2346_v33  ;;  %v2110_v33 = vmul.f32 1.442695, %v2076_v59 }
 0x255   :  { %v5433_v26 = vpop.xlane.xlu1 %1128  ;;  %1282 = vadd.xlane.f32.xlu0 %v3882_v10 }
 0x256   :  { %8303 = vst [vmem:[#allocation68_spill] sm:$0xff] %v5433_v26  ;;  %3883 = vpow2.f32 %v2110_v33  ;;  %v2077_v33 = vsub.f32 %v5078_v63, %v5374_v52 }
 0x257   :  { %v5437_v45 = vpop.xlane.xlu2 %1130 }
 0x258   :  { %8304 = vst [vmem:[#allocation69_spill] sm:$0xff] %v5437_v45  ;;  %v5443_v54 = vpop.xlane.xlu0 %2374  ;;  %v2112_v56 = vmul.f32 1.442695, %v2077_v33 }
 0x259   :  { %8305 = vst [vmem:[#allocation70_spill] sm:$0xff] %v5443_v54 }
 0x25a   :  { %1146 = vmax.xlane.f32.xlu1 %v5333_v50 }
 0x25c   :  { %1504 = vadd.xlane.f32.xlu2 %v1455_v3  ;;  %v1182_v3 = vsub.f32 %v5010_v51, %v5280_v18  ;;  %v3884_v46 = vpop.eup %3883 }
 0x25d   :  { %v5462_v10 = vpop.xlane.xlu1 %2020  ;;  %1506 = vadd.xlane.f32.xlu0 %v1456_v25 }
 0x25e   :  { %8306 = vst [vmem:[#allocation71_spill] sm:$0xff] %v5462_v10  ;;  %v1214_v40 = vmul.f32 1.442695, %v1182_v3 }
 0x25f   :  { %v5464_v59 = vpop.xlane.xlu2 %2376 }
 0x260   :  { %8307 = vst [vmem:[#allocation72_spill] sm:$0xff] %v5464_v59  ;;  %v5466_v54 = vpop.xlane.xlu0 %1132  ;;  %v1935_v59 = vpop.f32.mrf.mxu2  ;;  %3885 = vpow2.f32 %v1214_v40 }
 0x261   :  { %8308 = vst [vmem:[#allocation73_spill] sm:$0xff] %v5466_v54  ;;  %v5489_v51 = vsel %vm1977_vm7, %v1935_v59, -1e+30  ;;  %3887 = vpow2.f32 %v2112_v56  ;;  %v1046_v40 = vpop.f32.mrf.mxu1 }
 0x262   :  { %2390 = vadd.xlane.f32.xlu1 %v2344_v41  ;;  %v2348_v63 = vsel %vm8026_vm12, %v5489_v51, 0.0  ;;  %v5507_v22 = vsel %vm1085_vm4, %v1046_v40, -1e+30  ;;  %vm8042_vm12 = vcmp.eq.s32.totalorder %v5005_v31, %v4727_v14 }
 0x264   :  { %2044 = vmax.xlane.f32.xlu2 %v5476_v37 }
 0x265   :  { %v5481_v25 = vpop.xlane.xlu1 %2372  ;;  %2174 = vadd.xlane.f32.xlu0 %v3884_v46  ;;  %v1186_v46 = vsub.f32 %v5111_v29, %v5409_v55  ;;  %v1187_v29 = vsub.f32 %v5122_v24, %v5433_v26 }
 0x266   :  { %8309 = vst [vmem:[#allocation74_spill] sm:$0xff] %v5481_v25 }
 0x267   :  { %v5483_v62 = vpop.xlane.xlu2 %1486  ;;  %v1224_v40 = vmul.f32 1.442695, %v1187_v29 }
 0x268   :  { %8310 = vst [vmem:[#allocation75_spill] sm:$0xff] %v5483_v62  ;;  %v5485_v41 = vpop.xlane.xlu0 %1488  ;;  %v1222_v62 = vmul.f32 1.442695, %v1186_v46  ;;  %v1938_v46 = vpop.f32.mrf.mxu2 }
 0x269   :  { %8311 = vst [vmem:[#allocation76_spill] sm:$0xff] %v5485_v41  ;;  %v3886_v41 = vpop.eup %3885  ;;  %v1049_v24 = vpop.f32.mrf.mxu1 }
 0x26a   :  { %2040 = vmax.xlane.f32.xlu1 %v5378_v4  ;;  %v3888_v25 = vpop.eup %3887  ;;  %3889 = vpow2.f32 %v1222_v62 }
 0x26b   :  { %3891 = vpow2.f32 %v1224_v40 }
 0x26c   :  { %1154 = vmax.xlane.f32.xlu2 %v5447_v42 }
 0x26d   :  { %v5499_v3 = vpop.xlane.xlu1 %2022  ;;  %2398 = vadd.xlane.f32.xlu0 %v2348_v63 }
 0x26e   :  { %8312 = vst [vmem:[#allocation77_spill] sm:$0xff] %v5499_v3 }
 0x26f   :  { %v5501_v59 = vpop.xlane.xlu2 %1136 }
 0x270   :  { %8313 = vst [vmem:[#allocation78_spill] sm:$0xff] %v5501_v59  ;;  %v5503_v33 = vpop.xlane.xlu0 %2380  ;;  %v3890_v62 = vpop.eup %3889 }
 0x271   :  { %8314 = vst [vmem:[#allocation79_spill] sm:$0xff] %v5503_v33  ;;  %v1052_v40 = vpop.f32.mrf.mxu1 }
 0x272   :  { %1278 = vadd.xlane.f32.xlu1 %v3886_v41  ;;  %v1454_v41 = vsel %vm8029_vm11, %v5400_v15, 0.0  ;;  %vm8056_vm11 = vcmp.eq.s32.totalorder %v5005_v31, %v4702_v1 }
 0x274   :  { %2176 = vadd.xlane.f32.xlu2 %v3888_v25  ;;  %v2075_v25 = vsub.f32 %v5036_v35, %v5342_v2  ;;  %v5556_v2 = vsel %vm1085_vm4, %v1052_v40, -1e+30 }
 0x275   :  { %v5509_v56 = vpop.xlane.xlu1 %1484  ;;  %1156 = vmax.xlane.f32.xlu0 %v5507_v22  ;;  %8325 = vst [vmem:[#allocation90_spill] sm:$0xff] %v5556_v2 }
 0x276   :  { %8315 = vst [vmem:[#allocation80_spill] sm:$0xff] %v5509_v56  ;;  %v5526_v56 = vsel %vm1977_vm7, %v1938_v46, -1e+30  ;;  %v2108_v26 = vmul.f32 1.442695, %v2075_v25  ;;  %v3892_v46 = vpop.eup %3891 }
 0x277   :  { %v5514_v63 = vpop.xlane.xlu2 %2382  ;;  %8318 = vst [vmem:[#allocation83_spill] sm:$0xff] %v5526_v56  ;;  %v2349_v35 = vsel %vm8042_vm12, %v5526_v56, 0.0 }
 0x278   :  { %8316 = vst [vmem:[#allocation81_spill] sm:$0xff] %v5514_v63  ;;  %v5516_v33 = vpop.xlane.xlu0 %1138  ;;  %3893 = vpow2.f32 %v2108_v26 }
 0x279   :  { %8317 = vst [vmem:[#allocation82_spill] sm:$0xff] %v5516_v33 }
 0x27a   :  { %1502 = vadd.xlane.f32.xlu1 %v1454_v41 }
 0x27c   :  { %1286 = vadd.xlane.f32.xlu2 %v3890_v62  ;;  %v2079_v62 = vsub.f32 %v5169_v30, %v5462_v10 }
 0x27d   :  { %v5528_v63 = vpop.xlane.xlu1 %2024  ;;  %2048 = vmax.xlane.f32.xlu0 %v5526_v56 }
 0x27e   :  { %8319 = vst [vmem:[#allocation84_spill] sm:$0xff] %v5528_v63  ;;  %v3894_v55 = vpop.eup %3893 }
 0x27f   :  { %v5531_v53 = vpop.xlane.xlu2 %1492 }
 0x280   :  { %8320 = vst [vmem:[#allocation85_spill] sm:$0xff] %v5531_v53  ;;  %v5533_v29 = vpop.xlane.xlu0 %2030  ;;  %v5550_v53 = vsel %vm1085_vm4, %v1049_v24, -1e+30  ;;  %v1941_v24 = vpop.f32.mrf.mxu2 }
 0x281   :  { %8321 = vst [vmem:[#allocation86_spill] sm:$0xff] %v5533_v29  ;;  %v1458_v30 = vsel %vm8056_vm11, %v5550_v53, 0.0  ;;  %v5584_v10 = vsel %vm1977_vm7, %v1941_v24, -1e+30 }
 0x282   :  { %1152 = vmax.xlane.f32.xlu1 %v5441_v34 }
 0x284   :  { %2400 = vadd.xlane.f32.xlu2 %v2349_v35  ;;  %v2116_v35 = vmul.f32 1.442695, %v2079_v62 }
 0x285   :  { %v5542_v41 = vpop.xlane.xlu1 %1134  ;;  %1288 = vadd.xlane.f32.xlu0 %v3892_v46  ;;  %v1459_v46 = vsel %vm8039_vm5, %v5556_v2, 0.0 }
 0x286   :  { %8322 = vst [vmem:[#allocation87_spill] sm:$0xff] %v5542_v41  ;;  %3895 = vpow2.f32 %v2116_v35  ;;  %v2080_v35 = vsub.f32 %v5149_v58, %v5499_v3 }
 0x287   :  { %v5546_v25 = vpop.xlane.xlu2 %2032 }
 0x288   :  { %8323 = vst [vmem:[#allocation88_spill] sm:$0xff] %v5546_v25  ;;  %v5552_v26 = vpop.xlane.xlu0 %1494  ;;  %v2118_v24 = vmul.f32 1.442695, %v2080_v35 }
 0x289   :  { %8324 = vst [vmem:[#allocation89_spill] sm:$0xff] %v5552_v26  ;;  %v2347_v26 = vsel %vm8043_vm0, %v5476_v37, 0.0  ;;  %vm8054_vm0 = vcmp.eq.s32.totalorder %v5005_v31, %v4897_v32 }
 0x28a   :  { %2172 = vadd.xlane.f32.xlu1 %v3894_v55 }
 0x28c   :  { %1510 = vadd.xlane.f32.xlu2 %v1458_v30  ;;  %v1185_v30 = vsub.f32 %v5062_v27, %v5372_v5  ;;  %v3896_v52 = vpop.eup %3895 }
 0x28d   :  { %v5570_v40 = vpop.xlane.xlu1 %2026  ;;  %1512 = vadd.xlane.f32.xlu0 %v1459_v46 }
 0x28e   :  { %8326 = vst [vmem:[#allocation91_spill] sm:$0xff] %v5570_v40  ;;  %v1220_v47 = vmul.f32 1.442695, %v1185_v30 }
 0x28f   :  { %v5572_v55 = vpop.xlane.xlu2 %1142 }
 0x290   :  { %8327 = vst [vmem:[#allocation92_spill] sm:$0xff] %v5572_v55  ;;  %v5574_v62 = vpop.xlane.xlu0 %2386  ;;  %3897 = vpow2.f32 %v1220_v47  ;;  %v1055_v47 = vpop.f32.mrf.mxu1 }
 0x291   :  { %8328 = vst [vmem:[#allocation93_spill] sm:$0xff] %v5574_v62  ;;  %v1944_v62 = vpop.f32.mrf.mxu2  ;;  %3899 = vpow2.f32 %v2118_v24  ;;  %v5615_v7 = vsel %vm1085_vm4, %v1055_v47, -1e+30  ;;  %v1190_v24 = vsub.f32 %v5188_v23, %v5542_v41 }
 0x292   :  { %2396 = vadd.xlane.f32.xlu1 %v2347_v26  ;;  %v5597_v27 = vsel %vm1977_vm7, %v1944_v62, -1e+30 }
 0x293   :  { %v2351_v58 = vsel %vm8039_vm5, %v5597_v27, 0.0  ;;  %v1230_v47 = vmul.f32 1.442695, %v1190_v24  ;;  %vm8055_vm5 = vcmp.eq.s32.totalorder %v5005_v31, %v4790_v60 }
 0x294   :  { %2050 = vmax.xlane.f32.xlu2 %v5584_v10 }
 0x295   :  { %v5589_v46 = vpop.xlane.xlu1 %2378  ;;  %2180 = vadd.xlane.f32.xlu0 %v3896_v52  ;;  %v1189_v52 = vsub.f32 %v5183_v12, %v5466_v54 }
 0x296   :  { %8329 = vst [vmem:[#allocation94_spill] sm:$0xff] %v5589_v46 }
 0x297   :  { %v5591_v18 = vpop.xlane.xlu2 %2388  ;;  %v1228_v46 = vmul.f32 1.442695, %v1189_v52 }
 0x298   :  { %8330 = vst [vmem:[#allocation95_spill] sm:$0xff] %v5591_v18  ;;  %v5593_v26 = vpop.xlane.xlu0 %1144  ;;  %v3898_v18 = vpop.eup %3897 }
 0x299   :  { %8331 = vst [vmem:[#allocation96_spill] sm:$0xff] %v5593_v26  ;;  %v3900_v3 = vpop.eup %3899  ;;  %3901 = vpow2.f32 %v1228_v46  ;;  %v1947_v52 = vpop.f32.mrf.mxu2  ;;  %v2078_v46 = vsub.f32 %v5088_v17, %v5390_v48 }
 0x29a   :  { %2046 = vmax.xlane.f32.xlu1 %v5489_v51  ;;  %v1058_v23 = vpop.f32.mrf.mxu1  ;;  %3903 = vpow2.f32 %v1230_v47 }
 0x29c   :  { %1160 = vmax.xlane.f32.xlu2 %v5556_v2 }
 0x29d   :  { %v5607_v30 = vpop.xlane.xlu1 %2028  ;;  %2404 = vadd.xlane.f32.xlu0 %v2351_v58 }
 0x29e   :  { %8332 = vst [vmem:[#allocation97_spill] sm:$0xff] %v5607_v30 }
 0x29f   :  { %v5609_v62 = vpop.xlane.xlu2 %1498 }
 0x2a0   :  { %8333 = vst [vmem:[#allocation98_spill] sm:$0xff] %v5609_v62  ;;  %v5611_v35 = vpop.xlane.xlu0 %2036 }
 0x2a1   :  { %8334 = vst [vmem:[#allocation99_spill] sm:$0xff] %v5611_v35 }
 0x2a2   :  { %1284 = vadd.xlane.f32.xlu1 %v3898_v18  ;;  %v1457_v18 = vsel %vm8042_vm12, %v5507_v22, 0.0  ;;  %v1061_v47 = vpop.f32.mrf.mxu1  ;;  %vm8097_vm12 = vcmp.eq.s32.totalorder %v5005_v31, %v4756_v36 }
 0x2a3   :  { %v5664_v48 = vsel %vm1085_vm4, %v1061_v47, -1e+30 }
 0x2a4   :  { %2182 = vadd.xlane.f32.xlu2 %v3900_v3  ;;  %v3902_v3 = vpop.eup %3901  ;;  %8344 = vst [vmem:[#allocation109_spill] sm:$0xff] %v5664_v48 }
 0x2a5   :  { %v5617_v12 = vpop.xlane.xlu1 %1490  ;;  %1162 = vmax.xlane.f32.xlu0 %v5615_v7 }
 0x2a6   :  { %8335 = vst [vmem:[#allocation100_spill] sm:$0xff] %v5617_v12  ;;  %v5634_v12 = vsel %vm1977_vm7, %v1947_v52, -1e+30  ;;  %v3904_v52 = vpop.eup %3903 }
 0x2a7   :  { %v5622_v58 = vpop.xlane.xlu2 %2038  ;;  %8338 = vst [vmem:[#allocation103_spill] sm:$0xff] %v5634_v12  ;;  %v2352_v17 = vsel %vm8055_vm5, %v5634_v12, 0.0 }
 0x2a8   :  { %8336 = vst [vmem:[#allocation101_spill] sm:$0xff] %v5622_v58  ;;  %v5624_v62 = vpop.xlane.xlu0 %1500 }
 0x2a9   :  { %8337 = vst [vmem:[#allocation102_spill] sm:$0xff] %v5624_v62  ;;  %v2114_v62 = vmul.f32 1.442695, %v2078_v46 }
 0x2aa   :  { %1508 = vadd.xlane.f32.xlu1 %v1457_v18 }
 0x2ab   :  { %3905 = vpow2.f32 %v2114_v62 }
 0x2ac   :  { %1292 = vadd.xlane.f32.xlu2 %v3902_v3  ;;  %v2082_v3 = vsub.f32 %v5285_v38, %v5570_v40 }
 0x2ad   :  { %v5636_v41 = vpop.xlane.xlu1 %1140  ;;  %2054 = vmax.xlane.f32.xlu0 %v5634_v12 }
 0x2ae   :  { %8339 = vst [vmem:[#allocation104_spill] sm:$0xff] %v5636_v41 }
 0x2af   :  { %v5639_v14 = vpop.xlane.xlu2 %1148 }
 0x2b0   :  { %8340 = vst [vmem:[#allocation105_spill] sm:$0xff] %v5639_v14  ;;  %v5641_v24 = vpop.xlane.xlu0 %2392 }
 0x2b1   :  { %8341 = vst [vmem:[#allocation106_spill] sm:$0xff] %v5641_v24  ;;  %v5658_v24 = vsel %vm1085_vm4, %v1058_v23, -1e+30  ;;  %v3906_v54 = vpop.eup %3905  ;;  %v1950_v23 = vpop.f32.mrf.mxu2 }
 0x2b2   :  { %1158 = vmax.xlane.f32.xlu1 %v5550_v53  ;;  %v1461_v38 = vsel %vm8097_vm12, %v5658_v24, 0.0  ;;  %v5692_v40 = vsel %vm1977_vm7, %v1950_v23, -1e+30 }
 0x2b4   :  { %2406 = vadd.xlane.f32.xlu2 %v2352_v17  ;;  %v2122_v17 = vmul.f32 1.442695, %v2082_v3 }
 0x2b5   :  { %v5650_v18 = vpop.xlane.xlu1 %2384  ;;  %1294 = vadd.xlane.f32.xlu0 %v3904_v52  ;;  %v1462_v52 = vsel %vm8054_vm0, %v5664_v48, 0.0 }
 0x2b6   :  { %8342 = vst [vmem:[#allocation107_spill] sm:$0xff] %v5650_v18  ;;  %3907 = vpow2.f32 %v2122_v17  ;;  %v2350_v18 = vsel %vm8056_vm11, %v5584_v10, 0.0  ;;  %v2083_v17 = vsub.f32 %v5215_v20, %v5607_v30 }
 0x2b7   :  { %v5654_v46 = vpop.xlane.xlu2 %2170 }
 0x2b8   :  { %v5660_v62 = vpop.xlane.xlu0 %1150  ;;  %v2124_v23 = vmul.f32 1.442695, %v2083_v17 }
 0x2b9   :  { %8343 = vst [vmem:[#allocation108_spill] sm:$0xff] %v5660_v62  ;;  %v1953_v12 = vpop.f32.mrf.mxu2 }
 0x2ba   :  { %2178 = vadd.xlane.f32.xlu1 %v3906_v54 }
 0x2bc   :  { %1516 = vadd.xlane.f32.xlu2 %v1461_v38  ;;  %v1188_v38 = vsub.f32 %v5126_v9, %v5437_v45  ;;  %v3908_v5 = vpop.eup %3907  ;;  %v5705_v9 = vsel %vm1977_vm7, %v1953_v12, -1e+30 }
 0x2bd   :  { %v5678_v47 = vpop.xlane.xlu1 %2034  ;;  %1518 = vadd.xlane.f32.xlu0 %v1462_v52  ;;  %v2354_v20 = vsel %vm8054_vm0, %v5705_v9, 0.0  ;;  %vm8096_vm0 = vcmp.eq.s32.totalorder %v5005_v31, %v4853_v49 }
 0x2be   :  { %8345 = vst [vmem:[#allocation110_spill] sm:$0xff] %v5678_v47  ;;  %v1226_v1 = vmul.f32 1.442695, %v1188_v38 }
 0x2bf   :  { %v5680_v54 = vpop.xlane.xlu2 %1280 }
 0x2c0   :  { %v5682_v3 = vpop.xlane.xlu0 %2042  ;;  %3909 = vpow2.f32 %v1226_v1  ;;  %v1064_v1 = vpop.f32.mrf.mxu1 }
 0x2c1   :  { %8346 = vst [vmem:[#allocation111_spill] sm:$0xff] %v5682_v3  ;;  %3911 = vpow2.f32 %v2124_v23  ;;  %v5723_v32 = vsel %vm1085_vm4, %v1064_v1, -1e+30  ;;  %v1193_v23 = vsub.f32 %v5248_v0, %v5636_v41 }
 0x2c2   :  { %2402 = vadd.xlane.f32.xlu1 %v2350_v18  ;;  %8352 = vst [vmem:[#allocation117_spill] sm:$0xff] %v5723_v32 }
 0x2c3   :  { %v1236_v1 = vmul.f32 1.442695, %v1193_v23 }
 0x2c4   :  { %2056 = vmax.xlane.f32.xlu2 %v5692_v40 }
 0x2c5   :  { %v5697_v52 = vpop.xlane.xlu1 %1496  ;;  %2186 = vadd.xlane.f32.xlu0 %v3908_v5  ;;  %v1192_v5 = vsub.f32 %v5243_v8, %v5516_v33 }
 0x2c6   :  { %8347 = vst [vmem:[#allocation112_spill] sm:$0xff] %v5697_v52 }
 0x2c7   :  { %v5699_v2 = vpop.xlane.xlu2 %2394  ;;  %v1234_v52 = vmul.f32 1.442695, %v1192_v5  ;;  %v1956_v5 = vpop.f32.mrf.mxu2 }
 0x2c8   :  { %8348 = vst [vmem:[#allocation113_spill] sm:$0xff] %v5699_v2  ;;  %v5701_v18 = vpop.xlane.xlu0 %1282  ;;  %v3910_v2 = vpop.eup %3909 }
 0x2c9   :  { %v3912_v30 = vpop.eup %3911  ;;  %3913 = vpow2.f32 %v1234_v52  ;;  %v2081_v52 = vsub.f32 %v5162_v19, %v5528_v63  ;;  %v1067_v0 = vpop.f32.mrf.mxu1  ;;  %v5754_v19 = vld [vmem:[%s7986_s1] sm:$0xff] }
 0x2ca   :  { %2052 = vmax.xlane.f32.xlu1 %v5597_v27  ;;  %3915 = vpow2.f32 %v1236_v1  ;;  %8360 = vst [vmem:[#allocation125_spill] sm:$0xff] %v5754_v19  ;;  %v5767_v1 = vld [vmem:[%s7986_s1 + $0x10] sm:$0xff] }
 0x2cb   :  { %v2120_v41 = vmul.f32 1.442695, %v2081_v52  ;;  %8361 = vst [vmem:[#allocation126_spill] sm:$0xff] %v5767_v1  ;;  %vm2460_vm11 = vcmp.eq.s32.totalorder %v5767_v1, 1 }
 0x2cc   :  { %1166 = vmax.xlane.f32.xlu2 %v5664_v48 }
 0x2cd   :  { %v5715_v38 = vpop.xlane.xlu1 %1146  ;;  %2410 = vadd.xlane.f32.xlu0 %v2354_v20  ;;  %3917 = vpow2.f32 %v2120_v41  ;;  %v2085_v41 = vsub.f32 %v5270_v6, %v5546_v25 }
 0x2ce   :  { %8349 = vst [vmem:[#allocation114_spill] sm:$0xff] %v5715_v38 }
 0x2cf   :  { %v5717_v12 = vpop.xlane.xlu2 %1504 }
 0x2d0   :  { %8350 = vst [vmem:[#allocation115_spill] sm:$0xff] %v5717_v12  ;;  %v5719_v17 = vpop.xlane.xlu0 %1506 }
 0x2d1   :  { %8351 = vst [vmem:[#allocation116_spill] sm:$0xff] %v5719_v17  ;;  %v1070_v52 = vpop.f32.mrf.mxu1 }
 0x2d2   :  { %1290 = vadd.xlane.f32.xlu1 %v3910_v2  ;;  %v1460_v2 = vsel %vm8055_vm5, %v5615_v7, 0.0  ;;  %vm2458_vm5 = vcmp.eq.s32.totalorder %v5754_v19, 1  ;;  %v5795_v45 = vsel %vm1085_vm4, %v1070_v52, -1e+30 }
 0x2d3   :  { %8367 = vst [vmem:[#allocation132_spill] sm:$0xff] %v5795_v45 }
 0x2d4   :  { %2188 = vadd.xlane.f32.xlu2 %v3912_v30  ;;  %v3914_v30 = vpop.eup %3913 }
 0x2d5   :  { %v5725_v8 = vpop.xlane.xlu1 %2390  ;;  %1168 = vmax.xlane.f32.xlu0 %v5723_v32 }
 0x2d6   :  { %8353 = vst [vmem:[#allocation118_spill] sm:$0xff] %v5725_v8  ;;  %v5742_v8 = vsel %vm1977_vm7, %v1956_v5, -1e+30 }
 0x2d7   :  { %v5730_v20 = vpop.xlane.xlu2 %2044  ;;  %8356 = vst [vmem:[#allocation121_spill] sm:$0xff] %v5742_v8  ;;  %v2355_v5 = vsel %vm8096_vm0, %v5742_v8, 0.0 }
 0x2d8   :  { %8354 = vst [vmem:[#allocation119_spill] sm:$0xff] %v5730_v20  ;;  %v5732_v17 = vpop.xlane.xlu0 %2174 }
 0x2d9   :  { %8355 = vst [vmem:[#allocation120_spill] sm:$0xff] %v5732_v17  ;;  %v1959_v17 = vpop.f32.mrf.mxu2 }
 0x2da   :  { %1514 = vadd.xlane.f32.xlu1 %v1460_v2  ;;  %v3916_v2 = vpop.eup %3915 }
 0x2dc   :  { %1298 = vadd.xlane.f32.xlu2 %v3914_v30 }
 0x2dd   :  { %v5744_v12 = vpop.xlane.xlu1 %2040  ;;  %2060 = vmax.xlane.f32.xlu0 %v5742_v8  ;;  %v8368_v8 = vmov 0.0  }
 0x2de   :  { %8357 = vst [vmem:[#allocation122_spill] sm:$0xff] %v5744_v12  ;;  %v5798_v48 = vsel %vm2460_vm11, 1.0, %v8368_v8 }
 0x2df   :  { %v5747_v60 = vpop.xlane.xlu2 %1154  ;;  %8369 = vst [vmem:[#allocation133_spill] sm:$0xff] %v5798_v48 }
 0x2e0   :  { %8358 = vst [vmem:[#allocation123_spill] sm:$0xff] %v5747_v60  ;;  %v5749_v23 = vpop.xlane.xlu0 %2398 }
 0x2e1   :  { %8359 = vst [vmem:[#allocation124_spill] sm:$0xff] %v5749_v23  ;;  %v8062_v23 = vmov 0.0  }
 0x2e2   :  { %1164 = vmax.xlane.f32.xlu1 %v5658_v24  ;;  %v5775_v33 = vsel %vm2458_vm5, 1.0, %v8062_v23  ;;  %v3918_v23 = vpop.eup %3917  ;;  %vm918_vm5 = vcmp.eq.s32.totalorder %v5005_v31, %v4816_v11 }
 0x2e3   :  { %8362 = vst [vmem:[#allocation127_spill] sm:$0xff] %v5775_v33  ;;  %v2655_v6 = vsel %vm1694_vm14, %v5775_v33, 0.0  ;;  %v2658_v33 = vsel %vm1694_vm14, %v5798_v48, 0.0 }
 0x2e4   :  { %2412 = vadd.xlane.f32.xlu2 %v2355_v5  ;;  %v5780_v5 = vld [vmem:[%s7986_s1 + $0x8] sm:$0xff] }
 0x2e5   :  { %1300 = vadd.xlane.f32.xlu0 %v3916_v2  ;;  %v5769_v30 = vpop.xlane.xlu1 %1278  ;;  %8363 = vst [vmem:[#allocation128_spill] sm:$0xff] %v5780_v5  ;;  %v5786_v2 = vsel %vm1085_vm4, %v1067_v0, -1e+30  ;;  %vm2459_vm6 = vcmp.eq.s32.totalorder %v5780_v5, 1  ;;  %v2128_v0 = vmul.f32 1.442695, %v2085_v41 }
 0x2e6   :  { %8365 = vst [vmem:[#allocation130_spill] sm:$0xff] %v5786_v2  ;;  %v5801_v19 = vsel %vm2459_vm6, 1.0, %v8368_v8  ;;  %v1464_v52 = vsel %vm918_vm5, %v5786_v2, 0.0 }
 0x2e7   :  { %v5782_v63 = vpop.xlane.xlu2 %2176  ;;  %8370 = vst [vmem:[#allocation134_spill] sm:$0xff] %v5801_v19  ;;  %v2656_v1 = vsel %vm1694_vm14, %v5801_v19, 0.0  ;;  %3919 = vpow2.f32 %v2128_v0 }
 0x2e8   :  { %8364 = vst [vmem:[#allocation129_spill] sm:$0xff] %v5782_v63  ;;  %v5790_v25 = vpop.xlane.xlu0 %1156  ;;  %v8371_v63 = vld [vmem:[#allocation35_spill] sm:$0xff]  ;;  %v2657_v5 = vadd.f32 %v2656_v1, %v2655_v6  ;;  %v2353_v1 = vsel %vm8097_vm12, %v5692_v40, 0.0  ;;  %v1191_v6 = vsub.f32 %v5192_v16, %v5501_v59 }
 0x2e9   :  { %8366 = vst [vmem:[#allocation131_spill] sm:$0xff] %v5790_v25  ;;  %vm8086_vm3 = vcmp.eq.s32.totalorder %v5005_v31, %v8371_v63 }
 0x2ea   :  { %2184 = vadd.xlane.f32.xlu1 %v3918_v23  ;;  %v1465_v41 = vsel %vm8086_vm3, %v5795_v45, 0.0  ;;  %v5821_v19 = vadd.f32 %v2658_v33, %v2657_v5  ;;  %v2086_v5 = vsub.f32 %v5289_v21, %v5678_v47  ;;  %v1232_v36 = vmul.f32 1.442695, %v1191_v6 }
 0x2eb   :  { %v1195_v6 = vsub.f32 %v5322_v44, %v5593_v26 }
 0x2ec   :  { %1522 = vadd.xlane.f32.xlu2 %v1464_v52  ;;  %v5835_v52 = vsel %vm1977_vm7, %v1959_v17, -1e+30  ;;  %v2130_v17 = vmul.f32 1.442695, %v2086_v5  ;;  %3921 = vpow2.f32 %v1232_v36  ;;  %v1073_v36 = vpop.f32.mrf.mxu1 }
 0x2ed   :  { %1524 = vadd.xlane.f32.xlu0 %v1465_v41  ;;  %v5819_v23 = vpop.xlane.xlu1 %1502  ;;  %v3920_v33 = vpop.eup %3919  ;;  %v1240_v47 = vmul.f32 1.442695, %v1195_v6  ;;  %v5866_v63 = vsel %vm1085_vm4, %v1073_v36, -1e+30 }
 0x2ee   :  { %8372 = vst [vmem:[#allocation135_spill] sm:$0xff] %v5819_v23  ;;  %v1962_v41 = vpop.f32.mrf.mxu2  ;;  %3923 = vpow2.f32 %v2130_v17  ;;  %v1196_v17 = vsub.f32 %v5333_v50, %v5715_v38  ;;  %v5915_v38 = vld [vmem:[%s7986_s1 + $0x28] sm:$0xff] }
 0x2ef   :  { %v5823_v48 = vpop.xlane.xlu2 %1286  ;;  %v5848_v16 = vsel %vm1977_vm7, %v1962_v41, -1e+30  ;;  %8379 = vst [vmem:[#allocation142_spill] sm:$0xff] %v5866_v63  ;;  %3925 = vpow2.f32 %v1240_v47  ;;  %v2084_v47 = vsub.f32 %v5228_v39, %v5533_v29  ;;  %v2088_v29 = vsub.f32 %v5361_v13, %v5622_v58 }
 0x2f0   :  { %v5825_v56 = vpop.xlane.xlu0 %2048  ;;  %8376 = vst [vmem:[#allocation139_spill] sm:$0xff] %v5848_v16  ;;  %v2357_v21 = vsel %vm8086_vm3, %v5848_v16, 0.0  ;;  %v1242_v36 = vmul.f32 1.442695, %v1196_v17  ;;  %v5893_v17 = vld [vmem:[%s7986_s1 + $0x18] sm:$0xff]  ;;  %vm2463_vm3 = vcmp.eq.s32.totalorder %v5915_v38, 1 }
 0x2f1   :  { %8373 = vst [vmem:[#allocation136_spill] sm:$0xff] %v5825_v56  ;;  %vm2461_vm6 = vcmp.eq.s32.totalorder %v5893_v17, 1 }
 0x2f2   :  { %2408 = vadd.xlane.f32.xlu1 %v2353_v1  ;;  %3927 = vpow2.f32 %v1242_v36  ;;  %8385 = vst [vmem:[#allocation148_spill] sm:$0xff] %v5893_v17  ;;  %v5942_v17 = vsel %vm2463_vm3, 1.0, %v8368_v8 }
 0x2f3   :  { %8390 = vst [vmem:[#allocation152_spill] sm:$0xff] %v5915_v38 }
 0x2f4   :  { %2062 = vmax.xlane.f32.xlu2 %v5835_v52  ;;  %v1076_v50 = vpop.f32.mrf.mxu1  ;;  %8396 = vst [vmem:[#allocation158_spill] sm:$0xff] %v5942_v17 }
 0x2f5   :  { %2192 = vadd.xlane.f32.xlu0 %v3920_v33  ;;  %v5840_v0 = vpop.xlane.xlu1 %1152 }
 0x2f6   :  { %8374 = vst [vmem:[#allocation137_spill] sm:$0xff] %v5840_v0  ;;  %v1965_v6 = vpop.f32.mrf.mxu2 }
 0x2f7   :  { %v5842_v23 = vpop.xlane.xlu2 %2400 }
 0x2f8   :  { %8375 = vst [vmem:[#allocation138_spill] sm:$0xff] %v5842_v23  ;;  %v5844_v1 = vpop.xlane.xlu0 %1288  ;;  %v3922_v23 = vpop.eup %3921 }
 0x2f9   :  { %v3924_v59 = vpop.eup %3923 }
 0x2fa   :  { %2058 = vmax.xlane.f32.xlu1 %v5705_v9 }
 0x2fc   :  { %1172 = vmax.xlane.f32.xlu2 %v5795_v45  ;;  %v1079_v26 = vpop.f32.mrf.mxu1  ;;  %v5931_v45 = vsel %vm1085_vm4, %v1076_v50, -1e+30  ;;  %v2134_v50 = vmul.f32 1.442695, %v2088_v29 }
 0x2fd   :  { %2416 = vadd.xlane.f32.xlu0 %v2357_v21  ;;  %v5858_v33 = vpop.xlane.xlu1 %2172  ;;  %8393 = vst [vmem:[#allocation155_spill] sm:$0xff] %v5931_v45  ;;  %v5939_v58 = vsel %vm1085_vm4, %v1079_v26, -1e+30  ;;  %v5955_v26 = vpop.f32.mrf.mxu3 }
 0x2fe   :  { %8395 = vst [vmem:[#allocation157_spill] sm:$0xff] %v5939_v58 }
 0x2ff   :  { %v5860_v41 = vpop.xlane.xlu2 %1510  ;;  %8400 = vst [vmem:[#allocation160_spill] sm:$0xff] %v5955_v26 }
 0x300   :  { %8377 = vst [vmem:[#allocation140_spill] sm:$0xff] %v5860_v41  ;;  %v5862_v5 = vpop.xlane.xlu0 %1512 }
 0x301   :  { %8378 = vst [vmem:[#allocation141_spill] sm:$0xff] %v5862_v5 }
 0x302   :  { %1296 = vadd.xlane.f32.xlu1 %v3922_v23  ;;  %v1463_v23 = vsel %vm8096_vm0, %v5723_v32, 0.0 }
 0x304   :  { %2194 = vadd.xlane.f32.xlu2 %v3924_v59  ;;  %v3926_v59 = vpop.eup %3925 }
 0x305   :  { %1174 = vmax.xlane.f32.xlu0 %v5866_v63  ;;  %v5869_v44 = vpop.xlane.xlu1 %2396 }
 0x306   :  { %8380 = vst [vmem:[#allocation143_spill] sm:$0xff] %v5869_v44  ;;  %v5885_v44 = vsel %vm1977_vm7, %v1965_v6, -1e+30  ;;  %v8388_v6 = vld [vmem:[#allocation32_spill] sm:$0xff] }
 0x307   :  { %v5873_v21 = vpop.xlane.xlu2 %2050  ;;  %8383 = vst [vmem:[#allocation146_spill] sm:$0xff] %v5885_v44  ;;  %vm8110_vm11 = vcmp.eq.s32.totalorder %v5005_v31, %v8388_v6 }
 0x308   :  { %8381 = vst [vmem:[#allocation144_spill] sm:$0xff] %v5873_v21  ;;  %v5875_v5 = vpop.xlane.xlu0 %2180  ;;  %v2358_v36 = vsel %vm8110_vm11, %v5885_v44, 0.0 }
 0x309   :  { %8382 = vst [vmem:[#allocation145_spill] sm:$0xff] %v5875_v5 }
 0x30a   :  { %1520 = vadd.xlane.f32.xlu1 %v1463_v23  ;;  %v2126_v23 = vmul.f32 1.442695, %v2084_v47  ;;  %v5908_v47 = vsel %vm2461_vm6, 1.0, %v8368_v8 }
 0x30b   :  { %8389 = vst [vmem:[#allocation151_spill] sm:$0xff] %v5908_v47 }
 0x30c   :  { %1304 = vadd.xlane.f32.xlu2 %v3926_v59  ;;  %3929 = vpow2.f32 %v2126_v23  ;;  %v3928_v59 = vpop.eup %3927 }
 0x30d   :  { %2066 = vmax.xlane.f32.xlu0 %v5885_v44  ;;  %v5888_v41 = vpop.xlane.xlu1 %2046  ;;  %3931 = vpow2.f32 %v2134_v50  ;;  %v2089_v50 = vsub.f32 %v5378_v4, %v5744_v12  ;;  %v1198_v4 = vsub.f32 %v5400_v15, %v5660_v62 }
 0x30e   :  { %8384 = vst [vmem:[#allocation147_spill] sm:$0xff] %v5888_v41 }
 0x30f   :  { %v5895_v49 = vpop.xlane.xlu2 %1160 }
 0x310   :  { %8386 = vst [vmem:[#allocation149_spill] sm:$0xff] %v5895_v49  ;;  %v5897_v39 = vpop.xlane.xlu0 %2404 }
 0x311   :  { %8387 = vst [vmem:[#allocation150_spill] sm:$0xff] %v5897_v39  ;;  %v2660_v39 = vsel %vm1694_vm14, %v5908_v47, 0.0 }
 0x312   :  { %1170 = vmax.xlane.f32.xlu1 %v5786_v2  ;;  %v2661_v47 = vadd.f32 %v2660_v39, %v5821_v19  ;;  %v3930_v13 = vpop.eup %3929  ;;  %v8398_v2 = vld [vmem:[#allocation30_spill] sm:$0xff]  ;;  %v8399_v39 = vld [vmem:[#allocation36_spill] sm:$0xff] }
 0x313   :  { %vm921_vm0 = vcmp.eq.s32.totalorder %v5005_v31, %v8398_v2  ;;  %vm922_vm12 = vcmp.eq.s32.totalorder %v5005_v31, %v8399_v39 }
 0x314   :  { %2418 = vadd.xlane.f32.xlu2 %v2358_v36  ;;  %v5925_v36 = vld [vmem:[%s7986_s1 + $0x20] sm:$0xff]  ;;  %v1468_v29 = vsel %vm922_vm12, %v5939_v58, 0.0 }
 0x315   :  { %1306 = vadd.xlane.f32.xlu0 %v3928_v59  ;;  %v5917_v23 = vpop.xlane.xlu1 %1284  ;;  %8391 = vst [vmem:[#allocation153_spill] sm:$0xff] %v5925_v36  ;;  %vm2462_vm6 = vcmp.eq.s32.totalorder %v5925_v36, 1  ;;  %v1467_v36 = vsel %vm921_vm0, %v5931_v45, 0.0 }
 0x316   :  { %v5945_v38 = vsel %vm2462_vm6, 1.0, %v8368_v8 }
 0x317   :  { %v5927_v44 = vpop.xlane.xlu2 %2182  ;;  %8397 = vst [vmem:[#allocation159_spill] sm:$0xff] %v5945_v38  ;;  %v2662_v19 = vsel %vm1694_vm14, %v5945_v38, 0.0 }
 0x318   :  { %8392 = vst [vmem:[#allocation154_spill] sm:$0xff] %v5927_v44  ;;  %v5933_v59 = vpop.xlane.xlu0 %1162  ;;  %v2664_v44 = vsel %vm1694_vm14, %v5942_v17, 0.0  ;;  %v2663_v5 = vadd.f32 %v2662_v19, %v2661_v47  ;;  %v2356_v47 = vsel %vm918_vm5, %v5835_v52, 0.0 }
 0x319   :  { %8394 = vst [vmem:[#allocation156_spill] sm:$0xff] %v5933_v59 }
 0x31a   :  { %2190 = vadd.xlane.f32.xlu1 %v3930_v13  ;;  %v1968_v13 = vpop.f32.mrf.mxu2  ;;  %v5967_v17 = vadd.f32 %v2664_v44, %v2663_v5  ;;  %v3932_v5 = vpop.eup %3931 }
 0x31b   :  { %v5981_v19 = vsel %vm1977_vm7, %v1968_v13, -1e+30  ;;  %v5984_v44 = vpop.f32.mrf.mxu3  ;;  %v1082_v13 = vpop.f32.mrf.mxu1 }
 0x31c   :  { %1528 = vadd.xlane.f32.xlu2 %v1467_v36  ;;  %v1194_v36 = vsub.f32 %v5263_v57, %v5572_v55  ;;  %8403 = vst [vmem:[#allocation163_spill] sm:$0xff] %v5984_v44  ;;  %v2136_v55 = vmul.f32 1.442695, %v2089_v50  ;;  %v5999_v44 = vsel %vm1085_vm4, %v1082_v13, -1e+30 }
 0x31d   :  { %1530 = vadd.xlane.f32.xlu0 %v1468_v29  ;;  %v5965_v38 = vpop.xlane.xlu1 %1508  ;;  %8406 = vst [vmem:[#allocation166_spill] sm:$0xff] %v5999_v44 }
 0x31e   :  { %8401 = vst [vmem:[#allocation161_spill] sm:$0xff] %v5965_v38  ;;  %v1238_v11 = vmul.f32 1.442695, %v1194_v36 }
 0x31f   :  { %v5969_v26 = vpop.xlane.xlu2 %1292 }
 0x320   :  { %v5971_v32 = vpop.xlane.xlu0 %2054  ;;  %3933 = vpow2.f32 %v1238_v11 }
 0x321   :  { %8402 = vst [vmem:[#allocation162_spill] sm:$0xff] %v5971_v32  ;;  %3935 = vpow2.f32 %v2136_v55 }
 0x322   :  { %2414 = vadd.xlane.f32.xlu1 %v2356_v47  ;;  %v5990_v47 = vpop.f32.mrf.mxu2 }
 0x323   :  { %v6009_v50 = vpop.f32.mrf.mxu3 }
 0x324   :  { %2068 = vmax.xlane.f32.xlu2 %v5981_v19  ;;  %8407 = vst [vmem:[#allocation167_spill] sm:$0xff] %v6009_v50 }
 0x325   :  { %2198 = vadd.xlane.f32.xlu0 %v3932_v5  ;;  %v5988_v29 = vpop.xlane.xlu1 %1158  ;;  %v1199_v5 = vsub.f32 %v5441_v34, %v5840_v0  ;;  %v2091_v34 = vsub.f32 %v5476_v37, %v5730_v20 }
 0x326   :  { %8404 = vst [vmem:[#allocation164_spill] sm:$0xff] %v5988_v29  ;;  %v3934_v13 = vpop.eup %3933 }
 0x327   :  { %v5992_v38 = vpop.xlane.xlu2 %2406  ;;  %v3936_v15 = vpop.eup %3935 }
 0x328   :  { %8405 = vst [vmem:[#allocation165_spill] sm:$0xff] %v5992_v38  ;;  %v5994_v57 = vpop.xlane.xlu0 %1294 }
 0x32a   :  { %2064 = vmax.xlane.f32.xlu1 %v5848_v16  ;;  %v1974_v12 = vpop.f32.mrf.mxu2  ;;  %v1248_v16 = vmul.f32 1.442695, %v1199_v5 }
 0x32b   :  { %v6017_v55 = vsel %vm1977_vm7, %v1974_v12, -1e+30  ;;  %v6028_v5 = vpop.f32.mrf.mxu3  ;;  %v1466_v12 = vsel %vm8110_vm11, %v5866_v63, 0.0 }
 0x32c   :  { %1178 = vmax.xlane.f32.xlu2 %v5939_v58  ;;  %v1246_v58 = vmul.f32 1.442695, %v1198_v4  ;;  %8410 = vst [vmem:[#allocation170_spill] sm:$0xff] %v6017_v55 }
 0x32d   :  { %v6004_v36 = vpop.xlane.xlu1 %2178  ;;  %1180 = vmax.xlane.f32.xlu0 %v5999_v44 }
 0x32e   :  { %3937 = vpow2.f32 %v1246_v58  ;;  %v2140_v58 = vmul.f32 1.442695, %v2091_v34 }
 0x32f   :  { %v6011_v11 = vpop.xlane.xlu2 %1516  ;;  %3939 = vpow2.f32 %v1248_v16  ;;  %v6041_v16 = vld [vmem:[%s7986_s1 + $0x30] sm:$0xff] }
 0x330   :  { %8408 = vst [vmem:[#allocation168_spill] sm:$0xff] %v6011_v11  ;;  %v6013_v38 = vpop.xlane.xlu0 %1518  ;;  %3941 = vpow2.f32 %v2140_v58  ;;  %vm2464_vm4 = vcmp.eq.s32.totalorder %v6041_v16, 1 }
 0x331   :  { %8409 = vst [vmem:[#allocation169_spill] sm:$0xff] %v6013_v38 }
 0x332   :  { %1302 = vadd.xlane.f32.xlu1 %v3934_v13 }
 0x334   :  { %2200 = vadd.xlane.f32.xlu2 %v3936_v15  ;;  %v3938_v13 = vpop.eup %3937  ;;  %v2087_v15 = vsub.f32 %v5308_v61, %v5611_v35  ;;  %v6051_v61 = vpop.f32.mrf.mxu3 }
 0x335   :  { %v6019_v62 = vpop.xlane.xlu1 %2402  ;;  %2072 = vmax.xlane.f32.xlu0 %v6017_v55  ;;  %8417 = vst [vmem:[#allocation176_spill] sm:$0xff] %v6051_v61 }
 0x336   :  { %8411 = vst [vmem:[#allocation171_spill] sm:$0xff] %v6019_v62  ;;  %v3940_v62 = vpop.eup %3939  ;;  %v2132_v11 = vmul.f32 1.442695, %v2087_v15 }
 0x337   :  { %v6024_v38 = vpop.xlane.xlu2 %2056  ;;  %v3942_v58 = vpop.eup %3941 }
 0x338   :  { %8412 = vst [vmem:[#allocation172_spill] sm:$0xff] %v6024_v38  ;;  %v6026_v4 = vpop.xlane.xlu0 %2186  ;;  %3943 = vpow2.f32 %v2132_v11  ;;  %v1202_v11 = vsub.f32 %v5550_v53, %v5988_v29  ;;  %v6087_v53 = vsel %vm1977_vm7, %v5990_v47, -1e+30 }
 0x339   :  { %8419 = vst [vmem:[#allocation178_spill] sm:$0xff] %v6087_v53 }
 0x33a   :  { %1526 = vadd.xlane.f32.xlu1 %v1466_v12  ;;  %v8416_v12 = vld [vmem:[#allocation34_spill] sm:$0xff] }
 0x33b   :  { %vm8155_vm3 = vcmp.eq.s32.totalorder %v5005_v31, %v8416_v12 }
 0x33c   :  { %1310 = vadd.xlane.f32.xlu2 %v3938_v13  ;;  %v6058_v13 = vsel %vm2464_vm4, 1.0, %v8368_v8  ;;  %vm2868_vm4 = vcmp.lt.s32.totalorder %v5005_v31, 13 }
 0x33d   :  { %v6036_v37 = vpop.xlane.xlu1 %2052  ;;  %1312 = vadd.xlane.f32.xlu0 %v3940_v62  ;;  %v2361_v62 = vsel %vm8155_vm3, %v6017_v55, 0.0  ;;  %v2666_v15 = vsel %vm1694_vm14, %v6058_v13, 0.0  ;;  %v6104_v47 = vsel %vm2868_vm4, %v5118_v43, -1e+30  ;;  %v2094_v43 = vsub.f32 %v5584_v10, %v5873_v21 }
 0x33e   :  { %8413 = vst [vmem:[#allocation173_spill] sm:$0xff] %v6036_v37  ;;  %v3944_v35 = vpop.eup %3943 }
 0x33f   :  { %v6043_v6 = vpop.xlane.xlu2 %1166  ;;  %8422 = vst [vmem:[#allocation181_spill] sm:$0xff] %v6104_v47 }
 0x340   :  { %8414 = vst [vmem:[#allocation174_spill] sm:$0xff] %v6043_v6  ;;  %v6045_v34 = vpop.xlane.xlu0 %2410 }
 0x341   :  { %8415 = vst [vmem:[#allocation175_spill] sm:$0xff] %v6045_v34  ;;  %v6065_v34 = vld [vmem:[%s7986_s1 + $0x40] sm:$0xff] }
 0x342   :  { %1176 = vmax.xlane.f32.xlu1 %v5931_v45  ;;  %vm2466_vm6 = vcmp.eq.s32.totalorder %v6065_v34, 1  ;;  %v1254_v45 = vmul.f32 1.442695, %v1202_v11  ;;  %v2360_v11 = vsel %vm922_vm12, %v6087_v53, 0.0 }
 0x343   :  { %v6090_v29 = vsel %vm2466_vm6, 1.0, %v8368_v8 }
 0x344   :  { %2424 = vadd.xlane.f32.xlu2 %v2361_v62  ;;  %v6075_v62 = vld [vmem:[%s7986_s1 + $0x38] sm:$0xff]  ;;  %8420 = vst [vmem:[#allocation179_spill] sm:$0xff] %v6090_v29  ;;  %v2670_v55 = vsel %vm1694_vm14, %v6090_v29, 0.0  ;;  %3945 = vpow2.f32 %v1254_v45  ;;  %v1201_v45 = vsub.f32 %v5507_v22, %v5790_v25 }
 0x345   :  { %v6067_v61 = vpop.xlane.xlu1 %1290  ;;  %2204 = vadd.xlane.f32.xlu0 %v3942_v58  ;;  %vm2465_vm11 = vcmp.eq.s32.totalorder %v6075_v62, 1  ;;  %v2667_v58 = vadd.f32 %v2666_v15, %v5967_v17  ;;  %v1197_v15 = vsub.f32 %v5351_v28, %v5639_v14  ;;  %v2146_v14 = vmul.f32 1.442695, %v2094_v43  ;;  %v8430_v22 = vld [vmem:[#allocation64_spill] sm:$0xff] }
 0x346   :  { %v6093_v0 = vsel %vm2465_vm11, 1.0, %v8368_v8 }
 0x347   :  { %v6077_v20 = vpop.xlane.xlu2 %2188  ;;  %8421 = vst [vmem:[#allocation180_spill] sm:$0xff] %v6093_v0  ;;  %v2668_v17 = vsel %vm1694_vm14, %v6093_v0, 0.0  ;;  %v2092_v0 = vsub.f32 %v5489_v51, %v5888_v41  ;;  %v8425_v51 = vld [vmem:[#allocation38_spill] sm:$0xff] }
 0x348   :  { %v6080_v50 = vpop.xlane.xlu0 %1168  ;;  %v2669_v63 = vadd.f32 %v2668_v17, %v2667_v58  ;;  %v1244_v58 = vmul.f32 1.442695, %v1197_v15 }
 0x349   :  { %8418 = vst [vmem:[#allocation177_spill] sm:$0xff] %v6080_v50  ;;  %v2142_v39 = vmul.f32 1.442695, %v2092_v0 }
 0x34a   :  { %2196 = vadd.xlane.f32.xlu1 %v3944_v35  ;;  %v6111_v35 = vpop.f32.mrf.mxu3  ;;  %v6117_v28 = vadd.f32 %v2670_v55, %v2669_v63  ;;  %3947 = vpow2.f32 %v1244_v58  ;;  %v3946_v63 = vpop.eup %3945 }
 0x34b   :  { %8423 = vst [vmem:[#allocation182_spill] sm:$0xff] %v6111_v35  ;;  %3949 = vpow2.f32 %v2142_v39  ;;  %v2090_v39 = vsub.f32 %v8430_v22, %v5682_v3 }
 0x34c   :  { %2901 = vmax.xlane.f32.xlu2 %v6104_v47  ;;  %3951 = vpow2.f32 %v2146_v14 }
 0x34d   :  { %v6115_v29 = vpop.xlane.xlu1 %1514  ;;  %2422 = vadd.xlane.f32.xlu0 %v2360_v11  ;;  %v6129_v11 = vsel %vm2868_vm4, %v8425_v51, -1e+30  ;;  %v1252_v51 = vmul.f32 1.442695, %v1201_v45 }
 0x34e   :  { %8424 = vst [vmem:[#allocation183_spill] sm:$0xff] %v6115_v29 }
 0x34f   :  { %v6121_v17 = vpop.xlane.xlu2 %1298  ;;  %8426 = vst [vmem:[#allocation38_spill] sm:$0xff] %v6129_v11  ;;  %3953 = vpow2.f32 %v1252_v51 }
 0x350   :  { %v6123_v47 = vpop.xlane.xlu0 %2060  ;;  %v3948_v58 = vpop.eup %3947 }
 0x351   :  { %v3950_v29 = vpop.eup %3949 }
 0x352   :  { %2070 = vmax.xlane.f32.xlu1 %v6087_v53  ;;  %v6138_v55 = vpop.f32.mrf.mxu3  ;;  %v3952_v21 = vpop.eup %3951 }
 0x353   :  { %8428 = vst [vmem:[#allocation185_spill] sm:$0xff] %v6138_v55 }
 0x354   :  { %2903 = vmax.xlane.f32.xlu2 %v6129_v11 }
 0x355   :  { %v6134_v10 = vpop.xlane.xlu1 %1164  ;;  %1318 = vadd.xlane.f32.xlu0 %v3946_v63  ;;  %v2138_v63 = vmul.f32 1.442695, %v2090_v39  ;;  %v3954_v51 = vpop.eup %3953 }
 0x356   :  { %8427 = vst [vmem:[#allocation184_spill] sm:$0xff] %v6134_v10  ;;  %v1205_v0 = vsub.f32 %v5658_v24, %v6134_v10  ;;  %v2097_v24 = vsub.f32 %v5692_v40, %v6024_v38  ;;  %v1200_v40 = vsub.f32 %v5447_v42, %v5747_v60  ;;  %v8443_v38 = vld [vmem:[#allocation83_spill] sm:$0xff]  ;;  %v8453_v60 = vld [vmem:[#allocation129_spill] sm:$0xff] }
 0x357   :  { %v6140_v15 = vpop.xlane.xlu2 %2412 }
 0x358   :  { %8429 = vst [vmem:[#allocation186_spill] sm:$0xff] %v6140_v15  ;;  %v6142_v43 = vpop.xlane.xlu0 %1300  ;;  %v1260_v11 = vmul.f32 1.442695, %v1205_v0  ;;  %v1250_v39 = vmul.f32 1.442695, %v1200_v40  ;;  %v1204_v40 = vsub.f32 %v5615_v7, %v5933_v59 }
 0x35a   :  { %1308 = vadd.xlane.f32.xlu1 %v3948_v58  ;;  %3955 = vpow2.f32 %v1260_v11  ;;  %v6154_v0 = vpop.f32.mrf.mxu3  ;;  %v2152_v58 = vmul.f32 1.442695, %v2097_v24  ;;  %v2095_v11 = vsub.f32 %v5597_v27, %v6036_v37  ;;  %v8451_v37 = vld [vmem:[#allocation51_spill] sm:$0xff] }
 0x35b   :  { %8433 = vst [vmem:[#allocation188_spill] sm:$0xff] %v6154_v0  ;;  %3957 = vpow2.f32 %v2138_v63 }
 0x35c   :  { %2206 = vadd.xlane.f32.xlu2 %v3950_v29  ;;  %v1469_v29 = vsel %vm8155_vm3, %v5999_v44, 0.0  ;;  %3959 = vlog2.f32 %v5654_v46  ;;  %v8437_v46 = vld [vmem:[#allocation39_spill] sm:$0xff] }
 0x35d   :  { %v6146_v14 = vpop.xlane.xlu1 %2184  ;;  %2210 = vadd.xlane.f32.xlu0 %v3952_v21  ;;  %3961 = vpow2.f32 %v2152_v58  ;;  %v6177_v27 = vsel %vm2868_vm4, %v8437_v46, -1e+30 }
 0x35e   :  { %3963 = vlog2.f32 %v5680_v54  ;;  %8438 = vst [vmem:[#allocation39_spill] sm:$0xff] %v6177_v27 }
 0x35f   :  { %v6150_v15 = vpop.xlane.xlu2 %1522  ;;  %3965 = vpow2.f32 %v1250_v39 }
 0x360   :  { %8431 = vst [vmem:[#allocation64_spill] sm:$0xff] %v6150_v15  ;;  %v6152_v45 = vpop.xlane.xlu0 %1524  ;;  %v3956_v21 = vpop.eup %3955  ;;  %3967 = vlog2.f32 %v5701_v18 }
 0x361   :  { %8432 = vst [vmem:[#allocation187_spill] sm:$0xff] %v6152_v45  ;;  %v3958_v63 = vpop.eup %3957  ;;  %v1258_v45 = vmul.f32 1.442695, %v1204_v40 }
 0x362   :  { %1532 = vadd.xlane.f32.xlu1 %v1469_v29  ;;  %v2148_v29 = vmul.f32 1.442695, %v2095_v11  ;;  %v3960_v42 = vpop.eup %3959 }
 0x363   :  { %v3962_v58 = vpop.eup %3961  ;;  %v2235_v11 = vmul.f32 0.6931472, %v3960_v42  ;;  %v2093_v42 = vsub.f32 %v8443_v38, %v5825_v56  ;;  %v6215_v38 = vld [vmem:[%s7986_s1 + $0x58] sm:$0xff]  ;;  %v2359_v56 = vsel %vm921_vm0, %v5981_v19, 0.0 }
 0x364   :  { %1316 = vadd.xlane.f32.xlu2 %v3954_v51  ;;  %v6172_v51 = vpop.f32.mrf.mxu3  ;;  %3969 = vpow2.f32 %v2148_v29  ;;  %v3964_v18 = vpop.eup %3963  ;;  %vm2469_vm6 = vcmp.eq.s32.totalorder %v6215_v38, 1 }
 0x365   :  { %v6165_v22 = vpop.xlane.xlu1 %2408  ;;  %1324 = vadd.xlane.f32.xlu0 %v3956_v21  ;;  %8436 = vst [vmem:[#allocation191_spill] sm:$0xff] %v6172_v51  ;;  %v6188_v21 = vld [vmem:[%s7986_s1 + $0x48] sm:$0xff]  ;;  %3971 = vlog2.f32 %v5769_v30  ;;  %v3966_v46 = vpop.eup %3965  ;;  %v2144_v51 = vmul.f32 1.442695, %v2093_v42 }
 0x366   :  { %8434 = vst [vmem:[#allocation189_spill] sm:$0xff] %v6165_v22  ;;  %vm2467_vm7 = vcmp.eq.s32.totalorder %v6188_v21, 1  ;;  %v3968_v7 = vpop.eup %3967  ;;  %v1345_v22 = vmul.f32 0.6931472, %v3964_v18  ;;  %vm1575_vm3 = vcmp.eq.s32.totalorder %v6188_v21, 0 }
 0x367   :  { %v6167_v12 = vpop.xlane.xlu2 %2062  ;;  %v6201_v30 = vsel %vm2467_vm7, 1.0, %v8368_v8 }
 0x368   :  { %8435 = vst [vmem:[#allocation190_spill] sm:$0xff] %v6167_v12  ;;  %v6169_v24 = vpop.xlane.xlu0 %2192 }
 0x36a   :  { %2202 = vadd.xlane.f32.xlu1 %v3958_v63  ;;  %v3970_v29 = vpop.eup %3969 }
 0x36b   :  { %v3972_v0 = vpop.eup %3971 }
 0x36c   :  { %2905 = vmax.xlane.f32.xlu2 %v6177_v27  ;;  %v8444_v27 = vld [vmem:[#allocation120_spill] sm:$0xff]  ;;  %v1343_v3 = vmul.f32 0.6931472, %v3972_v0 }
 0x36d   :  { %v6183_v54 = vpop.xlane.xlu1 %2058  ;;  %2216 = vadd.xlane.f32.xlu0 %v3962_v58  ;;  %v8442_v58 = vld [vmem:[#allocation45_spill] sm:$0xff]  ;;  %3973 = vlog2.f32 %v8444_v27 }
 0x36e   :  { %8439 = vst [vmem:[#allocation192_spill] sm:$0xff] %v6183_v54  ;;  %v2298_v15 = vadd.f32 %v2235_v11, %v8442_v58  ;;  %3975 = vpow2.f32 %v1258_v45  ;;  %v2672_v11 = vsel %vm1694_vm14, %v6201_v30, 0.0  ;;  %v2098_v27 = vsub.f32 %v5705_v9, %v6183_v54  ;;  %v8450_v58 = vld [vmem:[#allocation128_spill] sm:$0xff]  ;;  %v8452_v9 = vld [vmem:[#allocation47_spill] sm:$0xff] }
 0x36f   :  { %v6191_v39 = vpop.xlane.xlu2 %1172  ;;  %vm1567_vm11 = vcmp.eq.s32.totalorder %v8450_v58, 0  ;;  %v1347_v45 = vmul.f32 0.6931472, %v3968_v7  ;;  %v1407_v54 = vadd.f32 %v1345_v22, %v8452_v9  ;;  %3977 = vlog2.f32 %v8453_v60  ;;  %v8457_v9 = vld [vmem:[#allocation55_spill] sm:$0xff] }
 0x370   :  { %8440 = vst [vmem:[#allocation193_spill] sm:$0xff] %v6191_v39  ;;  %v6193_v63 = vpop.xlane.xlu0 %2416  ;;  %v2426_v59 = vsub.f32 %v2298_v15, %v8451_v37  ;;  %3979 = vlog2.f32 %v5858_v33  ;;  %v2673_v37 = vadd.f32 %v2672_v11, %v6117_v28  ;;  %v6249_v60 = vsel %vm2469_vm6, 1.0, %v8368_v8  ;;  %v8458_v11 = vld [vmem:[#allocation49_spill] sm:$0xff] }
 0x371   :  { %8441 = vst [vmem:[#allocation194_spill] sm:$0xff] %v6193_v63  ;;  %v8445_v63 = vld [vmem:[#allocation40_spill] sm:$0xff]  ;;  %3981 = vlog2.f32 %v5823_v48  ;;  %v2154_v15 = vmul.f32 1.442695, %v2098_v27  ;;  %v1408_v0 = vadd.f32 %v1347_v45, %v8457_v9  ;;  %v2676_v33 = vsel %vm1694_vm14, %v6249_v60, 0.0  ;;  %v8459_v27 = vld [vmem:[#allocation90_spill] sm:$0xff] }
 0x372   :  { %1314 = vadd.xlane.f32.xlu1 %v3966_v46  ;;  %v6206_v40 = vsel %vm2868_vm4, %v8445_v63, -1e+30  ;;  %v6208_v46 = vpop.f32.mrf.mxu3  ;;  %3983 = vlog2.f32 %v5917_v23  ;;  %v1535_v2 = vsub.f32 %v1407_v54, %v8458_v11  ;;  %v1203_v10 = vsub.f32 %v8459_v27, %v5895_v49  ;;  %v8460_v23 = vld [vmem:[#allocation126_spill] sm:$0xff]  ;;  %v8461_v9 = vld [vmem:[#allocation125_spill] sm:$0xff]  ;;  %v8466_v27 = vld [vmem:[#allocation127_spill] sm:$0xff] }
 0x373   :  { %8446 = vst [vmem:[#allocation45_spill] sm:$0xff] %v6206_v40  ;;  %v3974_v42 = vpop.eup %3973  ;;  %3985 = vpow2.f32 %v2144_v51  ;;  %v3679_v45 = vsel %vm1567_vm11, 1.0, %v8368_v8  ;;  %vm1568_vm6 = vcmp.eq.s32.totalorder %v8460_v23, 0  ;;  %v8463_v51 = vld [vmem:[#allocation117_spill] sm:$0xff] }
 0x374   :  { %2212 = vadd.xlane.f32.xlu2 %v3970_v29  ;;  %8447 = vst [vmem:[#allocation83_spill] sm:$0xff] %v6208_v46  ;;  %v8448_v29 = vld [vmem:[#allocation41_spill] sm:$0xff]  ;;  %v3976_v48 = vpop.eup %3975  ;;  %3987 = vlog2.f32 %v5844_v1  ;;  %v8462_v46 = vld [vmem:[#allocation44_spill] sm:$0xff]  ;;  %v1207_v54 = vsub.f32 %v8463_v51, %v6080_v50  ;;  %v2554_v1 = vmul.f32 %v8466_v27, %v2426_v59  ;;  %v2239_v55 = vmul.f32 0.6931472, %v3974_v42  ;;  %v8469_v27 = vld [vmem:[#allocation103_spill] sm:$0xff] }
 0x375   :  { %v6219_v18 = vpop.xlane.xlu1 %1296  ;;  %v6224_v63 = vsel %vm2868_vm4, %v8448_v29, -1e+30  ;;  %v6238_v29 = vld [vmem:[%s7986_s1 + $0x50] sm:$0xff]  ;;  %8455 = vst [vmem:[#allocation41_spill] sm:$0xff] %v6249_v60  ;;  %v1406_v35 = vadd.f32 %v1343_v3, %v8462_v46  ;;  %3989 = vpow2.f32 %v2154_v15  ;;  %v1663_v51 = vmul.f32 %v3679_v45, %v1535_v2  ;;  %v8471_v50 = vld [vmem:[#allocation48_spill] sm:$0xff]  ;;  %v8474_v60 = vld [vmem:[#allocation57_spill] sm:$0xff] }
 0x376   :  { %8449 = vst [vmem:[#allocation120_spill] sm:$0xff] %v6224_v63  ;;  %vm2468_vm7 = vcmp.eq.s32.totalorder %v6238_v29, 1  ;;  %v1765_v59 = vsel %vm1694_vm14, %v3679_v45, 0.0  ;;  %v2096_v2 = vsub.f32 %v8469_v27, %v5971_v32  ;;  %v6302_v40 = vsel %vm1694_vm14, %v2554_v1, 0.0  ;;  %v8472_v63 = vld [vmem:[#allocation58_spill] sm:$0xff] }
 0x377   :  { %v6240_v7 = vpop.xlane.xlu2 %2194  ;;  %v6252_v22 = vsel %vm2468_vm7, 1.0, %v8368_v8  ;;  %vm1566_vm7 = vcmp.eq.s32.totalorder %v8461_v9, 0  ;;  %v1534_v9 = vsub.f32 %v1406_v35, %v8471_v50  ;;  %v2300_v44 = vadd.f32 %v2239_v55, %v8472_v63  ;;  %v8475_v35 = vld [vmem:[#allocation153_spill] sm:$0xff]  ;;  %v8477_v55 = vld [vmem:[#allocation52_spill] sm:$0xff] }
 0x378   :  { %v6243_v41 = vpop.xlane.xlu0 %1174  ;;  %8456 = vst [vmem:[#allocation128_spill] sm:$0xff] %v6252_v22  ;;  %v2674_v28 = vsel %vm1694_vm14, %v6252_v22, 0.0  ;;  %v3678_v15 = vsel %vm1566_vm7, 1.0, %v8368_v8  ;;  %v1696_v32 = vsel %vm1694_vm14, %v1663_v51, 0.0  ;;  %vm1570_vm11 = vcmp.eq.s32.totalorder %v8475_v35, 0 }
 0x379   :  { %8454 = vst [vmem:[#allocation40_spill] sm:$0xff] %v6243_v41  ;;  %v2675_v25 = vadd.f32 %v2674_v28, %v2673_v37  ;;  %v6279_v28 = vsel %vm2868_vm4, %v6028_v5, -1e+30  ;;  %v1764_v42 = vsel %vm1694_vm14, %v3678_v15, 0.0 }
 0x37a   :  { %2420 = vadd.xlane.f32.xlu1 %v2359_v56  ;;  %v3978_v56 = vpop.eup %3977  ;;  %8465 = vst [vmem:[#allocation47_spill] sm:$0xff] %v6279_v28  ;;  %v6283_v46 = vpop.f32.mrf.mxu3  ;;  %v1766_v53 = vadd.f32 %v1765_v59, %v1764_v42  ;;  %v8479_v59 = vld [vmem:[#allocation61_spill] sm:$0xff] }
 0x37b   :  { %v6274_v37 = vadd.f32 %v2676_v33, %v2675_v25  ;;  %v3980_v58 = vpop.eup %3979  ;;  %8468 = vst [vmem:[#allocation129_spill] sm:$0xff] %v6283_v46  ;;  %v3680_v25 = vsel %vm1568_vm6, 1.0, %v8368_v8  ;;  %v1256_v33 = vmul.f32 1.442695, %v1203_v10  ;;  %v1264_v10 = vmul.f32 1.442695, %v1207_v54 }
 0x37c   :  { %1322 = vadd.xlane.f32.xlu2 %v3976_v48  ;;  %v8467_v48 = vld [vmem:[#allocation53_spill] sm:$0xff]  ;;  %v3982_v3 = vpop.eup %3981  ;;  %v1767_v46 = vsel %vm1694_vm14, %v3680_v25, 0.0  ;;  %v2237_v31 = vmul.f32 0.6931472, %v3980_v58  ;;  %v8476_v54 = vld [vmem:[#allocation154_spill] sm:$0xff] }
 0x37d   :  { %v6272_v11 = vpop.xlane.xlu1 %1520  ;;  %v1536_v49 = vsub.f32 %v1408_v0, %v8467_v48  ;;  %v2241_v0 = vmul.f32 0.6931472, %v3978_v56  ;;  %v8473_v56 = vld [vmem:[#allocation145_spill] sm:$0xff]  ;;  %v2150_v58 = vmul.f32 1.442695, %v2096_v2  ;;  %v8482_v2 = vld [vmem:[#allocation56_spill] sm:$0xff] }
 0x37e   :  { %8464 = vst [vmem:[#allocation51_spill] sm:$0xff] %v6272_v11  ;;  %v3984_v11 = vpop.eup %3983  ;;  %3991 = vlog2.f32 %v8473_v56  ;;  %v1351_v1 = vmul.f32 0.6931472, %v3982_v3  ;;  %v2299_v63 = vadd.f32 %v2237_v31, %v8477_v55  ;;  %v8487_v55 = vld [vmem:[#allocation50_spill] sm:$0xff] }
 0x37f   :  { %v6291_v5 = vpop.xlane.xlu2 %1304  ;;  %v3986_v23 = vpop.eup %3985  ;;  %v1664_v45 = vmul.f32 %v3680_v25, %v1536_v49  ;;  %3993 = vpow2.f32 %v1256_v33  ;;  %v1349_v22 = vmul.f32 0.6931472, %v3984_v11  ;;  %v2301_v50 = vadd.f32 %v2241_v0, %v8474_v60  ;;  %v8480_v60 = vld [vmem:[#allocation130_spill] sm:$0xff] }
 0x380   :  { %v6297_v48 = vpop.xlane.xlu0 %2066  ;;  %v3988_v28 = vpop.eup %3987  ;;  %3995 = vlog2.f32 %v8476_v54  ;;  %v1662_v49 = vmul.f32 %v3678_v15, %v1534_v9  ;;  %v2428_v33 = vsub.f32 %v2300_v44, %v8479_v59  ;;  %v3682_v0 = vsel %vm1570_vm11, 1.0, %v8368_v8  ;;  %v8484_v9 = vld [vmem:[#allocation60_spill] sm:$0xff]  ;;  %v8486_v54 = vld [vmem:[#allocation63_spill] sm:$0xff] }
 0x381   :  { %8470 = vst [vmem:[#allocation55_spill] sm:$0xff] %v6297_v48  ;;  %v3990_v27 = vpop.eup %3989  ;;  %3997 = vpow2.f32 %v1264_v10  ;;  %v1698_v51 = vsel %vm1694_vm14, %v1664_v45, 0.0  ;;  %v1353_v11 = vmul.f32 0.6931472, %v3988_v28  ;;  %v1409_v15 = vadd.f32 %v1349_v22, %v8482_v2  ;;  %v8485_v45 = vld [vmem:[#allocation148_spill] sm:$0xff] }
 0x382   :  { %2208 = vadd.xlane.f32.xlu1 %v3986_v23  ;;  %v8481_v23 = vld [vmem:[#allocation152_spill] sm:$0xff]  ;;  %3999 = vlog2.f32 %v5969_v26  ;;  %v2429_v10 = vsub.f32 %v2301_v50, %v8484_v9  ;;  %vm1569_vm7 = vcmp.eq.s32.totalorder %v8485_v45, 0  ;;  %v1695_v35 = vsel %vm1694_vm14, %v1662_v49, 0.0 }
 0x383   :  { %vm1571_vm6 = vcmp.eq.s32.totalorder %v8481_v23, 0  ;;  %4001 = vpow2.f32 %v2150_v58  ;;  %v1410_v22 = vadd.f32 %v1351_v1, %v8486_v54  ;;  %v2427_v26 = vsub.f32 %v2299_v63, %v8487_v55  ;;  %v8489_v2 = vld [vmem:[#allocation68_spill] sm:$0xff]  ;;  %v8490_v1 = vld [vmem:[#allocation54_spill] sm:$0xff]  ;;  %v8492_v55 = vld [vmem:[#allocation151_spill] sm:$0xff] }
 0x384   :  { %2218 = vadd.xlane.f32.xlu2 %v3990_v27  ;;  %v3992_v3 = vpop.eup %3991  ;;  %v6327_v27 = vpop.f32.mrf.mxu3  ;;  %4003 = vlog2.f32 %v6004_v36  ;;  %v1411_v9 = vadd.f32 %v1353_v11, %v8489_v2  ;;  %v2100_v58 = vsub.f32 %v5835_v52, %v6167_v12  ;;  %v3681_v49 = vsel %vm1569_vm7, 1.0, %v8368_v8  ;;  %v8491_v36 = vld [vmem:[#allocation109_spill] sm:$0xff] }
 0x385   :  { %v6311_v25 = vpop.xlane.xlu1 %1170  ;;  %v3994_v56 = vpop.eup %3993  ;;  %v1537_v54 = vsub.f32 %v1409_v15, %v8490_v1  ;;  %v1206_v63 = vsub.f32 %v8491_v36, %v6043_v6  ;;  %v2557_v11 = vmul.f32 %v8492_v55, %v2429_v10  ;;  %v1769_v52 = vsel %vm1694_vm14, %v3681_v49, 0.0 }
 0x386   :  { %8478 = vst [vmem:[#allocation49_spill] sm:$0xff] %v6311_v25  ;;  %v1208_v42 = vsub.f32 %v8480_v60, %v6311_v25  ;;  %v3996_v59 = vpop.eup %3995  ;;  %v8488_v60 = vld [vmem:[#allocation133_spill] sm:$0xff]  ;;  %v2245_v12 = vmul.f32 0.6931472, %v3992_v3  ;;  %vm1573_vm11 = vcmp.eq.s32.totalorder %v6075_v62, 0  ;;  %vm1574_vm7 = vcmp.eq.s32.totalorder %v6065_v34, 0 }
 0x387   :  { %v6321_v31 = vpop.xlane.xlu2 %2418  ;;  %v2556_v50 = vmul.f32 %v8488_v60, %v2428_v33  ;;  %v1697_v33 = vadd.f32 %v1696_v32, %v1695_v35  ;;  %v1768_v60 = vadd.f32 %v1767_v46, %v1766_v53  ;;  %v2247_v25 = vmul.f32 0.6931472, %v3996_v59  ;;  %v8495_v35 = vld [vmem:[#allocation66_spill] sm:$0xff]  ;;  %v8511_v34 = vld [vmem:[#allocation75_spill] sm:$0xff] }
 0x388   :  { %8483 = vst [vmem:[#allocation90_spill] sm:$0xff] %v6321_v31  ;;  %v1266_v44 = vmul.f32 1.442695, %v1208_v42  ;;  %v6325_v28 = vpop.xlane.xlu0 %1306  ;;  %v3998_v42 = vpop.eup %3997  ;;  %v8494_v31 = vld [vmem:[#allocation134_spill] sm:$0xff]  ;;  %v3683_v32 = vsel %vm1571_vm6, 1.0, %v8368_v8  ;;  %v1539_v10 = vsub.f32 %v1411_v9, %v8495_v35  ;;  %v6361_v23 = vsel %vm1694_vm14, %v2557_v11, 0.0 }
 0x389   :  { %v2555_v45 = vmul.f32 %v8494_v31, %v2427_v26  ;;  %v2158_v53 = vmul.f32 1.442695, %v2100_v58  ;;  %v1665_v31 = vmul.f32 %v3681_v49, %v1537_v54  ;;  %v1262_v3 = vmul.f32 1.442695, %v1206_v63  ;;  %v8498_v35 = vld [vmem:[#allocation71_spill] sm:$0xff]  ;;  %v8499_v49 = vld [vmem:[#allocation77_spill] sm:$0xff] }
 0x38a   :  { %4005 = vpow2.f32 %v1266_v44  ;;  %1320 = vadd.xlane.f32.xlu1 %v3994_v56  ;;  %v4000_v44 = vpop.eup %3999  ;;  %v8493_v56 = vld [vmem:[#allocation65_spill] sm:$0xff]  ;;  %v2589_v1 = vsel %vm1694_vm14, %v2556_v50, 0.0  ;;  %v1770_v36 = vadd.f32 %v1769_v52, %v1768_v60  ;;  %v1699_v9 = vadd.f32 %v1698_v51, %v1697_v33 }
 0x38b   :  { %4007 = vlog2.f32 %v5994_v57  ;;  %v1538_v2 = vsub.f32 %v1410_v22, %v8493_v56  ;;  %v4002_v57 = vpop.eup %4001  ;;  %v1773_v22 = vsel %vm1694_vm14, %v3683_v32, 0.0  ;;  %v2587_v56 = vsel %vm1694_vm14, %v2555_v45, 0.0 }
 0x38c   :  { %1328 = vadd.xlane.f32.xlu2 %v3998_v42  ;;  %4009 = vlog2.f32 %v6067_v61  ;;  %v4004_v46 = vpop.eup %4003  ;;  %v1771_v42 = vsel %vm1694_vm14, %v3682_v0, 0.0  ;;  %v2303_v6 = vadd.f32 %v2245_v12, %v8498_v35  ;;  %v2304_v54 = vadd.f32 %v2247_v25, %v8499_v49  ;;  %v6369_v11 = vpop.f32.mrf.mxu3 }
 0x38d   :  { %v6348_v15 = vpop.xlane.xlu1 %2190  ;;  %v1666_v58 = vmul.f32 %v3682_v0, %v1538_v2  ;;  %v1667_v63 = vmul.f32 %v3683_v32, %v1539_v10  ;;  %v2243_v50 = vmul.f32 0.6931472, %v4004_v46  ;;  %4011 = vpow2.f32 %v2158_v53  ;;  %v8500_v0 = vld [vmem:[#allocation121_spill] sm:$0xff]  ;;  %v8501_v32 = vld [vmem:[#allocation74_spill] sm:$0xff] }
 0x38e   :  { %v1700_v51 = vsel %vm1694_vm14, %v1665_v31, 0.0  ;;  %v1357_v33 = vmul.f32 0.6931472, %v4000_v44  ;;  %4013 = vpow2.f32 %v1262_v3  ;;  %v2099_v60 = vsub.f32 %v8500_v0, %v6123_v47  ;;  %v8502_v10 = vld [vmem:[#allocation70_spill] sm:$0xff] }
 0x38f   :  { %v6357_v26 = vpop.xlane.xlu2 %1528  ;;  %v2588_v12 = vadd.f32 %v2587_v56, %v6302_v40  ;;  %v1772_v25 = vadd.f32 %v1771_v42, %v1770_v36  ;;  %4015 = vlog2.f32 %v6026_v4  ;;  %v1702_v45 = vsel %vm1694_vm14, %v1666_v58, 0.0  ;;  %v8503_v42 = vld [vmem:[#allocation59_spill] sm:$0xff]  ;;  %v8504_v4 = vld [vmem:[#allocation73_spill] sm:$0xff] }
 0x390   :  { %8496 = vst [vmem:[#allocation126_spill] sm:$0xff] %v6357_v26  ;;  %v4006_v59 = vpop.eup %4005  ;;  %v6363_v55 = vpop.xlane.xlu0 %1530  ;;  %v2432_v53 = vsub.f32 %v2304_v54, %v8502_v10  ;;  %vm1572_vm6 = vcmp.eq.s32.totalorder %v6041_v16, 0  ;;  %v1704_v46 = vsel %vm1694_vm14, %v1667_v63, 0.0  ;;  %v1701_v31 = vadd.f32 %v1700_v51, %v1699_v9  ;;  %v8505_v56 = vld [vmem:[#allocation87_spill] sm:$0xff]  ;;  %v8506_v63 = vld [vmem:[#allocation158_spill] sm:$0xff] }
 0x391   :  { %8497 = vst [vmem:[#allocation125_spill] sm:$0xff] %v6363_v55  ;;  %v4008_v61 = vpop.eup %4007  ;;  %1330 = vadd.xlane.f32.xlu0 %v4006_v59  ;;  %v3685_v40 = vsel %vm1573_vm11, 1.0, %v8368_v8  ;;  %v2302_v3 = vadd.f32 %v2243_v50, %v8503_v42  ;;  %v1413_v59 = vadd.f32 %v1357_v33, %v8504_v4  ;;  %v2156_v36 = vmul.f32 1.442695, %v2099_v60 }
 0x392   :  { %2214 = vadd.xlane.f32.xlu1 %v4002_v57  ;;  %v4010_v52 = vpop.eup %4009  ;;  %v1359_v2 = vmul.f32 0.6931472, %v4008_v61  ;;  %v2431_v57 = vsub.f32 %v2303_v6, %v8501_v32  ;;  %v2590_v58 = vadd.f32 %v2589_v1, %v2588_v12  ;;  %v3684_v9 = vsel %vm1572_vm6, 1.0, %v8368_v8  ;;  %v8508_v12 = vld [vmem:[#allocation80_spill] sm:$0xff] }
 0x393   :  { %v1355_v6 = vmul.f32 0.6931472, %v4010_v52  ;;  %v4012_v16 = vpop.eup %4011  ;;  %v1774_v49 = vadd.f32 %v1773_v22, %v1772_v25  ;;  %v2560_v51 = vmul.f32 %v6058_v13, %v2432_v53  ;;  %v1775_v33 = vsel %vm1694_vm14, %v3684_v9, 0.0  ;;  %v8507_v52 = vld [vmem:[#allocation62_spill] sm:$0xff]  ;;  %v8510_v32 = vld [vmem:[#allocation132_spill] sm:$0xff] }
 0x394   :  { %v1414_v35 = vadd.f32 %v1359_v2, %v8505_v56  ;;  %v4014_v62 = vpop.eup %4013  ;;  %v2559_v50 = vmul.f32 %v8506_v63, %v2431_v57  ;;  %4017 = vlog2.f32 %v6146_v14  ;;  %v1703_v60 = vadd.f32 %v1702_v45, %v1701_v31  ;;  %v8509_v2 = vld [vmem:[#allocation69_spill] sm:$0xff]  ;;  %v6413_v31 = vpop.f32.mrf.mxu3 }
 0x395   :  { %v6380_v44 = vpop.xlane.xlu1 %2414  ;;  %v4016_v0 = vpop.eup %4015  ;;  %v3686_v1 = vsel %vm1574_vm7, 1.0, %v8368_v8  ;;  %v2430_v22 = vsub.f32 %v2302_v3, %v8507_v52  ;;  %4019 = vlog2.f32 %v6077_v20  ;;  %v1541_v25 = vsub.f32 %v1413_v59, %v8508_v12  ;;  %v6431_v56 = vld [vmem:[%s7986_s1 + $0x60] sm:$0xff]  ;;  %v8517_v12 = vld [vmem:[#allocation91_spill] sm:$0xff] }
 0x396   :  { %v1412_v13 = vadd.f32 %v1355_v6, %v8509_v2  ;;  %4021 = vpow2.f32 %v2156_v36  ;;  %v1209_v14 = vsub.f32 %v8510_v32, %v6191_v39  ;;  %v1777_v57 = vsel %vm1694_vm14, %v3685_v40, 0.0  ;;  %v8512_v6 = vld [vmem:[#allocation159_spill] sm:$0xff] }
 0x397   :  { %v6389_v61 = vpop.xlane.xlu2 %2068  ;;  %v6410_v45 = vsel %vm1694_vm14, %v3686_v1, 0.0  ;;  %v1542_v10 = vsub.f32 %v1414_v35, %v8511_v34  ;;  %v1776_v53 = vadd.f32 %v1775_v33, %v1774_v49  ;;  %v6416_v20 = vsel %vm1694_vm14, %v2559_v50, 0.0  ;;  %v8513_v35 = vld [vmem:[#allocation139_spill] sm:$0xff] }
 0x398   :  { %v6393_v54 = vpop.xlane.xlu0 %2198  ;;  %v6419_v42 = vsel %vm1694_vm14, %v2560_v51, 0.0  ;;  %v2592_v3 = vadd.f32 %v6361_v23, %v2590_v58  ;;  %v2251_v4 = vmul.f32 0.6931472, %v4016_v0  ;;  %v2558_v36 = vmul.f32 %v8512_v6, %v2430_v22  ;;  %v8514_v23 = vld [vmem:[#allocation67_spill] sm:$0xff] }
 0x399   :  { %2222 = vadd.xlane.f32.xlu0 %v4012_v16  ;;  %v6425_v16 = vadd.f32 %v1704_v46, %v1703_v60  ;;  %vm1576_vm11 = vcmp.eq.s32.totalorder %v6238_v29, 0  ;;  %v1669_v63 = vmul.f32 %v3685_v40, %v1541_v25  ;;  %v1540_v58 = vsub.f32 %v1412_v13, %v8514_v23 }
 0x39a   :  { %1326 = vadd.xlane.f32.xlu1 %v4014_v62  ;;  %v4018_v62 = vpop.eup %4017  ;;  %4023 = vlog2.f32 %v6121_v17  ;;  %v1268_v50 = vmul.f32 1.442695, %v1209_v14  ;;  %v1670_v33 = vmul.f32 %v3686_v1, %v1542_v10  ;;  %v6439_v0 = vadd.f32 %v1777_v57, %v1776_v53  ;;  %v8519_v14 = vld [vmem:[#allocation146_spill] sm:$0xff] }
 0x39b   :  { %v4020_v46 = vpop.eup %4019  ;;  %4025 = vlog2.f32 %v6142_v43  ;;  %v6445_v2 = vadd.f32 %v2251_v4, %v8517_v12  ;;  %v6450_v17 = vsel %vm1576_vm11, 1.0, %v8368_v8  ;;  %vm2470_vm6 = vcmp.eq.s32.totalorder %v6431_v56, 1  ;;  %v8518_v43 = vld [vmem:[#allocation142_spill] sm:$0xff] }
 0x39c   :  { %v4022_v22 = vpop.eup %4021  ;;  %4027 = vlog2.f32 %v6219_v18  ;;  %v2593_v40 = vsel %vm1694_vm14, %v2558_v36, 0.0  ;;  %v2249_v1 = vmul.f32 0.6931472, %v4018_v62  ;;  %v1210_v25 = vsub.f32 %v8518_v43, %v6243_v41  ;;  %v8520_v4 = vld [vmem:[#allocation94_spill] sm:$0xff] }
 0x39d   :  { %v6422_v59 = vpop.xlane.xlu1 %2064  ;;  %v1668_v13 = vmul.f32 %v3684_v9, %v1540_v58  ;;  %v2253_v32 = vmul.f32 0.6931472, %v4020_v46  ;;  %v2102_v29 = vsub.f32 %v8519_v14, %v6297_v48  ;;  %v6460_v57 = vsel %vm1694_vm14, %v1669_v63, 0.0  ;;  %v8521_v63 = vld [vmem:[#allocation84_spill] sm:$0xff] }
 0x39e   :  { %v2101_v49 = vsub.f32 %v8513_v35, %v6422_v59  ;;  %v6463_v18 = vsel %vm1694_vm14, %v1670_v33, 0.0  ;;  %v6467_v34 = vsel %vm1694_vm14, %v6450_v17, 0.0  ;;  %v6470_v10 = vsel %vm2470_vm6, 1.0, %v8368_v8  ;;  %v6480_v35 = vld [vmem:[%s7986_s1 + $0x70] sm:$0xff]  ;;  %v8522_v33 = vld [vmem:[#allocation97_spill] sm:$0xff] }
 0x39f   :  { %v6437_v51 = vpop.xlane.xlu2 %1178  ;;  %v2594_v9 = vadd.f32 %v2593_v40, %v2592_v3  ;;  %v2434_v6 = vsub.f32 %v6445_v2, %v8520_v4  ;;  %vm1577_vm7 = vcmp.eq.s32.totalorder %v6215_v38, 0  ;;  %v2678_v36 = vsel %vm1694_vm14, %v6470_v10, 0.0  ;;  %v8524_v4 = vld [vmem:[#allocation157_spill] sm:$0xff] }
 0x3a0   :  { %8515 = vst [vmem:[#allocation44_spill] sm:$0xff] %v6437_v51  ;;  %v2160_v60 = vmul.f32 1.442695, %v2101_v49  ;;  %v6442_v52 = vpop.xlane.xlu0 %1180  ;;  %v4024_v53 = vpop.eup %4023  ;;  %v2305_v23 = vadd.f32 %v2249_v1, %v8521_v63  ;;  %v1270_v3 = vmul.f32 1.442695, %v1210_v25  ;;  %vm2472_vm11 = vcmp.eq.s32.totalorder %v6480_v35, 1 }
 0x3a1   :  { %8516 = vst [vmem:[#allocation117_spill] sm:$0xff] %v6442_v52  ;;  %v4026_v62 = vpop.eup %4025  ;;  %v1706_v46 = vsel %vm1694_vm14, %v1668_v13, 0.0  ;;  %v2162_v12 = vmul.f32 1.442695, %v2102_v29  ;;  %v1363_v40 = vmul.f32 0.6931472, %v4024_v53  ;;  %v2679_v43 = vadd.f32 %v2678_v36, %v6274_v37 }
 0x3a2   :  { %4029 = vpow2.f32 %v2160_v60  ;;  %2220 = vadd.xlane.f32.xlu1 %v4022_v22  ;;  %v4028_v58 = vpop.eup %4027  ;;  %v2307_v60 = vadd.f32 %v2253_v32, %v8522_v33  ;;  %v6495_v22 = vld [vmem:[%s7986_s1 + $0x68] sm:$0xff]  ;;  %v6508_v13 = vsel %vm2472_vm11, 1.0, %v8368_v8  ;;  %v1212_v36 = vsub.f32 %v8524_v4, %v6437_v51 }
 0x3a3   :  { %4031 = vpow2.f32 %v1268_v50  ;;  %v6487_v50 = vpop.f32.mrf.mxu3  ;;  %vm2471_vm6 = vcmp.eq.s32.totalorder %v6495_v22, 1  ;;  %v2682_v29 = vsel %vm1694_vm14, %v6508_v13, 0.0  ;;  %v1361_v53 = vmul.f32 0.6931472, %v4028_v58 }
 0x3a4   :  { %4033 = vlog2.f32 %v6169_v24  ;;  %v6511_v32 = vsel %vm2471_vm6, 1.0, %v8368_v8  ;;  %v2596_v33 = vadd.f32 %v6416_v20, %v2594_v9  ;;  %v3687_v58 = vsel %vm1575_vm3, 1.0, %v8368_v8 }
 0x3a5   :  { %v6482_v49 = vpop.xlane.xlu1 %1302  ;;  %4035 = vlog2.f32 %v6240_v7  ;;  %v1365_v7 = vmul.f32 0.6931472, %v4026_v62  ;;  %v2680_v37 = vsel %vm1694_vm14, %v6511_v32, 0.0  ;;  %vm1579_vm3 = vcmp.eq.s32.totalorder %v6495_v22, 0 }
 0x3a6   :  { %4037 = vlog2.f32 %v6348_v15  ;;  %v8523_v15 = vld [vmem:[#allocation72_spill] sm:$0xff]  ;;  %v2681_v62 = vadd.f32 %v2680_v37, %v2679_v43  ;;  %vm1580_vm6 = vcmp.eq.s32.totalorder %v6480_v35, 0 }
 0x3a7   :  { %v6497_v2 = vpop.xlane.xlu2 %2200  ;;  %v2433_v14 = vsub.f32 %v2305_v23, %v8523_v15  ;;  %4039 = vpow2.f32 %v1270_v3  ;;  %v8525_v23 = vld [vmem:[#allocation79_spill] sm:$0xff]  ;;  %v8526_v15 = vld [vmem:[#allocation82_spill] sm:$0xff]  ;;  %v940_v35 = vld [vmem:[%s7986_s1 + $0x80] sm:$0xff] }
 0x3a8   :  { %v4030_v24 = vpop.eup %4029  ;;  %v6500_v1 = vpop.xlane.xlu0 %2072  ;;  %4041 = vpow2.f32 %v2162_v12  ;;  %v2435_v3 = vsub.f32 %v2307_v60, %v8525_v23  ;;  %v1416_v26 = vadd.f32 %v1363_v40, %v8526_v15  ;;  %v1780_v12 = vadd.f32 %v6410_v45, %v6439_v0  ;;  %v8530_v60 = vld [vmem:[#allocation180_spill] sm:$0xff]  ;;  %v8531_v23 = vld [vmem:[#allocation78_spill] sm:$0xff] }
 0x3a9   :  { %v4032_v25 = vpop.eup %4031  ;;  %2224 = vadd.xlane.f32.xlu2 %v4030_v24  ;;  %v1707_v24 = vadd.f32 %v1706_v46, %v6425_v16  ;;  %v6532_v37 = vadd.f32 %v2682_v29, %v2681_v62  ;;  %v8529_v16 = vld [vmem:[#allocation179_spill] sm:$0xff]  ;;  %v3689_v46 = vsel %vm1577_vm7, 1.0, %v8368_v8  ;;  %v2561_v40 = vmul.f32 %v8530_v60, %v2433_v14 }
 0x3aa   :  { %1332 = vadd.xlane.f32.xlu1 %v4032_v25  ;;  %v4034_v63 = vpop.eup %4033  ;;  %v8527_v25 = vld [vmem:[#allocation104_spill] sm:$0xff]  ;;  %v2562_v9 = vmul.f32 %v8529_v16, %v2434_v6  ;;  %v1785_v21 = vsel %vm1694_vm14, %v3689_v46, 0.0  ;;  %v1415_v45 = vadd.f32 %v1361_v53, %v8531_v23  ;;  %v1274_v0 = vmul.f32 1.442695, %v1212_v36 }
 0x3ab   :  { %v4036_v55 = vpop.eup %4035  ;;  %v1417_v48 = vadd.f32 %v1365_v7, %v8527_v25  ;;  %v1781_v7 = vsel %vm1694_vm14, %v3687_v58, 0.0  ;;  %v2257_v4 = vmul.f32 0.6931472, %v4034_v63  ;;  %v1709_v62 = vadd.f32 %v6460_v57, %v1707_v24  ;;  %v8532_v25 = vld [vmem:[#allocation100_spill] sm:$0xff]  ;;  %v6547_v60 = vpop.f32.mrf.mxu3 }
 0x3ac   :  { %v4038_v20 = vpop.eup %4037  ;;  %v2563_v6 = vmul.f32 %v6201_v30, %v2435_v3  ;;  %v1544_v38 = vsub.f32 %v1416_v26, %v8532_v25  ;;  %v2259_v16 = vmul.f32 0.6931472, %v4036_v55  ;;  %v1782_v63 = vadd.f32 %v1781_v7, %v1780_v12  ;;  %v8534_v30 = vld [vmem:[#allocation88_spill] sm:$0xff]  ;;  %v6572_v7 = vld [vmem:[%s7986_s1 + $0x88] sm:$0xff] }
 0x3ad   :  { %v6530_v43 = vpop.xlane.xlu1 %1526  ;;  %v4040_v29 = vpop.eup %4039  ;;  %v2255_v39 = vmul.f32 0.6931472, %v4038_v20  ;;  %v2601_v53 = vsel %vm1694_vm14, %v2562_v9, 0.0  ;;  %v2598_v36 = vadd.f32 %v6419_v42, %v2596_v33  ;;  %v2599_v57 = vsel %vm1694_vm14, %v2561_v40, 0.0  ;;  %v8535_v55 = vld [vmem:[#allocation76_spill] sm:$0xff]  ;;  %v8537_v33 = vld [vmem:[#allocation110_spill] sm:$0xff] }
 0x3ae   :  { %8528 = vst [vmem:[#allocation127_spill] sm:$0xff] %v6530_v43  ;;  %v4042_v14 = vpop.eup %4041  ;;  %v8533_v43 = vld [vmem:[#allocation85_spill] sm:$0xff]  ;;  %v2309_v26 = vadd.f32 %v2257_v4, %v8534_v30  ;;  %v1543_v24 = vsub.f32 %v1415_v45, %v8535_v55  ;;  %v6562_v12 = vmul.f32 %v6450_v17, %v1544_v38  ;;  %v1711_v42 = vadd.f32 %v6463_v18, %v1709_v62  ;;  %v8538_v9 = vld [vmem:[#allocation86_spill] sm:$0xff] }
 0x3af   :  { %v6542_v15 = vpop.xlane.xlu2 %1310  ;;  %v1545_v41 = vsub.f32 %v1417_v48, %v8533_v43  ;;  %v8536_v48 = vld [vmem:[#allocation170_spill] sm:$0xff]  ;;  %v2310_v43 = vadd.f32 %v2259_v16, %v8537_v33  ;;  %v1784_v20 = vadd.f32 %v6467_v34, %v1782_v63  ;;  %v2308_v40 = vadd.f32 %v2255_v39, %v8538_v9  ;;  %v8541_v62 = vld [vmem:[#allocation93_spill] sm:$0xff] }
 0x3b0   :  { %v1313_v51 = vpop.xlane.xlu0 %1312  ;;  %v2105_v3 = vsub.f32 %v8536_v48, %v6500_v1  ;;  %v2600_v17 = vadd.f32 %v2599_v57, %v2598_v36  ;;  %vm1578_vm7 = vcmp.eq.s32.totalorder %v6431_v56, 0  ;;  %v1671_v45 = vmul.f32 %v3687_v58, %v1543_v24  ;;  %v8543_v30 = vld [vmem:[#allocation137_spill] sm:$0xff] }
 0x3b1   :  { %4043 = vlog2.f32 %v1313_v51  ;;  %1334 = vadd.xlane.f32.xlu2 %v4040_v29  ;;  %v6559_v51 = vsel %vm1694_vm14, %v2563_v6, 0.0  ;;  %v2438_v6 = vsub.f32 %v2310_v43, %v8541_v62  ;;  %vm1583_vm11 = vcmp.eq.s32.totalorder %v6572_v7, 0 }
 0x3b2   :  { %4045 = vlog2.f32 %v6291_v5  ;;  %2226 = vadd.xlane.f32.xlu1 %v4042_v14  ;;  %v1673_v5 = vmul.f32 %v3689_v46, %v1545_v41  ;;  %v8539_v41 = vld [vmem:[#allocation155_spill] sm:$0xff]  ;;  %v2168_v39 = vmul.f32 1.442695, %v2105_v3  ;;  %v8542_v14 = vld [vmem:[#allocation81_spill] sm:$0xff]  ;;  %v1786_v58 = vadd.f32 %v1785_v21, %v1784_v20 }
 0x3b3   :  { %4047 = vpow2.f32 %v1274_v0  ;;  %v8540_v46 = vld [vmem:[#allocation107_spill] sm:$0xff]  ;;  %v2436_v63 = vsub.f32 %v2308_v40, %v8542_v14  ;;  %v2103_v36 = vsub.f32 %v5981_v19, %v6389_v61  ;;  %v6600_v55 = vpop.f32.mrf.mxu3  ;;  %v6610_v19 = vsel %vm1583_vm11, 1.0, %v8368_v8  ;;  %v8545_v20 = vld [vmem:[#allocation41_spill] sm:$0xff]  ;;  %v8546_v40 = vld [vmem:[#allocation128_spill] sm:$0xff] }
 0x3b4   :  { %4049 = vlog2.f32 %v6393_v54  ;;  %v2437_v23 = vsub.f32 %v2309_v26, %v8540_v46  ;;  %v1712_v24 = vsel %vm1694_vm14, %v1671_v45, 0.0  ;;  %v8544_v3 = vld [vmem:[#allocation115_spill] sm:$0xff]  ;;  %v2602_v43 = vadd.f32 %v2601_v53, %v2600_v17  ;;  %v8547_v53 = vld [vmem:[#allocation96_spill] sm:$0xff] }
 0x3b5   :  { %v6574_v4 = vpop.xlane.xlu1 %1176  ;;  %4051 = vlog2.f32 %v6482_v49  ;;  %v6593_v49 = vsel %vm1578_vm7, 1.0, %v8368_v8  ;;  %v2566_v46 = vmul.f32 %v6470_v10, %v2438_v6  ;;  %v939_v45 = vld [vmem:[%s7986_s1 + $0x78] sm:$0xff]  ;;  %v6639_v14 = vsel %vm1694_vm14, %v1673_v5, 0.0 }
 0x3b6   :  { %v1211_v18 = vsub.f32 %v8539_v41, %v6574_v4  ;;  %4053 = vlog2.f32 %v6325_v28  ;;  %v1787_v57 = vsel %vm1694_vm14, %v6593_v49, 0.0  ;;  %v6605_v28 = vsel %vm1579_vm3, 1.0, %v8368_v8 }
 0x3b7   :  { %v4044_v34 = vpop.eup %4043  ;;  %v6582_v0 = vpop.xlane.xlu2 %2424  ;;  %v1789_v48 = vsel %vm1694_vm14, %v6605_v28, 0.0  ;;  %v2565_v9 = vmul.f32 %v8545_v20, %v2437_v23  ;;  %v2564_v41 = vmul.f32 %v8546_v40, %v2436_v63  ;;  %v6632_v23 = vsel %vm1580_vm6, 1.0, %v8368_v8 }
 0x3b8   :  { %v4046_v29 = vpop.eup %4045  ;;  %v1377_v54 = vmul.f32 0.6931472, %v4044_v34  ;;  %v1272_v25 = vmul.f32 1.442695, %v1211_v18  ;;  %v6586_v38 = vpop.xlane.xlu0 %2204  ;;  %v1788_v18 = vadd.f32 %v1787_v57, %v1786_v58  ;;  %v2604_v57 = vadd.f32 %v6559_v51, %v2602_v43  ;;  %v8551_v43 = vld [vmem:[#allocation92_spill] sm:$0xff] }
 0x3b9   :  { %v4048_v16 = vpop.eup %4047  ;;  %v1369_v56 = vmul.f32 0.6931472, %v4046_v29  ;;  %vm2473_vm3 = vcmp.eq.s32.totalorder %v939_v45, 1  ;;  %v2609_v5 = vsel %vm1694_vm14, %v2566_v46, 0.0  ;;  %vm1581_vm7 = vcmp.eq.s32.totalorder %v939_v45, 0 }
 0x3ba   :  { %v1423_v26 = vadd.f32 %v1377_v54, %v8543_v30  ;;  %4055 = vpow2.f32 %v1272_v25  ;;  %1338 = vadd.xlane.f32.xlu1 %v4048_v16  ;;  %v4050_v21 = vpop.eup %4049  ;;  %v1713_v54 = vadd.f32 %v1712_v24, %v1711_v42  ;;  %v1714_v16 = vsel %vm1694_vm14, %v6562_v12, 0.0  ;;  %v8557_v24 = vld [vmem:[#allocation95_spill] sm:$0xff] }
 0x3bb   :  { %4057 = vpow2.f32 %v2168_v39  ;;  %v4052_v22 = vpop.eup %4051  ;;  %v2164_v39 = vmul.f32 1.442695, %v2103_v36  ;;  %v6627_v17 = vadd.f32 %v1369_v56, %v8547_v53  ;;  %v2263_v10 = vmul.f32 0.6931472, %v4050_v21  ;;  %v8549_v21 = vld [vmem:[#allocation112_spill] sm:$0xff]  ;;  %v6661_v40 = vpop.f32.mrf.mxu3 }
 0x3bc   :  { %v1551_v33 = vsub.f32 %v1423_v26, %v8544_v3  ;;  %v4054_v62 = vpop.eup %4053  ;;  %v1791_v42 = vsel %vm1694_vm14, %v6632_v23, 0.0  ;;  %v1367_v63 = vmul.f32 0.6931472, %v4052_v22  ;;  %v2605_v30 = vsel %vm1694_vm14, %v2564_v41, 0.0  ;;  %v8550_v3 = vld [vmem:[#allocation101_spill] sm:$0xff] }
 0x3bd   :  { %v2197_v34 = vpop.xlane.xlu1 %2196  ;;  %v1790_v26 = vadd.f32 %v1789_v48, %v1788_v18  ;;  %v2607_v12 = vsel %vm1694_vm14, %v2565_v9, 0.0  ;;  %v6652_v56 = vadd.f32 %v1714_v16, %v1713_v54  ;;  %vm1582_vm11 = vcmp.eq.s32.totalorder %v940_v35, 0  ;;  %v8554_v16 = vld [vmem:[#allocation99_spill] sm:$0xff] }
 0x3be   :  { %v6624_v29 = vmul.f32 %v6610_v19, %v1551_v33  ;;  %4059 = vlog2.f32 %v2197_v34  ;;  %v2312_v33 = vadd.f32 %v2263_v10, %v8550_v3  ;;  %v1371_v22 = vmul.f32 0.6931472, %v4054_v62  ;;  %v8552_v62 = vld [vmem:[#allocation178_spill] sm:$0xff]  ;;  %v8556_v3 = vld [vmem:[#allocation89_spill] sm:$0xff] }
 0x3bf   :  { %v6634_v6 = vpop.xlane.xlu2 %2901  ;;  %4061 = vpow2.f32 %v2164_v39  ;;  %v2606_v48 = vadd.f32 %v2605_v30, %v2604_v57  ;;  %v1418_v20 = vadd.f32 %v1367_v63, %v8551_v43  ;;  %v6659_v9 = vsel %vm2473_vm3, 1.0, %v8368_v8  ;;  %v8555_v30 = vld [vmem:[#allocation166_spill] sm:$0xff] }
 0x3c0   :  { %8548 = vst [vmem:[#allocation53_spill] sm:$0xff] %v6634_v6  ;;  %v4056_v25 = vpop.eup %4055  ;;  %v6646_v58 = vpop.xlane.xlu0 %2422  ;;  %4063 = vlog2.f32 %v6542_v15  ;;  %v6667_v34 = vsel %vm1581_vm7, 1.0, %v8368_v8  ;;  %v1792_v46 = vadd.f32 %v1791_v42, %v1790_v26  ;;  %v2684_v39 = vsel %vm1694_vm14, %v6659_v9, 0.0  ;;  %v8553_v15 = vld [vmem:[#allocation118_spill] sm:$0xff] }
 0x3c1   :  { %v4058_v36 = vpop.eup %4057  ;;  %1336 = vadd.xlane.f32.xlu0 %v4056_v25  ;;  %v6672_v45 = vsel %vm1582_vm11, 1.0, %v8368_v8  ;;  %v1793_v53 = vsel %vm1694_vm14, %v6667_v34, 0.0  ;;  %v2440_v10 = vsub.f32 %v2312_v33, %v8553_v15  ;;  %vm2475_vm6 = vcmp.eq.s32.totalorder %v6572_v7, 1 }
 0x3c2   :  { %2232 = vadd.xlane.f32.xlu1 %v4058_v36  ;;  %v1795_v25 = vsel %vm1694_vm14, %v6672_v45, 0.0  ;;  %v2608_v57 = vadd.f32 %v2607_v12, %v2606_v48  ;;  %v1213_v26 = vsub.f32 %v8555_v30, %v6442_v52  ;;  %v1794_v15 = vadd.f32 %v1793_v53, %v1792_v46 }
 0x3c3   :  { %vm2474_vm3 = vcmp.eq.s32.totalorder %v940_v35, 1  ;;  %v6690_v7 = vsel %vm2475_vm6, 1.0, %v8368_v8  ;;  %v2685_v48 = vadd.f32 %v2684_v39, %v6532_v37  ;;  %v1797_v53 = vsel %vm1694_vm14, %v6610_v19, 0.0  ;;  %v6709_v37 = vld [vmem:[%s7986_s1 + $0x98] sm:$0xff] }
 0x3c4   :  { %v4060_v51 = vpop.eup %4059  ;;  %v6694_v12 = vsel %vm2474_vm3, 1.0, %v8368_v8  ;;  %v1276_v39 = vmul.f32 1.442695, %v1213_v26  ;;  %v8559_v26 = vld [vmem:[#allocation114_spill] sm:$0xff]  ;;  %vm1585_vm7 = vcmp.eq.s32.totalorder %v6709_v37, 0 }
 0x3c5   :  { %v2261_v41 = vmul.f32 0.6931472, %v4060_v51  ;;  %v6664_v18 = vpop.xlane.xlu1 %2070  ;;  %v4062_v36 = vpop.eup %4061  ;;  %v1546_v51 = vsub.f32 %v1418_v20, %v8556_v3  ;;  %v2686_v35 = vsel %vm1694_vm14, %v6694_v12, 0.0 }
 0x3c6   :  { %v2104_v54 = vsub.f32 %v8552_v62, %v6664_v18  ;;  %v4064_v20 = vpop.eup %4063  ;;  %v6720_v3 = vpop.f32.mrf.mxu3 }
 0x3c7   :  { %v2311_v42 = vadd.f32 %v2261_v41, %v8554_v16  ;;  %v6683_v63 = vpop.xlane.xlu2 %2903  ;;  %v8558_v41 = vld [vmem:[#allocation120_spill] sm:$0xff]  ;;  %v2610_v16 = vadd.f32 %v2609_v5, %v2608_v57  ;;  %v1375_v19 = vmul.f32 0.6931472, %v4064_v20 }
 0x3c8   :  { %v2166_v43 = vmul.f32 1.442695, %v2104_v54  ;;  %v1319_v62 = vpop.xlane.xlu0 %1318  ;;  %v2568_v54 = vmul.f32 %v6508_v13, %v2440_v10  ;;  %v2687_v13 = vadd.f32 %v2686_v35, %v2685_v48  ;;  %v1674_v10 = vmul.f32 %v6593_v49, %v1546_v51 }
 0x3c9   :  { %v2439_v33 = vsub.f32 %v2311_v42, %v8557_v24  ;;  %4065 = vlog2.f32 %v1319_v62  ;;  %2228 = vadd.xlane.f32.xlu0 %v4062_v36  ;;  %v2688_v24 = vsel %vm1694_vm14, %v6690_v7, 0.0  ;;  %v6716_v42 = vld [vmem:[%s7986_s1 + $0xa0] sm:$0xff]  ;;  %v1717_v51 = vadd.f32 %v6639_v14, %v6652_v56 }
 0x3ca   :  { %4067 = vpow2.f32 %v2166_v43  ;;  %2909 = vmax.xlane.f32.xlu1 %v8558_v41  ;;  %v6718_v57 = vadd.f32 %v2688_v24, %v2687_v13  ;;  %v1420_v43 = vadd.f32 %v1371_v22, %v8559_v26  ;;  %v2613_v49 = vsel %vm1694_vm14, %v2568_v54, 0.0  ;;  %v942_v22 = vld [vmem:[%s7986_s1 + $0x90] sm:$0xff]  ;;  %v8561_v56 = vld [vmem:[#allocation45_spill] sm:$0xff] }
 0x3cb   :  { %v2567_v46 = vmul.f32 %v6511_v32, %v2439_v33  ;;  %4069 = vlog2.f32 %v6497_v2  ;;  %v1796_v2 = vadd.f32 %v1795_v25, %v1794_v15  ;;  %v8560_v33 = vsub.f32 %v6627_v17, %v8549_v21  ;;  %v8562_v21 = vld [vmem:[#allocation108_spill] sm:$0xff] }
 0x3cc   :  { %vm1586_vm11 = vcmp.eq.s32.totalorder %v6716_v42, 0  ;;  %v1718_v14 = vsel %vm1694_vm14, %v1674_v10, 0.0  ;;  %vm1584_vm6 = vcmp.eq.s32.totalorder %v942_v22, 0  ;;  %v1422_v24 = vadd.f32 %v1375_v19, %v8562_v21  ;;  %v8565_v10 = vld [vmem:[#allocation98_spill] sm:$0xff] }
 0x3cd   :  { %v2611_v32 = vsel %vm1694_vm14, %v2567_v46, 0.0  ;;  %v1309_v36 = vpop.xlane.xlu1 %1308  ;;  %v1675_v15 = vmul.f32 %v6605_v28, %v8560_v33  ;;  %v1798_v17 = vadd.f32 %v1797_v53, %v1796_v2  ;;  %v8563_v46 = vld [vmem:[#allocation164_spill] sm:$0xff]  ;;  %v6747_v13 = vsel %vm1585_vm7, 1.0, %v8368_v8 }
 0x3ce   :  { %v2612_v5 = vadd.f32 %v2611_v32, %v2610_v16  ;;  %4071 = vlog2.f32 %v1309_v36  ;;  %v8564_v16 = vld [vmem:[#allocation47_spill] sm:$0xff]  ;;  %v1548_v32 = vsub.f32 %v1420_v43, %v8565_v10  ;;  %v6756_v53 = vsel %vm1586_vm11, 1.0, %v8368_v8 }
 0x3cf   :  { %v4066_v30 = vpop.eup %4065  ;;  %v2207_v62 = vpop.xlane.xlu2 %2206  ;;  %4073 = vpow2.f32 %v1276_v39  ;;  %v6750_v39 = vsel %vm1584_vm6, 1.0, %v8368_v8  ;;  %v1801_v2 = vsel %vm1694_vm14, %v6747_v13, 0.0  ;;  %v8568_v43 = vld [vmem:[#allocation135_spill] sm:$0xff]  ;;  %v1720_v52 = vsel %vm1694_vm14, %v1675_v15, 0.0 }
 0x3d0   :  { %v4068_v25 = vpop.eup %4067  ;;  %v6731_v48 = vadd.f32 %v2613_v49, %v2612_v5  ;;  %v1383_v20 = vmul.f32 0.6931472, %v4066_v30  ;;  %v6737_v54 = vpop.xlane.xlu0 %2210  ;;  %v1799_v36 = vsel %vm1694_vm14, %v6750_v39, 0.0  ;;  %v1719_v5 = vadd.f32 %v1718_v14, %v1717_v51  ;;  %v8566_v30 = vld [vmem:[#allocation140_spill] sm:$0xff]  ;;  %v8569_v14 = vld [vmem:[#allocation105_spill] sm:$0xff] }
 0x3d1   :  { %2907 = vmax.xlane.f32.xlu0 %v8561_v56  ;;  %2230 = vadd.xlane.f32.xlu2 %v4068_v25  ;;  %v4070_v28 = vpop.eup %4069  ;;  %v1800_v49 = vadd.f32 %v1799_v36, %v1798_v17  ;;  %v1550_v21 = vsub.f32 %v1422_v24, %v8568_v43  ;;  %4075 = vlog2.f32 %v6586_v38  ;;  %v1676_v51 = vmul.f32 %v6632_v23, %v1548_v32  ;;  %v8571_v36 = vld [vmem:[#allocation37_spill] sm:$0xff]  ;;  %v6785_v15 = vpop.f32.mrf.mxu3  ;;  %v8575_v23 = vld [vmem:[#allocation102_spill] sm:$0xff] }
 0x3d2   :  { %v1426_v35 = vadd.f32 %v1383_v20, %v8563_v46  ;;  %2923 = vmax.xlane.f32.xlu1 %v8564_v16  ;;  %v2265_v25 = vmul.f32 0.6931472, %v4070_v28  ;;  %4077 = vlog2.f32 %v2207_v62  ;;  %v1721_v38 = vadd.f32 %v1720_v52, %v1719_v5  ;;  %v8576_v62 = vld [vmem:[#allocation122_spill] sm:$0xff] }
 0x3d3   :  { %v6770_v10 = vadd.f32 %v1801_v2, %v1800_v49  ;;  %vm2476_vm3 = vcmp.eq.s32.totalorder %v942_v22, 1  ;;  %v8573_v2 = vld [vmem:[#allocation185_spill] sm:$0xff]  ;;  %v1678_v52 = vmul.f32 %v6672_v45, %v1550_v21  ;;  %v1722_v22 = vsel %vm1694_vm14, %v1676_v51, 0.0  ;;  %v8577_v43 = vld [vmem:[#allocation182_spill] sm:$0xff] }
 0x3d4   :  { %v4072_v19 = vpop.eup %4071  ;;  %v1554_v26 = vsub.f32 %v1426_v35, %v8566_v30  ;;  %v8570_v35 = vld [vmem:[#allocation167_spill] sm:$0xff]  ;;  %v6783_v30 = vsel %vm2868_vm4, %v8573_v2, -1e+30  ;;  %v6795_v49 = vsel %vm2476_vm3, 1.0, %v8368_v8  ;;  %v8579_v45 = vld [vmem:[#allocation42_spill] sm:$0xff]  ;;  %vm2478_vm7 = vcmp.eq.s32.totalorder %v6716_v42, 1 }
 0x3d5   :  { %v1373_v33 = vmul.f32 0.6931472, %v4072_v19  ;;  %v6763_v20 = vpop.xlane.xlu1 %1532  ;;  %v4074_v16 = vpop.eup %4073  ;;  %v6778_v24 = vsel %vm2868_vm4, %v8570_v35, -1e+30  ;;  %8574 = vst [vmem:[#allocation58_spill] sm:$0xff] %v6783_v30  ;;  %v6819_v35 = vld [vmem:[%s7986_s1 + $0xb8] sm:$0xff] }
 0x3d6   :  { %8567 = vst [vmem:[#allocation103_spill] sm:$0xff] %v6763_v20  ;;  %v6768_v46 = vmul.f32 %v6756_v53, %v1554_v26  ;;  %v2313_v26 = vadd.f32 %v2265_v25, %v8576_v62  ;;  %v2690_v25 = vsel %vm1694_vm14, %v6795_v49, 0.0  ;;  %v6807_v21 = vsel %vm2868_vm4, %v8579_v45, -1e+30  ;;  %v8582_v2 = vld [vmem:[#allocation106_spill] sm:$0xff]  ;;  %v8591_v20 = vld [vmem:[#allocation111_spill] sm:$0xff] }
 0x3d7   :  { %v1421_v17 = vadd.f32 %v1373_v33, %v8569_v14  ;;  %v1317_v28 = vpop.xlane.xlu2 %1316  ;;  %8572 = vst [vmem:[#allocation48_spill] sm:$0xff] %v6778_v24  ;;  %v4076_v33 = vpop.eup %4075  ;;  %v6800_v14 = vsel %vm2868_vm4, %v8577_v43, -1e+30  ;;  %vm2477_vm11 = vcmp.eq.s32.totalorder %v6709_v37, 1  ;;  %v2691_v42 = vadd.f32 %v2690_v25, %v6718_v57  ;;  %v8585_v25 = vld [vmem:[#allocation184_spill] sm:$0xff] }
 0x3d8   :  { %4079 = vlog2.f32 %v1317_v28  ;;  %v1325_v19 = vpop.xlane.xlu0 %1324  ;;  %8578 = vst [vmem:[#allocation145_spill] sm:$0xff] %v6800_v14  ;;  %v4078_v51 = vpop.eup %4077  ;;  %v2269_v43 = vmul.f32 0.6931472, %v4076_v33  ;;  %vm1589_vm6 = vcmp.eq.s32.totalorder %v6819_v35, 0  ;;  %v6837_v37 = vsel %vm2477_vm11, 1.0, %v8368_v8 }
 0x3d9   :  { %v1549_v32 = vsub.f32 %v1421_v17, %v8575_v23  ;;  %4081 = vlog2.f32 %v1325_v19  ;;  %2921 = vmax.xlane.f32.xlu0 %v6778_v24  ;;  %1340 = vadd.xlane.f32.xlu2 %v4074_v16  ;;  %v1723_v16 = vadd.f32 %v1722_v22, %v1721_v38  ;;  %v2441_v23 = vsub.f32 %v2313_v26, %v8582_v2  ;;  %v8586_v2 = vld [vmem:[#allocation119_spill] sm:$0xff] }
 0x3da   :  { %2929 = vmax.xlane.f32.xlu1 %v6783_v30  ;;  %v6828_v30 = vsel %vm2478_vm7, 1.0, %v8368_v8 }
 0x3db   :  { %v1677_v5 = vmul.f32 %v6667_v34, %v1549_v32  ;;  %v8580_v34 = vld [vmem:[#allocation83_spill] sm:$0xff]  ;;  %v1726_v32 = vsel %vm1694_vm14, %v1678_v52, 0.0  ;;  %v1728_v52 = vsel %vm1694_vm14, %v6624_v29, 0.0  ;;  %v2694_v57 = vsel %vm1694_vm14, %v6828_v30, 0.0 }
 0x3dc   :  { %v6812_v17 = vsel %vm2868_vm4, %v8580_v34, -1e+30  ;;  %v2692_v29 = vsel %vm1694_vm14, %v6837_v37, 0.0  ;;  %v2569_v24 = vmul.f32 %v6659_v9, %v2441_v23  ;;  %v8593_v9 = vld [vmem:[#allocation191_spill] sm:$0xff]  ;;  %v8596_v23 = vld [vmem:[#allocation124_spill] sm:$0xff] }
 0x3dd   :  { %8581 = vst [vmem:[#allocation57_spill] sm:$0xff] %v6812_v17  ;;  %v1724_v28 = vsel %vm1694_vm14, %v1677_v5, 0.0  ;;  %v2203_v38 = vpop.xlane.xlu1 %2202 }
 0x3de   :  { %v4080_v19 = vpop.eup %4079  ;;  %v1725_v62 = vadd.f32 %v1724_v28, %v1723_v16  ;;  %4083 = vlog2.f32 %v2203_v38  ;;  %v2271_v16 = vmul.f32 0.6931472, %v4078_v51  ;;  %v8584_v28 = vld [vmem:[#allocation131_spill] sm:$0xff]  ;;  %v6847_v51 = vpop.f32.mrf.mxu3 }
 0x3df   :  { %v4082_v22 = vpop.eup %4081  ;;  %v1381_v45 = vmul.f32 0.6931472, %v4080_v19  ;;  %v6823_v34 = vpop.xlane.xlu2 %2905 }
 0x3e0   :  { %8583 = vst [vmem:[#allocation153_spill] sm:$0xff] %v6823_v34  ;;  %v1727_v5 = vadd.f32 %v1726_v32, %v1725_v62  ;;  %v1389_v26 = vmul.f32 0.6931472, %v4082_v22  ;;  %v2315_v32 = vadd.f32 %v2269_v43, %v8586_v2  ;;  %v8587_v62 = vld [vmem:[#allocation161_spill] sm:$0xff] }
 0x3e1   :  { %v1425_v33 = vadd.f32 %v1381_v45, %v8584_v28  ;;  %2927 = vmax.xlane.f32.xlu0 %v6800_v14  ;;  %2911 = vmax.xlane.f32.xlu2 %v6807_v21  ;;  %v6854_v45 = vsel %vm1589_vm6, 1.0, %v8368_v8  ;;  %v2693_v28 = vadd.f32 %v2692_v29, %v2691_v42  ;;  %v1803_v42 = vsel %vm1694_vm14, %v6756_v53, 0.0  ;;  %v8590_v29 = vld [vmem:[#allocation143_spill] sm:$0xff] }
 0x3e2   :  { %v1429_v38 = vadd.f32 %v1389_v26, %v8585_v25  ;;  %2935 = vmax.xlane.f32.xlu1 %v6812_v17  ;;  %v6843_v19 = vadd.f32 %v1728_v52, %v1727_v5  ;;  %v8588_v25 = vld [vmem:[#allocation168_spill] sm:$0xff]  ;;  %v6860_v5 = vld [vmem:[%s7986_s1 + $0xb0] sm:$0xff]  ;;  %v6885_v53 = vsel %vm2868_vm4, %v8593_v9, -1e+30  ;;  %vm2481_vm6 = vcmp.eq.s32.totalorder %v6819_v35, 1 }
 0x3e3   :  { %v1553_v22 = vsub.f32 %v1425_v33, %v8587_v62  ;;  %v8589_v52 = vld [vmem:[#allocation147_spill] sm:$0xff]  ;;  %v6866_v62 = vadd.f32 %v2694_v57, %v2693_v28  ;;  %vm1588_vm3 = vcmp.eq.s32.totalorder %v6860_v5, 0  ;;  %8594 = vst [vmem:[#allocation154_spill] sm:$0xff] %v6885_v53 }
 0x3e4   :  { %v4084_v26 = vpop.eup %4083  ;;  %v1557_v17 = vsub.f32 %v1429_v38, %v8588_v25  ;;  %v2316_v14 = vadd.f32 %v2271_v16, %v8589_v52  ;;  %v2443_v25 = vsub.f32 %v2315_v32, %v8590_v29  ;;  %v8597_v32 = vld [vmem:[#allocation113_spill] sm:$0xff]  ;;  %v8606_v35 = vld [vmem:[#allocation163_spill] sm:$0xff] }
 0x3e5   :  { %v6864_v43 = vmul.f32 %v6747_v13, %v1553_v22  ;;  %v2267_v33 = vmul.f32 0.6931472, %v4084_v26  ;;  %v1315_v2 = vpop.xlane.xlu1 %1314  ;;  %v8592_v13 = vld [vmem:[#allocation43_spill] sm:$0xff]  ;;  %v1804_v26 = vadd.f32 %v1803_v42, %v6770_v10 }
 0x3e6   :  { %v6872_v38 = vmul.f32 %v6854_v45, %v1557_v17  ;;  %4085 = vlog2.f32 %v1315_v2  ;;  %v6879_v22 = vsel %vm2868_vm4, %v8592_v13, -1e+30  ;;  %v6890_v17 = vsel %vm2868_vm4, %v6369_v11, -1e+30  ;;  %v6916_v13 = vpop.f32.mrf.mxu3 }
 0x3e7   :  { %v2314_v16 = vadd.f32 %v2267_v33, %v8591_v20  ;;  %v2213_v52 = vpop.xlane.xlu2 %2212  ;;  %8595 = vst [vmem:[#allocation52_spill] sm:$0xff] %v6890_v17  ;;  %4087 = vlog2.f32 %v6737_v54  ;;  %v945_v20 = vld [vmem:[%s7986_s1 + $0xa8] sm:$0xff]  ;;  %v2444_v57 = vsub.f32 %v2316_v14, %v8596_v23  ;;  %v2615_v11 = vsel %vm1694_vm14, %v2569_v24, 0.0 }
 0x3e8   :  { %vm1587_vm7 = vcmp.eq.s32.totalorder %v945_v20, 0  ;;  %v6904_v54 = vsel %vm1588_vm3, 1.0, %v8368_v8  ;;  %v2571_v14 = vmul.f32 %v6690_v7, %v2443_v25  ;;  %v2616_v24 = vadd.f32 %v2615_v11, %v6731_v48 }
 0x3e9   :  { %v2442_v28 = vsub.f32 %v2314_v16, %v8597_v32  ;;  %2933 = vmax.xlane.f32.xlu0 %v6885_v53  ;;  %2913 = vmax.xlane.f32.xlu2 %v6879_v22  ;;  %v6907_v33 = vsel %vm1587_vm7, 1.0, %v8368_v8  ;;  %v1807_v29 = vsel %vm1694_vm14, %v6904_v54, 0.0  ;;  %v2572_v9 = vmul.f32 %v6795_v49, %v2444_v57  ;;  %v8601_v57 = vld [vmem:[#allocation123_spill] sm:$0xff] }
 0x3ea   :  { %2941 = vmax.xlane.f32.xlu1 %v6890_v17  ;;  %v1805_v10 = vsel %vm1694_vm14, %v6907_v33, 0.0  ;;  %vm2479_vm11 = vcmp.eq.s32.totalorder %v945_v20, 1  ;;  %v6932_v48 = vsel %vm2868_vm4, %v6327_v27, -1e+30  ;;  %v2619_v49 = vsel %vm1694_vm14, %v2571_v14, 0.0  ;;  %v8603_v27 = vld [vmem:[#allocation116_spill] sm:$0xff] }
 0x3eb   :  { %v2570_v2 = vmul.f32 %v6694_v12, %v2442_v28  ;;  %v1806_v16 = vadd.f32 %v1805_v10, %v1804_v26  ;;  %v8598_v28 = vld [vmem:[#allocation46_spill] sm:$0xff]  ;;  %8600 = vst [vmem:[#allocation130_spill] sm:$0xff] %v6932_v48  ;;  %4089 = vlog2.f32 %v2213_v52  ;;  %v6939_v11 = vsel %vm2868_vm4, %v6547_v60, -1e+30 }
 0x3ec   :  { %v4086_v42 = vpop.eup %4085  ;;  %v6925_v17 = vsel %vm2868_vm4, %v8598_v28, -1e+30  ;;  %8602 = vst [vmem:[#allocation152_spill] sm:$0xff] %v6939_v11  ;;  %v2621_v10 = vsel %vm1694_vm14, %v2572_v9, 0.0  ;;  %v6962_v9 = vsel %vm2868_vm4, %v8606_v35, -1e+30 }
 0x3ed   :  { %v2617_v23 = vsel %vm1694_vm14, %v2570_v2, 0.0  ;;  %v1379_v32 = vmul.f32 0.6931472, %v4086_v42  ;;  %v6920_v7 = vpop.xlane.xlu1 %2420  ;;  %v4088_v12 = vpop.eup %4087  ;;  %8599 = vst [vmem:[#allocation61_spill] sm:$0xff] %v6925_v17  ;;  %v6927_v53 = vadd.f32 %v1807_v29, %v1806_v16  ;;  %v6942_v29 = vsel %vm2479_vm11, 1.0, %v8368_v8 }
 0x3ee   :  { %v2618_v25 = vadd.f32 %v2617_v23, %v2616_v24  ;;  %v2696_v52 = vsel %vm1694_vm14, %v6942_v29, 0.0  ;;  %v2275_v60 = vmul.f32 0.6931472, %v4088_v12  ;;  %v8604_v24 = vld [vmem:[#allocation160_spill] sm:$0xff]  ;;  %8607 = vst [vmem:[#allocation60_spill] sm:$0xff] %v6962_v9  ;;  %vm2480_vm3 = vcmp.eq.s32.totalorder %v6860_v5, 1  ;;  %v7001_v35 = vpop.f32.mrf.mxu3 }
 0x3ef   :  { %v1424_v20 = vadd.f32 %v1379_v32, %v8601_v57  ;;  %v1323_v26 = vpop.xlane.xlu2 %1322  ;;  %v6957_v16 = vsel %vm2868_vm4, %v8604_v24, -1e+30  ;;  %v8608_v32 = vld [vmem:[#allocation176_spill] sm:$0xff]  ;;  %v2697_v28 = vadd.f32 %v2696_v52, %v6866_v62  ;;  %v6978_v57 = vsel %vm2868_vm4, %v6487_v50, -1e+30  ;;  %v949_v50 = vld [vmem:[%s7986_s1 + $0xc8] sm:$0xff] }
 0x3f0   :  { %v2620_v2 = vadd.f32 %v2619_v49, %v2618_v25  ;;  %4091 = vlog2.f32 %v1323_v26  ;;  %8605 = vst [vmem:[#allocation56_spill] sm:$0xff] %v6957_v16  ;;  %v6968_v12 = vsel %vm2868_vm4, %v8608_v32, -1e+30  ;;  %v6971_v25 = vsel %vm2481_vm6, 1.0, %v8368_v8 }
 0x3f1   :  { %v1552_v14 = vsub.f32 %v1424_v20, %v8603_v27  ;;  %2939 = vmax.xlane.f32.xlu0 %v6932_v48  ;;  %2915 = vmax.xlane.f32.xlu2 %v6925_v17  ;;  %v4090_v49 = vpop.eup %4089  ;;  %8609 = vst [vmem:[#allocation148_spill] sm:$0xff] %v6978_v57  ;;  %v6987_v5 = vsel %vm2480_vm3, 1.0, %v8368_v8  ;;  %v6999_v24 = vsel %vm2868_vm4, %v6720_v3, -1e+30  ;;  %v8612_v3 = vld [vmem:[#allocation156_spill] sm:$0xff]  ;;  %vm1591_vm11 = vcmp.eq.s32.totalorder %v949_v50, 0 }
 0x3f2   :  { %2947 = vmax.xlane.f32.xlu1 %v6939_v11  ;;  %v6952_v42 = vadd.f32 %v2621_v10, %v2620_v2  ;;  %v948_v2 = vld [vmem:[%s7986_s1 + $0xc0] sm:$0xff]  ;;  %v2698_v52 = vsel %vm1694_vm14, %v6987_v5, 0.0  ;;  %8611 = vst [vmem:[#allocation63_spill] sm:$0xff] %v6999_v24  ;;  %v2277_v11 = vmul.f32 0.6931472, %v4090_v49  ;;  %v8615_v49 = vld [vmem:[#allocation183_spill] sm:$0xff] }
 0x3f3   :  { %v1680_v23 = vmul.f32 %v6750_v39, %v1552_v14  ;;  %v2700_v39 = vsel %vm1694_vm14, %v6971_v25, 0.0  ;;  %v8610_v10 = vld [vmem:[#allocation144_spill] sm:$0xff]  ;;  %v2699_v32 = vadd.f32 %v2698_v52, %v2697_v28  ;;  %vm2482_vm7 = vcmp.eq.s32.totalorder %v948_v2, 1  ;;  %v8613_v28 = vld [vmem:[#allocation181_spill] sm:$0xff]  ;;  %v8614_v52 = vld [vmem:[#allocation171_spill] sm:$0xff] }
 0x3f4   :  { %v2318_v27 = vadd.f32 %v2275_v60, %v8610_v10  ;;  %v1732_v60 = vsel %vm1694_vm14, %v6864_v43, 0.0  ;;  %v2217_v10 = vpop.xlane.xlu0 %2216  ;;  %vm1590_vm6 = vcmp.eq.s32.totalorder %v948_v2, 0 }
 0x3f5   :  { %v1730_v20 = vsel %vm1694_vm14, %v1680_v23, 0.0  ;;  %v2209_v26 = vpop.xlane.xlu1 %2208  ;;  %v2701_v43 = vadd.f32 %v2700_v39, %v2699_v32 }
 0x3f6   :  { %v4092_v62 = vpop.eup %4091  ;;  %v1731_v14 = vadd.f32 %v1730_v20, %v6843_v19  ;;  %4093 = vlog2.f32 %v2209_v26  ;;  %v1734_v20 = vsel %vm1694_vm14, %v6768_v46, 0.0  ;;  %v1809_v26 = vsel %vm1694_vm14, %v6854_v45, 0.0 }
 0x3f7   :  { %v1387_v23 = vmul.f32 0.6931472, %v4092_v62  ;;  %v2219_v19 = vpop.xlane.xlu2 %2218  ;;  %v2965_v62 = vsub.f32 %v8613_v28, %v6634_v6  ;;  %v2446_v46 = vsub.f32 %v2318_v27, %v8614_v52  ;;  %4095 = vlog2.f32 %v2217_v10 }
 0x3f8   :  { %v1733_v48 = vadd.f32 %v1732_v60, %v1731_v14  ;;  %v7020_v60 = vsel %vm2482_vm7, 1.0, %v8368_v8  ;;  %v7028_v27 = vsel %vm1591_vm11, 1.0, %v8368_v8  ;;  %v7042_v6 = vsel %vm2868_vm4, %v6661_v40, -1e+30 }
 0x3f9   :  { %v1428_v17 = vadd.f32 %v1387_v23, %v8612_v3  ;;  %2945 = vmax.xlane.f32.xlu0 %v6978_v57  ;;  %2917 = vmax.xlane.f32.xlu2 %v6957_v16  ;;  %v7023_v23 = vsel %vm1590_vm6, 1.0, %v8368_v8  ;;  %v2702_v32 = vsel %vm1694_vm14, %v7020_v60, 0.0  ;;  %8617 = vst [vmem:[#allocation50_spill] sm:$0xff] %v7042_v6  ;;  %v2997_v57 = vmul.f32 1.442695, %v2965_v62 }
 0x3fa   :  { %2953 = vmax.xlane.f32.xlu1 %v6999_v24  ;;  %v7016_v45 = vadd.f32 %v1734_v20, %v1733_v48  ;;  %v1810_v48 = vadd.f32 %v1809_v26, %v6927_v53  ;;  %v1811_v2 = vsel %vm1694_vm14, %v7023_v23, 0.0  ;;  %v8616_v20 = vld [vmem:[#allocation173_spill] sm:$0xff]  ;;  %v950_v53 = vld [vmem:[%s7986_s1 + $0xd0] sm:$0xff]  ;;  %v8618_v26 = vld [vmem:[#allocation136_spill] sm:$0xff]  ;;  %vm2483_vm7 = vcmp.eq.s32.totalorder %v949_v50, 1 }
 0x3fb   :  { %v1556_v14 = vsub.f32 %v1428_v17, %v8615_v49  ;;  %v2319_v17 = vadd.f32 %v2277_v11, %v8616_v20  ;;  %v1813_v49 = vsel %vm1694_vm14, %v7028_v27, 0.0  ;;  %vm2484_vm3 = vcmp.eq.s32.totalorder %v950_v53, 1  ;;  %v8622_v50 = vld [vmem:[#allocation188_spill] sm:$0xff] }
 0x3fc   :  { %v4094_v39 = vpop.eup %4093  ;;  %v1812_v11 = vadd.f32 %v1811_v2, %v1810_v48  ;;  %v2703_v40 = vadd.f32 %v2702_v32, %v2701_v43  ;;  %v7054_v62 = vsel %vm2868_vm4, %v6916_v13, -1e+30  ;;  %v8620_v48 = vld [vmem:[#allocation150_spill] sm:$0xff]  ;;  %v7066_v43 = vsel %vm2868_vm4, %v8622_v50, -1e+30 }
 0x3fd   :  { %v7035_v10 = vmul.f32 %v6904_v54, %v1556_v14  ;;  %v2273_v3 = vmul.f32 0.6931472, %v4094_v39  ;;  %v1321_v52 = vpop.xlane.xlu1 %1320  ;;  %v2574_v54 = vmul.f32 %v6828_v30, %v2446_v46  ;;  %v4096_v24 = vpop.eup %4095  ;;  %8619 = vst [vmem:[#allocation133_spill] sm:$0xff] %v7054_v62  ;;  %v2447_v2 = vsub.f32 %v2319_v17, %v8620_v48  ;;  %v8621_v30 = vld [vmem:[#allocation138_spill] sm:$0xff] }
 0x3fe   :  { %4097 = vlog2.f32 %v1321_v52  ;;  %v7049_v20 = vadd.f32 %v1813_v49, %v1812_v11  ;;  %v2865_v52 = vpop.f32.mrf.mxu3  ;;  %v7071_v13 = vsel %vm2868_vm4, %v6847_v51, -1e+30  ;;  %v7076_v32 = vsel %vm2484_vm3, 1.0, %v8368_v8 }
 0x3ff   :  { %v2317_v14 = vadd.f32 %v2273_v3, %v8618_v26  ;;  %4099 = vlog2.f32 %v2219_v19  ;;  %v1329_v39 = vpop.xlane.xlu2 %1328  ;;  %v7061_v19 = vsel %vm2483_vm7, 1.0, %v8368_v8  ;;  %8623 = vst [vmem:[#allocation68_spill] sm:$0xff] %v7071_v13  ;;  %v2706_v49 = vsel %vm1694_vm14, %v7076_v32, 0.0 }
 0x400   :  { %4101 = vlog2.f32 %v1329_v39  ;;  %v2704_v17 = vsel %vm1694_vm14, %v7061_v19, 0.0  ;;  %v7085_v51 = vsel %vm2868_vm4, %v2865_v52, -1e+30  ;;  %v2281_v39 = vmul.f32 0.6931472, %v4096_v24  ;;  %v951_v24 = vld [vmem:[%s7986_s1 + $0xd8] sm:$0xff] }
 0x401   :  { %v2445_v46 = vsub.f32 %v2317_v14, %v8621_v30  ;;  %2951 = vmax.xlane.f32.xlu0 %v7042_v6  ;;  %2919 = vmax.xlane.f32.xlu2 %v6962_v9  ;;  %4103 = vpow2.f32 %v2997_v57  ;;  %v2705_v11 = vadd.f32 %v2704_v17, %v2703_v40  ;;  %v2625_v14 = vsel %vm1694_vm14, %v2574_v54, 0.0  ;;  %v8624_v40 = vld [vmem:[#allocation39_spill] sm:$0xff]  ;;  %v8625_v52 = vld [vmem:[#allocation149_spill] sm:$0xff] }
 0x402   :  { %2959 = vmax.xlane.f32.xlu1 %v7054_v62  ;;  %v2575_v50 = vmul.f32 %v6942_v29, %v2447_v2  ;;  %v2967_v17 = vsub.f32 %v8624_v40, %v6823_v34  ;;  %vm1592_vm11 = vcmp.eq.s32.totalorder %v950_v53, 0  ;;  %vm2485_vm6 = vcmp.eq.s32.totalorder %v951_v24, 1  ;;  %v8626_v2 = vld [vmem:[#allocation172_spill] sm:$0xff]  ;;  %v8628_v40 = vld [vmem:[#allocation177_spill] sm:$0xff] }
 0x403   :  { %v2573_v3 = vmul.f32 %v6837_v37, %v2445_v46  ;;  %v2707_v54 = vadd.f32 %v2706_v49, %v2705_v11  ;;  %v7099_v9 = vsel %vm2485_vm6, 1.0, %v8368_v8  ;;  %v3704_v53 = vsel %vm1592_vm11, 1.0, %v8368_v8 }
 0x404   :  { %v4098_v26 = vpop.eup %4097  ;;  %v1331_v48 = vpop.xlane.xlu0 %1330  ;;  %vm1593_vm3 = vcmp.eq.s32.totalorder %v951_v24, 0 }
 0x405   :  { %v4100_v30 = vpop.eup %4099  ;;  %v2623_v57 = vsel %vm1694_vm14, %v2573_v3, 0.0  ;;  %v1385_v6 = vmul.f32 0.6931472, %v4098_v26  ;;  %4105 = vlog2.f32 %v1331_v48  ;;  %v2215_v37 = vpop.xlane.xlu1 %2214  ;;  %v2321_v3 = vadd.f32 %v2281_v39, %v8626_v2 }
 0x406   :  { %v4102_v46 = vpop.eup %4101  ;;  %v2624_v62 = vadd.f32 %v2623_v57, %v6952_v42  ;;  %4107 = vlog2.f32 %v2215_v37  ;;  %v2283_v48 = vmul.f32 0.6931472, %v4100_v30  ;;  %v2627_v42 = vsel %vm1694_vm14, %v2575_v50, 0.0  ;;  %v8627_v57 = vld [vmem:[#allocation141_spill] sm:$0xff] }
 0x407   :  { %v1427_v28 = vadd.f32 %v1385_v6, %v8625_v52  ;;  %v1393_v29 = vmul.f32 0.6931472, %v4102_v46  ;;  %v4104_v34 = vpop.eup %4103  ;;  %v2708_v6 = vsel %vm1694_vm14, %v7099_v9, 0.0  ;;  %v1815_v50 = vsel %vm1694_vm14, %v3704_v53, 0.0 }
 0x408   :  { %v2626_v26 = vadd.f32 %v2625_v14, %v2624_v62  ;;  %v2709_v49 = vadd.f32 %v2708_v6, %v2707_v54  ;;  %v3001_v14 = vmul.f32 1.442695, %v2967_v17  ;;  %v8632_v54 = vld [vmem:[#allocation49_spill] sm:$0xff]  ;;  %v8633_v6 = vld [vmem:[#allocation162_spill] sm:$0xff] }
 0x409   :  { %v1555_v37 = vsub.f32 %v1427_v28, %v8627_v57  ;;  %v1431_v16 = vadd.f32 %v1393_v29, %v8628_v40  ;;  %2957 = vmax.xlane.f32.xlu0 %v7071_v13  ;;  %2925 = vmax.xlane.f32.xlu2 %v6968_v12  ;;  %v8629_v28 = vld [vmem:[#allocation51_spill] sm:$0xff]  ;;  %v8630_v40 = vld [vmem:[#allocation189_spill] sm:$0xff]  ;;  %v8631_v29 = vld [vmem:[#allocation192_spill] sm:$0xff] }
 0x40a   :  { %v2628_v62 = vadd.f32 %v2627_v42, %v2626_v26  ;;  %3061 = vadd.xlane.f32.xlu1 %v4104_v34  ;;  %v2449_v52 = vsub.f32 %v2321_v3, %v8630_v40  ;;  %v2322_v2 = vadd.f32 %v2283_v48, %v8631_v29  ;;  %v7115_v26 = vsel %vm1593_vm3, 1.0, %v8368_v8  ;;  %v952_v48 = vld [vmem:[%s7986_s1 + $0xe0] sm:$0xff] }
 0x40b   :  { %v4106_v11 = vpop.eup %4105  ;;  %v1683_v39 = vmul.f32 %v6907_v33, %v1555_v37  ;;  %v1559_v30 = vsub.f32 %v1431_v16, %v8629_v28  ;;  %v1816_v3 = vadd.f32 %v1815_v50, %v7049_v20  ;;  %v1738_v37 = vsel %vm1694_vm14, %v7035_v10, 0.0  ;;  %v8635_v50 = vld [vmem:[#allocation175_spill] sm:$0xff]  ;;  %v8636_v40 = vld [vmem:[#allocation165_spill] sm:$0xff] }
 0x40c   :  { %v4108_v46 = vpop.eup %4107  ;;  %v1395_v57 = vmul.f32 0.6931472, %v4106_v11  ;;  %v2223_v13 = vpop.xlane.xlu0 %2222  ;;  %vm1594_vm7 = vcmp.eq.s32.totalorder %v952_v48, 0  ;;  %v1740_v20 = vsel %vm1694_vm14, %v6872_v38, 0.0  ;;  %vm2486_vm11 = vcmp.eq.s32.totalorder %v952_v48, 1 }
 0x40d   :  { %v1736_v34 = vsel %vm1694_vm14, %v1683_v39, 0.0  ;;  %v7119_v17 = vmul.f32 %v7028_v27, %v1559_v30  ;;  %v2279_v33 = vmul.f32 0.6931472, %v4108_v46  ;;  %4109 = vlog2.f32 %v2223_v13  ;;  %v1327_v16 = vpop.xlane.xlu1 %1326 }
 0x40e   :  { %v1737_v24 = vadd.f32 %v1736_v34, %v7016_v45  ;;  %v1432_v42 = vadd.f32 %v1395_v57, %v8632_v54  ;;  %4111 = vlog2.f32 %v1327_v16  ;;  %v1817_v13 = vsel %vm1694_vm14, %v7115_v26, 0.0  ;;  %v8634_v45 = vld [vmem:[#allocation64_spill] sm:$0xff] }
 0x40f   :  { %v2320_v27 = vadd.f32 %v2279_v33, %v8633_v6  ;;  %v1818_v28 = vadd.f32 %v1817_v13, %v1816_v3  ;;  %v7134_v30 = vsel %vm1594_vm7, 1.0, %v8368_v8  ;;  %v2450_v46 = vsub.f32 %v2322_v2, %v8635_v50 }
 0x410   :  { %v1739_v11 = vadd.f32 %v1738_v37, %v1737_v24  ;;  %v1560_v39 = vsub.f32 %v1432_v42, %v8634_v45  ;;  %v1819_v29 = vsel %vm1694_vm14, %v7134_v30, 0.0  ;;  %4113 = vpow2.f32 %v3001_v14 }
 0x411   :  { %v2448_v10 = vsub.f32 %v2320_v27, %v8636_v40  ;;  %2963 = vmax.xlane.f32.xlu0 %v7085_v51  ;;  %2931 = vmax.xlane.f32.xlu2 %v7066_v43  ;;  %v1820_v33 = vadd.f32 %v1819_v29, %v1818_v28  ;;  %v2577_v24 = vmul.f32 %v6971_v25, %v2449_v52  ;;  %v7147_v54 = vsel %vm2486_vm11, 1.0, %v8368_v8  ;;  %v8637_v52 = vld [vmem:[#allocation174_spill] sm:$0xff]  ;;  %v8639_v28 = vld [vmem:[#allocation169_spill] sm:$0xff] }
 0x412   :  { %v1688_v57 = vmul.f32 %v3704_v53, %v1560_v39  ;;  %v1741_v34 = vadd.f32 %v1740_v20, %v1739_v11  ;;  %v2578_v42 = vmul.f32 %v7020_v60, %v2450_v46  ;;  %v2710_v53 = vsel %vm1694_vm14, %v7147_v54, 0.0  ;;  %v8638_v11 = vld [vmem:[#allocation129_spill] sm:$0xff] }
 0x413   :  { %v4110_v16 = vpop.eup %4109  ;;  %v2576_v38 = vmul.f32 %v6987_v5, %v2448_v10  ;;  %v2711_v27 = vadd.f32 %v2710_v53, %v2709_v49  ;;  %v2631_v25 = vsel %vm1694_vm14, %v2577_v24, 0.0  ;;  %v7158_v60 = vsel %vm2868_vm4, %v8638_v11, -1e+30  ;;  %v8640_v49 = vld [vmem:[#allocation190_spill] sm:$0xff] }
 0x414   :  { %v4112_v2 = vpop.eup %4111  ;;  %v2287_v5 = vmul.f32 0.6931472, %v4110_v16  ;;  %v2633_v39 = vsel %vm1694_vm14, %v2578_v42, 0.0  ;;  %v1744_v42 = vsel %vm1694_vm14, %v7119_v17, 0.0 }
 0x415   :  { %v2629_v3 = vsel %vm1694_vm14, %v2576_v38, 0.0  ;;  %v1391_v37 = vmul.f32 0.6931472, %v4112_v2  ;;  %v2221_v6 = vpop.xlane.xlu1 %2220  ;;  %v7169_v38 = vld [vmem:[%s7986_s1 + $0xe8] sm:$0xff] }
 0x416   :  { %v2630_v14 = vadd.f32 %v2629_v3, %v2628_v62  ;;  %4115 = vlog2.f32 %v2221_v6  ;;  %v4114_v13 = vpop.eup %4113  ;;  %v2324_v50 = vadd.f32 %v2287_v5, %v8640_v49  ;;  %vm1595_vm6 = vcmp.eq.s32.totalorder %v7169_v38, 0 }
 0x417   :  { %v1430_v48 = vadd.f32 %v1391_v37, %v8637_v52  ;;  %v7177_v37 = vsel %vm1595_vm6, 1.0, %v8368_v8  ;;  %v7182_v6 = vsel %vm2868_vm4, %v6413_v31, -1e+30  ;;  %vm2487_vm3 = vcmp.eq.s32.totalorder %v7169_v38, 1 }
 0x418   :  { %v2632_v45 = vadd.f32 %v2631_v25, %v2630_v14  ;;  %v1746_v14 = vsel %vm1694_vm14, %v1688_v57, 0.0  ;;  %v8641_v25 = vld [vmem:[#allocation186_spill] sm:$0xff] }
 0x419   :  { %v1558_v20 = vsub.f32 %v1430_v48, %v8639_v28  ;;  %3065 = vadd.xlane.f32.xlu0 %v4114_v13  ;;  %2937 = vmax.xlane.f32.xlu2 %v7158_v60 }
 0x41a   :  { %v2634_v62 = vadd.f32 %v2633_v39, %v2632_v45 }
 0x41b   :  { %v1686_v46 = vmul.f32 %v7023_v23, %v1558_v20  ;;  %v2452_v23 = vsub.f32 %v2324_v50, %v6380_v44  ;;  %v7206_v50 = vsel %vm2868_vm4, %v6600_v55, -1e+30 }
 0x41c   :  { %v4116_v40 = vpop.eup %4115  ;;  %v2225_v10 = vpop.xlane.xlu2 %2224 }
 0x41d   :  { %v1742_v29 = vsel %vm1694_vm14, %v1686_v46, 0.0  ;;  %v2285_v16 = vmul.f32 0.6931472, %v4116_v40  ;;  %4117 = vlog2.f32 %v2225_v10  ;;  %v1333_v24 = vpop.xlane.xlu1 %1332  ;;  %v2580_v52 = vmul.f32 %v7076_v32, %v2452_v23  ;;  %v8644_v10 = vld [vmem:[#allocation187_spill] sm:$0xff] }
 0x41e   :  { %v1743_v2 = vadd.f32 %v1742_v29, %v1741_v34  ;;  %4119 = vlog2.f32 %v1333_v24  ;;  %v1821_v34 = vsel %vm1694_vm14, %v7177_v37, 0.0  ;;  %v7210_v40 = vsel %vm2487_vm3, 1.0, %v8368_v8 }
 0x41f   :  { %v2323_v3 = vadd.f32 %v2285_v16, %v6123_v47  ;;  %v7189_v44 = vadd.f32 %v1821_v34, %v1820_v33  ;;  %v7198_v33 = vld [vmem:[%s7986_s1 + $0xf8] sm:$0xff]  ;;  %v2637_v32 = vsel %vm1694_vm14, %v2580_v52, 0.0  ;;  %v2712_v16 = vsel %vm1694_vm14, %v7210_v40, 0.0  ;;  %v7223_v34 = vld [vmem:[%s7986_s1 + $0xf0] sm:$0xff] }
 0x420   :  { %v1745_v53 = vadd.f32 %v1744_v42, %v1743_v2  ;;  %vm2489_vm7 = vcmp.eq.s32.totalorder %v7198_v33, 1  ;;  %v2713_v2 = vadd.f32 %v2712_v16, %v2711_v27  ;;  %vm2488_vm11 = vcmp.eq.s32.totalorder %v7223_v34, 1 }
 0x421   :  { %v2451_v17 = vsub.f32 %v2323_v3, %v8641_v25  ;;  %2943 = vmax.xlane.f32.xlu2 %v7182_v6  ;;  %vm1596_vm6 = vcmp.eq.s32.totalorder %v7223_v34, 0  ;;  %vm1597_vm3 = vcmp.eq.s32.totalorder %v7198_v33, 0 }
 0x422   :  { %v1747_v47 = vadd.f32 %v1746_v14, %v1745_v53  ;;  %v7226_v14 = vsel %vm2489_vm7, 1.0, %v8368_v8 }
 0x423   :  { %v4118_v5 = vpop.eup %4117  ;;  %v2579_v48 = vmul.f32 %v7061_v19, %v2451_v17  ;;  %v8642_v19 = vld [vmem:[#allocation193_spill] sm:$0xff] }
 0x424   :  { %v4120_v31 = vpop.eup %4119  ;;  %v2289_v13 = vmul.f32 0.6931472, %v4118_v5  ;;  %v1335_v11 = vpop.xlane.xlu2 %1334  ;;  %v8645_v5 = vld [vmem:[#allocation40_spill] sm:$0xff] }
 0x425   :  { %v2635_v45 = vsel %vm1694_vm14, %v2579_v48, 0.0  ;;  %v1397_v39 = vmul.f32 0.6931472, %v4120_v31  ;;  %4121 = vlog2.f32 %v1335_v11  ;;  %v2227_v57 = vpop.xlane.xlu1 %2226  ;;  %v7232_v48 = vsel %vm2488_vm11, 1.0, %v8368_v8  ;;  %v8646_v31 = vld [vmem:[#allocation55_spill] sm:$0xff] }
 0x426   :  { %v2636_v28 = vadd.f32 %v2635_v45, %v2634_v62  ;;  %v2325_v20 = vadd.f32 %v2289_v13, %v6422_v59  ;;  %4123 = vlog2.f32 %v2227_v57  ;;  %v8643_v62 = vld [vmem:[#allocation194_spill] sm:$0xff]  ;;  %v2716_v11 = vsel %vm1694_vm14, %v7226_v14, 0.0 }
 0x427   :  { %v1433_v49 = vadd.f32 %v1397_v39, %v8642_v19  ;;  %v2714_v45 = vsel %vm1694_vm14, %v7232_v48, 0.0  ;;  %v7242_v39 = vsel %vm2868_vm4, %v6785_v15, -1e+30  ;;  %v8649_v19 = vld [vmem:[#allocation38_spill] sm:$0xff]  ;;  %v3708_v15 = vsel %vm1596_vm6, 1.0, %v8368_v8 }
 0x428   :  { %v2453_v46 = vsub.f32 %v2325_v20, %v8643_v62  ;;  %v2638_v59 = vadd.f32 %v2637_v32, %v2636_v28  ;;  %v2715_v28 = vadd.f32 %v2714_v45, %v2713_v2  ;;  %v8648_v20 = vld [vmem:[#allocation90_spill] sm:$0xff]  ;;  %v1823_v16 = vsel %vm1694_vm14, %v3708_v15, 0.0 }
 0x429   :  { %v1561_v29 = vsub.f32 %v1433_v49, %v8644_v10  ;;  %2949 = vmax.xlane.f32.xlu2 %v7206_v50  ;;  %v2966_v49 = vsub.f32 %v8649_v19, %v6683_v63 }
 0x42a   :  { %v2581_v24 = vmul.f32 %v7099_v9, %v2453_v46  ;;  %v7251_v46 = vadd.f32 %v2716_v11, %v2715_v28  ;;  %v8652_v28 = vld [vmem:[#allocation126_spill] sm:$0xff] }
 0x42b   :  { %v4122_v55 = vpop.eup %4121  ;;  %v1689_v42 = vmul.f32 %v7115_v26, %v1561_v29 }
 0x42c   :  { %v4124_v23 = vpop.eup %4123  ;;  %v2639_v3 = vsel %vm1694_vm14, %v2581_v24, 0.0  ;;  %v1399_v53 = vmul.f32 0.6931472, %v4122_v55 }
 0x42d   :  { %v2640_v25 = vadd.f32 %v2639_v3, %v2638_v59  ;;  %v1748_v17 = vsel %vm1694_vm14, %v1689_v42, 0.0  ;;  %v2291_v9 = vmul.f32 0.6931472, %v4124_v23  ;;  %v1339_v27 = vpop.xlane.xlu1 %1338  ;;  %v2999_v3 = vmul.f32 1.442695, %v2966_v49 }
 0x42e   :  { %v1749_v26 = vadd.f32 %v1748_v17, %v1747_v47  ;;  %v1434_v52 = vadd.f32 %v1399_v53, %v8645_v5  ;;  %4125 = vlog2.f32 %v1339_v27  ;;  %v8647_v47 = vld [vmem:[#allocation127_spill] sm:$0xff]  ;;  %v8650_v53 = vld [vmem:[#allocation44_spill] sm:$0xff]  ;;  %v7267_v27 = vsel %vm1597_vm3, 1.0, %v8368_v8 }
 0x42f   :  { %v2326_v13 = vadd.f32 %v2291_v9, %v8646_v31  ;;  %v7264_v9 = vsel %vm2868_vm4, %v7001_v35, -1e+30 }
 0x430   :  { %v1562_v57 = vsub.f32 %v1434_v52, %v8647_v47 }
 0x431   :  { %v2454_v32 = vsub.f32 %v2326_v13, %v8648_v20  ;;  %2955 = vmax.xlane.f32.xlu2 %v7242_v39 }
 0x432   :  { %v1690_v62 = vmul.f32 %v7134_v30, %v1562_v57 }
 0x433   :  { %v2582_v59 = vmul.f32 %v7147_v54, %v2454_v32  ;;  %v1824_v54 = vadd.f32 %v1823_v16, %v7189_v44 }
 0x434   :  { %v4126_v10 = vpop.eup %4125  ;;  %v1750_v29 = vsel %vm1694_vm14, %v1690_v62, 0.0  ;;  %v1337_v24 = vpop.xlane.xlu0 %1336 }
 0x435   :  { %v1751_v2 = vadd.f32 %v1750_v29, %v1749_v26  ;;  %v2641_v55 = vsel %vm1694_vm14, %v2582_v59, 0.0  ;;  %v1403_v42 = vmul.f32 0.6931472, %v4126_v10  ;;  %4127 = vlog2.f32 %v1337_v24  ;;  %v2233_v23 = vpop.xlane.xlu1 %2232  ;;  %v8651_v26 = vld [vmem:[#allocation125_spill] sm:$0xff] }
 0x436   :  { %v2642_v30 = vadd.f32 %v2641_v55, %v2640_v25  ;;  %v1825_v25 = vsel %vm1694_vm14, %v7267_v27, 0.0  ;;  %4129 = vpow2.f32 %v2999_v3 }
 0x437   :  { %v1436_v17 = vadd.f32 %v1403_v42, %v8650_v53  ;;  %v7273_v52 = vadd.f32 %v1825_v25, %v1824_v54  ;;  %4131 = vlog2.f32 %v2233_v23 }
 0x439   :  { %v1564_v5 = vsub.f32 %v1436_v17, %v8651_v26  ;;  %2961 = vmax.xlane.f32.xlu2 %v7264_v9 }
 0x43b   :  { %v4128_v31 = vpop.eup %4127  ;;  %v1692_v44 = vmul.f32 %v3708_v15, %v1564_v5 }
 0x43c   :  { %v1401_v13 = vmul.f32 0.6931472, %v4128_v31  ;;  %v2229_v11 = vpop.xlane.xlu0 %2228  ;;  %v4130_v57 = vpop.eup %4129 }
 0x43d   :  { %4133 = vlog2.f32 %v2229_v11  ;;  %v7275_v35 = vpop.xlane.xlu1 %2909  ;;  %v4132_v49 = vpop.eup %4131  ;;  %v1754_v55 = vsel %vm1694_vm14, %v1692_v44, 0.0 }
 0x43e   :  { %v1435_v45 = vadd.f32 %v1401_v13, %v6574_v4  ;;  %v2969_v47 = vsub.f32 %v8558_v41, %v7275_v35  ;;  %v2297_v42 = vmul.f32 0.6931472, %v4132_v49 }
 0x440   :  { %v1563_v20 = vsub.f32 %v1435_v45, %v8652_v28  ;;  %v3005_v32 = vmul.f32 1.442695, %v2969_v47  ;;  %v2329_v54 = vadd.f32 %v2297_v42, %v6500_v1 }
 0x441   :  { %3063 = vadd.xlane.f32.xlu2 %v4130_v57 }
 0x442   :  { %v1691_v62 = vmul.f32 %v7177_v37, %v1563_v20  ;;  %4135 = vpow2.f32 %v3005_v32  ;;  %v8653_v20 = vld [vmem:[#allocation117_spill] sm:$0xff] }
 0x443   :  { %v4134_v59 = vpop.eup %4133 }
 0x444   :  { %v1752_v15 = vsel %vm1694_vm14, %v1691_v62, 0.0  ;;  %v2293_v10 = vmul.f32 0.6931472, %v4134_v59  ;;  %v2231_v29 = vpop.xlane.xlu2 %2230  ;;  %v7283_v16 = vpop.xlane.xlu0 %2907 }
 0x445   :  { %v1753_v4 = vadd.f32 %v1752_v15, %v1751_v2  ;;  %4137 = vlog2.f32 %v2231_v29  ;;  %v2968_v24 = vsub.f32 %v8561_v56, %v7283_v16 }
 0x446   :  { %v2327_v23 = vadd.f32 %v2293_v10, %v6389_v61  ;;  %v2457_v61 = vsub.f32 %v2329_v54, %v6582_v0  ;;  %v7324_v54 = vpop.xlane.xlu1 %2923 }
 0x447   :  { %v3003_v3 = vmul.f32 1.442695, %v2968_v24  ;;  %v1755_v37 = vadd.f32 %v1754_v55, %v1753_v4  ;;  %8658 = vst [vmem:[#allocation109_spill] sm:$0xff] %v7324_v54 }
 0x448   :  { %v4136_v53 = vpop.eup %4135  ;;  %v2455_v17 = vsub.f32 %v2327_v23, %v6920_v7  ;;  %v2585_v45 = vmul.f32 %v7226_v14, %v2457_v61  ;;  %v8654_v14 = vld [vmem:[#allocation103_spill] sm:$0xff]  ;;  %v8656_v23 = vld [vmem:[#allocation61_spill] sm:$0xff] }
 0x449   :  { %4139 = vpow2.f32 %v3003_v3  ;;  %3069 = vadd.xlane.f32.xlu2 %v4136_v53 }
 0x44a   :  { %v2583_v2 = vmul.f32 %v7210_v40, %v2455_v17  ;;  %v8657_v17 = vld [vmem:[#allocation48_spill] sm:$0xff] }
 0x44b   :  { %v4138_v26 = vpop.eup %4137 }
 0x44c   :  { %v2643_v5 = vsel %vm1694_vm14, %v2583_v2, 0.0  ;;  %v2295_v25 = vmul.f32 0.6931472, %v4138_v26  ;;  %v1341_v31 = vpop.xlane.xlu2 %1340  ;;  %v7316_v55 = vpop.xlane.xlu0 %2921 }
 0x44d   :  { %v2644_v44 = vadd.f32 %v2643_v5, %v2642_v30  ;;  %4141 = vlog2.f32 %v1341_v31  ;;  %8655 = vst [vmem:[#allocation54_spill] sm:$0xff] %v7316_v55 }
 0x44e   :  { %v2328_v13 = vadd.f32 %v2295_v25, %v6664_v18  ;;  %v2647_v18 = vsel %vm1694_vm14, %v2585_v45, 0.0  ;;  %v8660_v25 = vld [vmem:[#allocation56_spill] sm:$0xff] }
 0x44f   :  { %v4140_v11 = vpop.eup %4139 }
 0x450   :  { %v2456_v7 = vsub.f32 %v2328_v13, %v6646_v58  ;;  %3067 = vadd.xlane.f32.xlu1 %v4140_v11  ;;  %v8661_v13 = vld [vmem:[#allocation47_spill] sm:$0xff] }
 0x451   :  { %v2976_v11 = vsub.f32 %v8661_v13, %v7324_v54 }
 0x452   :  { %v2584_v1 = vmul.f32 %v7232_v48, %v2456_v7  ;;  %v8662_v7 = vld [vmem:[#allocation145_spill] sm:$0xff] }
 0x453   :  { %v4142_v40 = vpop.eup %4141 }
 0x454   :  { %v2645_v47 = vsel %vm1694_vm14, %v2584_v1, 0.0  ;;  %v1405_v57 = vmul.f32 0.6931472, %v4142_v40  ;;  %v7299_v28 = vpop.xlane.xlu2 %2911  ;;  %v7328_v5 = vpop.xlane.xlu0 %2927  ;;  %v3019_v1 = vmul.f32 1.442695, %v2976_v11 }
 0x455   :  { %v2646_v30 = vadd.f32 %v2645_v47, %v2644_v44  ;;  %v2970_v0 = vsub.f32 %v6807_v21, %v7299_v28  ;;  %8659 = vst [vmem:[#allocation151_spill] sm:$0xff] %v7328_v5  ;;  %v2978_v45 = vsub.f32 %v8662_v7, %v7328_v5  ;;  %v7338_v47 = vpop.xlane.xlu1 %2929  ;;  %v8714_v5 = vld [vmem:[#allocation23_spill] sm:$0xff] }
 0x456   :  { %v1437_v32 = vadd.f32 %v1405_v57, %v8653_v20  ;;  %8664 = vst [vmem:[#allocation134_spill] sm:$0xff] %v7338_v47  ;;  %v8665_v57 = vld [vmem:[#allocation60_spill] sm:$0xff] }
 0x457   :  { %v7305_v58 = vadd.f32 %v2647_v18, %v2646_v30  ;;  %v3007_v49 = vmul.f32 1.442695, %v2970_v0  ;;  %v3023_v18 = vmul.f32 1.442695, %v2978_v45 }
 0x458   :  { %v1565_v62 = vsub.f32 %v1437_v32, %v8654_v14  ;;  %v8667_v14 = vld [vmem:[#allocation58_spill] sm:$0xff] }
 0x459   :  { %4143 = vpow2.f32 %v3007_v49 }
 0x45a   :  { %v1693_v48 = vmul.f32 %v7267_v27, %v1565_v62  ;;  %v2979_v62 = vsub.f32 %v8667_v14, %v7338_v47  ;;  %v8713_v47 = vld [vmem:[#allocation130_spill] sm:$0xff] }
 0x45c   :  { %v1756_v59 = vsel %vm1694_vm14, %v1693_v48, 0.0  ;;  %v7310_v15 = vpop.xlane.xlu2 %2913  ;;  %v7342_v32 = vpop.xlane.xlu0 %2933  ;;  %v8668_v48 = vld [vmem:[#allocation154_spill] sm:$0xff] }
 0x45d   :  { %v7312_v10 = vadd.f32 %v1756_v59, %v1755_v37  ;;  %v2971_v29 = vsub.f32 %v6879_v22, %v7310_v15  ;;  %v2975_v37 = vsub.f32 %v8657_v17, %v7316_v55  ;;  %8666 = vst [vmem:[#allocation66_spill] sm:$0xff] %v7342_v32  ;;  %v2981_v59 = vsub.f32 %v8668_v48, %v7342_v32 }
 0x45f   :  { %v4144_v4 = vpop.eup %4143  ;;  %v3009_v24 = vmul.f32 1.442695, %v2971_v29  ;;  %v3017_v2 = vmul.f32 1.442695, %v2975_v37  ;;  %v3025_v29 = vmul.f32 1.442695, %v2979_v62 }
 0x460   :  { %3071 = vadd.xlane.f32.xlu0 %v4144_v4 }
 0x461   :  { %4145 = vpow2.f32 %v3009_v24 }
 0x464   :  { %v7318_v42 = vpop.xlane.xlu2 %2915 }
 0x465   :  { %v2972_v27 = vsub.f32 %v8656_v23, %v7318_v42 }
 0x467   :  { %v4146_v3 = vpop.eup %4145  ;;  %v3011_v53 = vmul.f32 1.442695, %v2972_v27 }
 0x468   :  { %3073 = vadd.xlane.f32.xlu1 %v4146_v3  ;;  %v3029_v3 = vmul.f32 1.442695, %v2981_v59 }
 0x469   :  { %4147 = vpow2.f32 %v3011_v53 }
 0x46a   :  { %4149 = vpow2.f32 %v3017_v2 }
 0x46c   :  { %v7326_v26 = vpop.xlane.xlu2 %2917 }
 0x46d   :  { %v2973_v31 = vsub.f32 %v8660_v25, %v7326_v26 }
 0x46f   :  { %v4148_v44 = vpop.eup %4147  ;;  %v3013_v61 = vmul.f32 1.442695, %v2973_v31 }
 0x470   :  { %3075 = vadd.xlane.f32.xlu2 %v4148_v44  ;;  %v4150_v0 = vpop.eup %4149 }
 0x471   :  { %4151 = vpow2.f32 %v3013_v61 }
 0x472   :  { %4153 = vpow2.f32 %v3019_v1 }
 0x474   :  { %v7336_v40 = vpop.xlane.xlu2 %2919 }
 0x475   :  { %8663 = vst [vmem:[#allocation65_spill] sm:$0xff] %v7336_v40  ;;  %v2974_v30 = vsub.f32 %v8665_v57, %v7336_v40 }
 0x477   :  { %v4152_v20 = vpop.eup %4151  ;;  %v3015_v49 = vmul.f32 1.442695, %v2974_v30 }
 0x478   :  { %3077 = vadd.xlane.f32.xlu0 %v4152_v20  ;;  %3081 = vadd.xlane.f32.xlu2 %v4150_v0  ;;  %v4154_v27 = vpop.eup %4153  ;;  %v8671_v0 = vld [vmem:[#allocation181_spill] sm:$0xff] }
 0x479   :  { %4155 = vpow2.f32 %v3015_v49  ;;  %v3221_v20 = vsel %vm892_vm9, %v8671_v0, 0.0  ;;  %v8673_v49 = vld [vmem:[#allocation39_spill] sm:$0xff] }
 0x47a   :  { %4157 = vpow2.f32 %v3023_v18  ;;  %v3223_v59 = vsel %vm894_vm1, %v8673_v49, 0.0 }
 0x47b   :  { %4159 = vpow2.f32 %v3025_v29  ;;  %v7402_v29 = vpop.xlane.xlu0 %2939 }
 0x47c   :  { %v7348_v4 = vpop.xlane.xlu2 %2925  ;;  %8687 = vst [vmem:[#allocation70_spill] sm:$0xff] %v7402_v29 }
 0x47d   :  { %8669 = vst [vmem:[#allocation71_spill] sm:$0xff] %v7348_v4  ;;  %v2977_v24 = vsub.f32 %v6968_v12, %v7348_v4 }
 0x47f   :  { %v4156_v53 = vpop.eup %4155  ;;  %v3021_v37 = vmul.f32 1.442695, %v2977_v24  ;;  %v3224_v24 = vsel %vm895_vm2, %v8561_v56, 0.0 }
 0x480   :  { %v4158_v2 = vpop.eup %4157  ;;  %3083 = vadd.xlane.f32.xlu0 %v4154_v27  ;;  %3079 = vadd.xlane.f32.xlu1 %v4156_v53 }
 0x481   :  { %4161 = vpow2.f32 %v3021_v37  ;;  %3087 = vadd.xlane.f32.xlu2 %v4158_v2  ;;  %v4160_v61 = vpop.eup %4159  ;;  %v3226_v37 = vsel %vm897_vm8, %v6807_v21, 0.0  ;;  %v2649_v2 = vrot.slane %v7305_v58, 4  ;;  %v3229_v21 = vsel %vm900_vm15, %v8660_v25, 0.0  ;;  %v8685_v25 = vld [vmem:[#allocation12_spill] sm:$0xff] }
 0x482   :  { %4163 = vpow2.f32 %v3029_v3  ;;  %v3222_v3 = vsel %vm893_vm13, %v8649_v19, 0.0  ;;  %vm8686_vm13 = vcmp.eq.s32.totalorder %v8571_v36, %v8685_v25 }
 0x483   :  { %v2650_v19 = vadd.f32 %v2649_v2, %v7305_v58  ;;  %v8690_v2 = vld [vmem:[#allocation52_spill] sm:$0xff] }
 0x484   :  { %v7352_v31 = vpop.xlane.xlu2 %2931 }
 0x485   :  { %8670 = vst [vmem:[#allocation77_spill] sm:$0xff] %v7352_v31  ;;  %v2980_v44 = vsub.f32 %v7066_v43, %v7352_v31  ;;  %v2651_v18 = vrot.slane %v2650_v19, 2 }
 0x487   :  { %v4162_v11 = vpop.eup %4161  ;;  %v3027_v45 = vmul.f32 1.442695, %v2980_v44  ;;  %v7377_v44 = vpop.xlane.xlu1 %2935  ;;  %v2652_v62 = vadd.f32 %v2651_v18, %v2650_v19  ;;  %v8695_v18 = vld [vmem:[#allocation15_spill] sm:$0xff] }
 0x488   :  { %v4164_v1 = vpop.eup %4163  ;;  %3089 = vadd.xlane.f32.xlu0 %v4160_v61  ;;  %3085 = vadd.xlane.f32.xlu1 %v4162_v11  ;;  %8678 = vst [vmem:[#allocation121_spill] sm:$0xff] %v7377_v44  ;;  %v3227_v11 = vsel %vm898_vm10, %v6879_v22, 0.0  ;;  %v8683_v22 = vld [vmem:[#allocation19_spill] sm:$0xff]  ;;  %vm8696_vm2 = vcmp.eq.s32.totalorder %v8571_v36, %v8695_v18 }
 0x489   :  { %4165 = vpow2.f32 %v3027_v45  ;;  %3093 = vadd.xlane.f32.xlu2 %v4164_v1  ;;  %v8682_v1 = vld [vmem:[#allocation57_spill] sm:$0xff]  ;;  %vm8684_vm9 = vcmp.eq.s32.totalorder %v8571_v36, %v8683_v22  ;;  %v2653_v27 = vrot.slane %v2652_v62, 1 }
 0x48a   :  { %v3230_v58 = vsel %vm8684_vm9, %v8665_v57, 0.0 }
 0x48c   :  { %v7379_v61 = vpop.xlane.xlu2 %2937 }
 0x48d   :  { %8679 = vst [vmem:[#allocation74_spill] sm:$0xff] %v7379_v61  ;;  %v2983_v0 = vsub.f32 %v7158_v60, %v7379_v61 }
 0x48f   :  { %v4166_v30 = vpop.eup %4165  ;;  %v3033_v49 = vmul.f32 1.442695, %v2983_v0 }
 0x490   :  { %3253 = vadd.xlane.f32.xlu0 %v3221_v20  ;;  %3091 = vadd.xlane.f32.xlu1 %v4166_v30  ;;  %v2982_v30 = vsub.f32 %v8682_v1, %v7377_v44  ;;  %v4271_v44 = vld [vmem:[%s7986_s1 + $0x48] sm:$0xff] }
 0x491   :  { %3257 = vadd.xlane.f32.xlu2 %v3223_v59  ;;  %v3232_v59 = vsel %vm8686_vm13, %v8661_v13, 0.0 }
 0x492   :  { %v3031_v20 = vmul.f32 1.442695, %v2982_v30  ;;  %v8693_v30 = vld [vmem:[#allocation17_spill] sm:$0xff] }
 0x493   :  { %vm8694_vm1 = vcmp.eq.s32.totalorder %v8571_v36, %v8693_v30 }
 0x494   :  { %4167 = vpow2.f32 %v3031_v20  ;;  %v3234_v0 = vsel %vm8694_vm1, %v8662_v7, 0.0  ;;  %v3235_v20 = vsel %vm8696_vm2, %v8667_v14, 0.0  ;;  %v8699_v7 = vld [vmem:[#allocation152_spill] sm:$0xff]  ;;  %vm3358_vm2 = vcmp.eq.s32.totalorder %v4271_v44, 2 }
 0x495   :  { %4169 = vpow2.f32 %v3033_v49  ;;  %v4262_v14 = vld [vmem:[%s7986_s1] sm:$0xff] }
 0x496   :  { %vm3349_vm8 = vcmp.eq.s32.totalorder %v4262_v14, 2 }
 0x498   :  { %3259 = vadd.xlane.f32.xlu0 %v3224_v24  ;;  %3255 = vadd.xlane.f32.xlu1 %v3222_v3  ;;  %v7404_v24 = vpop.xlane.xlu2 %2943  ;;  %v7406_v3 = vpop.xlane.xlu1 %2941 }
 0x499   :  { %3263 = vadd.xlane.f32.xlu2 %v3226_v37  ;;  %8688 = vst [vmem:[#allocation59_spill] sm:$0xff] %v7404_v24  ;;  %v2654_v37 = vadd.f32 %v2653_v27, %v2652_v62  ;;  %v2985_v56 = vsub.f32 %v8690_v2, %v7406_v3  ;;  %v2986_v13 = vsub.f32 %v7182_v6, %v7404_v24  ;;  %v4263_v27 = vld [vmem:[%s7986_s1 + $0x8] sm:$0xff] }
 0x49a   :  { %8689 = vst [vmem:[#allocation73_spill] sm:$0xff] %v7406_v3  ;;  %v4168_v53 = vpop.eup %4167  ;;  %vm3350_vm10 = vcmp.eq.s32.totalorder %v4263_v27, 2  ;;  %v8709_v3 = vld [vmem:[#allocation63_spill] sm:$0xff] }
 0x49b   :  { %v4170_v57 = vpop.eup %4169  ;;  %v3037_v45 = vmul.f32 1.442695, %v2985_v56  ;;  %v4264_v56 = vld [vmem:[%s7986_s1 + $0x10] sm:$0xff] }
 0x49c   :  { %vm3351_vm15 = vcmp.eq.s32.totalorder %v4264_v56, 2 }
 0x49d   :  { %4171 = vpow2.f32 %v3037_v45 }
 0x4a0   :  { %3265 = vadd.xlane.f32.xlu0 %v3227_v11  ;;  %v7412_v11 = vpop.xlane.xlu0 %2945  ;;  %v7414_v19 = vpop.xlane.xlu2 %2949 }
 0x4a1   :  { %3269 = vadd.xlane.f32.xlu2 %v3229_v21  ;;  %8691 = vst [vmem:[#allocation87_spill] sm:$0xff] %v7412_v11  ;;  %v3039_v21 = vmul.f32 1.442695, %v2986_v13  ;;  %v7424_v49 = vpop.xlane.xlu1 %2947 }
 0x4a2   :  { %8692 = vst [vmem:[#allocation158_spill] sm:$0xff] %v7414_v19 }
 0x4a3   :  { %4173 = vpow2.f32 %v3039_v21  ;;  %8697 = vst [vmem:[#allocation62_spill] sm:$0xff] %v7424_v49  ;;  %v4172_v62 = vpop.eup %4171  ;;  %v7454_v21 = vsel %vm3351_vm15, 1.0, %v8368_v8  ;;  %vm8715_vm15 = vcmp.eq.s32.totalorder %v8571_v36, %v8714_v5  ;;  %v4275_v5 = vld [vmem:[%s7986_s1 + $0x68] sm:$0xff] }
 0x4a4   :  { %v3549_v18 = vsel %vm1694_vm14, %v7454_v21, 0.0  ;;  %v3240_v55 = vsel %vm8715_vm15, %v8713_v47, 0.0 }
 0x4a8   :  { %3271 = vadd.xlane.f32.xlu0 %v3230_v58  ;;  %v7426_v22 = vpop.xlane.xlu0 %2951  ;;  %v7428_v58 = vpop.xlane.xlu2 %2955 }
 0x4a9   :  { %3275 = vadd.xlane.f32.xlu2 %v3232_v59  ;;  %8698 = vst [vmem:[#allocation80_spill] sm:$0xff] %v7428_v58  ;;  %v4174_v25 = vpop.eup %4173  ;;  %v2988_v59 = vsub.f32 %v8699_v7, %v7424_v49 }
 0x4b0   :  { %3095 = vadd.xlane.f32.xlu0 %v4168_v53  ;;  %v2989_v53 = vsub.f32 %v7206_v50, %v7414_v19  ;;  %v7466_v56 = vpop.xlane.xlu0 %2957  ;;  %v7468_v19 = vpop.xlane.xlu2 %2961 }
 0x4b1   :  { %3097 = vadd.xlane.f32.xlu2 %v4170_v57  ;;  %2727 = vperm.xlu1 %3811, %v2654_v37   ;;  %v7441_v37 = vsel %vm3349_vm8, 1.0, %v8368_v8  ;;  %v7444_v57 = vsel %vm3350_vm10, 1.0, %v8368_v8  ;;  %8701 = vst [vmem:[#allocation132_spill] sm:$0xff] %v7468_v19 }
 0x4b2   :  { %v3546_v13 = vsel %vm1694_vm14, %v7441_v37, 0.0  ;;  %v3547_v45 = vsel %vm1694_vm14, %v7444_v57, 0.0 }
 0x4b3   :  { %v3548_v30 = vadd.f32 %v3547_v45, %v3546_v13  ;;  %v4266_v45 = vld [vmem:[%s7986_s1 + $0x20] sm:$0xff] }
 0x4b4   :  { %vm3353_vm11 = vcmp.eq.s32.totalorder %v4266_v45, 2 }
 0x4b5   :  { %v3550_v27 = vadd.f32 %v3549_v18, %v3548_v30  ;;  %v8704_v30 = vld [vmem:[#allocation18_spill] sm:$0xff] }
 0x4b6   :  { %vm8705_vm6 = vcmp.eq.s32.totalorder %v8571_v36, %v8704_v30 }
 0x4b7   :  { %v3238_v18 = vsel %vm8705_vm6, %v8682_v1, 0.0 }
 0x4b8   :  { %3279 = vadd.xlane.f32.xlu0 %v3234_v0  ;;  %v3043_v0 = vmul.f32 1.442695, %v2988_v59  ;;  %v8702_v59 = vld [vmem:[#allocation20_spill] sm:$0xff]  ;;  %v7524_v61 = vpop.xlane.xlu2 %3063 }
 0x4b9   :  { %3281 = vadd.xlane.f32.xlu2 %v3235_v20  ;;  %v4265_v20 = vld [vmem:[%s7986_s1 + $0x18] sm:$0xff]  ;;  %vm8703_vm7 = vcmp.eq.s32.totalorder %v8571_v36, %v8702_v59 }
 0x4ba   :  { %vm3352_vm4 = vcmp.eq.s32.totalorder %v4265_v20, 2  ;;  %v3237_v13 = vsel %vm8703_vm7, %v8668_v48, 0.0  ;;  %v7484_v20 = vsel %vm3353_vm11, 1.0, %v8368_v8  ;;  %4175 = vpow2.f32 %v3043_v0  ;;  %v4267_v48 = vld [vmem:[%s7986_s1 + $0x28] sm:$0xff]  ;;  %v4268_v0 = vld [vmem:[%s7986_s1 + $0x30] sm:$0xff] }
 0x4bb   :  { %v7464_v14 = vsel %vm3352_vm4, 1.0, %v8368_v8  ;;  %vm3354_vm3 = vcmp.eq.s32.totalorder %v4267_v48, 2  ;;  %v3553_v59 = vsel %vm1694_vm14, %v7484_v20, 0.0  ;;  %vm3355_vm9 = vcmp.eq.s32.totalorder %v4268_v0, 2 }
 0x4bc   :  { %vm3362_vm11 = vcmp.eq.s32.totalorder %v4275_v5, 2 }
 0x4c0   :  { %3101 = vadd.xlane.f32.xlu0 %v4172_v62  ;;  %v7461_v62 = vpop.xlane.xlu1 %2953  ;;  %v4176_v48 = vpop.eup %4175 }
 0x4c1   :  { %3103 = vadd.xlane.f32.xlu2 %v4174_v25  ;;  %8700 = vst [vmem:[#allocation69_spill] sm:$0xff] %v7461_v62  ;;  %v3045_v25 = vmul.f32 1.442695, %v2989_v53  ;;  %v3551_v53 = vsel %vm1694_vm14, %v7464_v14, 0.0 }
 0x4c2   :  { %v3552_v49 = vadd.f32 %v3551_v53, %v3550_v27  ;;  %v7500_v27 = vsel %vm3355_vm9, 1.0, %v8368_v8 }
 0x4c3   :  { %4177 = vpow2.f32 %v3045_v25  ;;  %v4269_v25 = vld [vmem:[%s7986_s1 + $0x38] sm:$0xff] }
 0x4c4   :  { %v3554_v45 = vadd.f32 %v3553_v59, %v3552_v49  ;;  %vm3356_vm13 = vcmp.eq.s32.totalorder %v4269_v25, 2  ;;  %v3557_v49 = vsel %vm1694_vm14, %v7500_v27, 0.0  ;;  %v4270_v59 = vld [vmem:[%s7986_s1 + $0x40] sm:$0xff] }
 0x4c5   :  { %v7508_v30 = vsel %vm3356_vm13, 1.0, %v8368_v8  ;;  %vm3357_vm1 = vcmp.eq.s32.totalorder %v4270_v59, 2 }
 0x4c6   :  { %8706 = vst [vmem:[#allocation75_spill] sm:$0xff] %v7508_v30  ;;  %v7518_v25 = vsel %vm3357_vm1, 1.0, %v8368_v8 }
 0x4c7   :  { %8708 = vst [vmem:[#allocation139_spill] sm:$0xff] %v7518_v25  ;;  %v3561_v59 = vsel %vm1694_vm14, %v7518_v25, 0.0 }
 0x4c8   :  { %3285 = vadd.xlane.f32.xlu0 %v3237_v13  ;;  %v7492_v13 = vsel %vm3354_vm3, 1.0, %v8368_v8  ;;  %v7515_v0 = vpop.xlane.xlu1 %2959 }
 0x4c9   :  { %3287 = vadd.xlane.f32.xlu2 %v3238_v18  ;;  %v3555_v1 = vsel %vm1694_vm14, %v7492_v13, 0.0  ;;  %8707 = vst [vmem:[#allocation159_spill] sm:$0xff] %v7515_v0 }
 0x4ca   :  { %v3556_v53 = vadd.f32 %v3555_v1, %v3554_v45  ;;  %v3559_v45 = vsel %vm1694_vm14, %v7508_v30, 0.0  ;;  %v4178_v1 = vpop.eup %4177 }
 0x4cc   :  { %v3558_v18 = vadd.f32 %v3557_v49, %v3556_v53  ;;  %v2991_v53 = vsub.f32 %v8709_v3, %v7461_v62  ;;  %v7522_v49 = vpop.xlane.xlu0 %2963  ;;  %v4272_v62 = vld [vmem:[%s7986_s1 + $0x50] sm:$0xff] }
 0x4cd   :  { %vm3359_vm8 = vcmp.eq.s32.totalorder %v4272_v62, 2 }
 0x4ce   :  { %v3560_v24 = vadd.f32 %v3559_v45, %v3558_v18  ;;  %v7534_v18 = vsel %vm3358_vm2, 1.0, %v8368_v8  ;;  %v7542_v31 = vsel %vm3359_vm8, 1.0, %v8368_v8  ;;  %v3049_v44 = vmul.f32 1.442695, %v2991_v53 }
 0x4cf   :  { %8710 = vst [vmem:[#allocation67_spill] sm:$0xff] %v7534_v18 }
 0x4d0   :  { %3107 = vadd.xlane.f32.xlu0 %v4176_v48  ;;  %v2992_v48 = vsub.f32 %v7242_v39, %v7428_v58  ;;  %v3562_v45 = vadd.f32 %v3561_v59, %v3560_v24  ;;  %8711 = vst [vmem:[#allocation91_spill] sm:$0xff] %v7542_v31  ;;  %v4273_v58 = vld [vmem:[%s7986_s1 + $0x58] sm:$0xff]  ;;  %v3565_v24 = vsel %vm1694_vm14, %v7542_v31, 0.0  ;;  %4179 = vpow2.f32 %v3049_v44 }
 0x4d1   :  { %3109 = vadd.xlane.f32.xlu2 %v4178_v1  ;;  %v3563_v1 = vsel %vm1694_vm14, %v7534_v18, 0.0  ;;  %vm3360_vm10 = vcmp.eq.s32.totalorder %v4273_v58, 2  ;;  %v4274_v58 = vld [vmem:[%s7986_s1 + $0x60] sm:$0xff] }
 0x4d2   :  { %v3564_v32 = vadd.f32 %v3563_v1, %v3562_v45  ;;  %v3051_v59 = vmul.f32 1.442695, %v2992_v48  ;;  %v7550_v4 = vsel %vm3360_vm10, 1.0, %v8368_v8  ;;  %vm3361_vm4 = vcmp.eq.s32.totalorder %v4274_v58, 2  ;;  %v8716_v48 = vld [vmem:[#allocation21_spill] sm:$0xff] }
 0x4d3   :  { %8712 = vst [vmem:[#allocation142_spill] sm:$0xff] %v7550_v4  ;;  %v3567_v53 = vsel %vm1694_vm14, %v7550_v4, 0.0  ;;  %vm8717_vm7 = vcmp.eq.s32.totalorder %v8571_v36, %v8716_v48  ;;  %v7584_v48 = vpop.xlane.xlu2 %3069 }
 0x4d4   :  { %v3566_v62 = vadd.f32 %v3565_v24, %v3564_v32  ;;  %v3241_v45 = vsel %vm8717_vm7, %v8690_v2, 0.0  ;;  %v7566_v32 = vsel %vm3361_vm4, 1.0, %v8368_v8  ;;  %4181 = vpow2.f32 %v3051_v59  ;;  %v8719_v2 = vld [vmem:[#allocation13_spill] sm:$0xff] }
 0x4d5   :  { %8718 = vst [vmem:[#allocation146_spill] sm:$0xff] %v7566_v32  ;;  %v3569_v24 = vsel %vm1694_vm14, %v7566_v32, 0.0  ;;  %vm8720_vm6 = vcmp.eq.s32.totalorder %v8571_v36, %v8719_v2  ;;  %v4278_v2 = vld [vmem:[%s7986_s1 + $0x90] sm:$0xff] }
 0x4d6   :  { %v3568_v1 = vadd.f32 %v3567_v53, %v3566_v62  ;;  %v3225_v58 = vsel %vm8720_vm6, %v8558_v41, 0.0  ;;  %v7580_v62 = vsel %vm3362_vm11, 1.0, %v8368_v8  ;;  %v7582_v53 = vpop.xlane.xlu0 %3065  ;;  %vm3367_vm13 = vcmp.eq.s32.totalorder %v4278_v2, 2  ;;  %v4180_v32 = vpop.eup %4179 }
 0x4d7   :  { %8721 = vst [vmem:[#allocation94_spill] sm:$0xff] %v7580_v62  ;;  %v3571_v59 = vsel %vm1694_vm14, %v7580_v62, 0.0 }
 0x4d8   :  { %3291 = vadd.xlane.f32.xlu0 %v3240_v55  ;;  %v7573_v55 = vpop.xlane.xlu1 %3061  ;;  %v3570_v44 = vadd.f32 %v3569_v24, %v3568_v1  ;;  %v4277_v24 = vld [vmem:[%s7986_s1 + $0x78] sm:$0xff] }
 0x4d9   :  { %3293 = vadd.xlane.f32.xlu2 %v3241_v45  ;;  %v4276_v45 = vld [vmem:[%s7986_s1 + $0x70] sm:$0xff]  ;;  %vm3364_vm9 = vcmp.eq.s32.totalorder %v4277_v24, 2  ;;  %v4281_v24 = vld [vmem:[%s7986_s1 + $0x80] sm:$0xff] }
 0x4da   :  { %vm3363_vm3 = vcmp.eq.s32.totalorder %v4276_v45, 2  ;;  %v3572_v41 = vadd.f32 %v3571_v59, %v3570_v44  ;;  %v4279_v44 = vld [vmem:[%s7986_s1 + $0x88] sm:$0xff]  ;;  %v4280_v59 = vld [vmem:[%s7986_s1 + $0x98] sm:$0xff]  ;;  %vm3365_vm8 = vcmp.eq.s32.totalorder %v4281_v24, 2  ;;  %v7628_v24 = vsel %vm3367_vm13, 1.0, %v8368_v8 }
 0x4db   :  { %3261 = vadd.xlane.f32.xlu1 %v3225_v58  ;;  %v7592_v5 = vsel %vm3363_vm3, 1.0, %v8368_v8  ;;  %v7603_v58 = vsel %vm3364_vm9, 1.0, %v8368_v8  ;;  %vm3366_vm1 = vcmp.eq.s32.totalorder %v4279_v44, 2  ;;  %vm3368_vm2 = vcmp.eq.s32.totalorder %v4280_v59, 2  ;;  %v4282_v59 = vld [vmem:[%s7986_s1 + $0xa0] sm:$0xff]  ;;  %8727 = vst [vmem:[#allocation157_spill] sm:$0xff] %v7628_v24 }
 0x4dc   :  { %8722 = vst [vmem:[#allocation84_spill] sm:$0xff] %v7592_v5  ;;  %v3573_v1 = vsel %vm1694_vm14, %v7592_v5, 0.0  ;;  %v3575_v5 = vsel %vm1694_vm14, %v7603_v58, 0.0  ;;  %v7621_v31 = vsel %vm3365_vm8, 1.0, %v8368_v8  ;;  %vm3369_vm15 = vcmp.eq.s32.totalorder %v4282_v59, 2 }
 0x4dd   :  { %8723 = vst [vmem:[#allocation97_spill] sm:$0xff] %v7603_v58  ;;  %v3574_v45 = vadd.f32 %v3573_v1, %v3572_v41  ;;  %v4182_v41 = vpop.eup %4181  ;;  %v8724_v1 = vld [vmem:[#allocation11_spill] sm:$0xff]  ;;  %v7643_v2 = vsel %vm3366_vm1, 1.0, %v8368_v8  ;;  %v7656_v54 = vsel %vm3369_vm15, 1.0, %v8368_v8 }
 0x4de   :  { %vm8725_vm10 = vcmp.eq.s32.totalorder %v8571_v36, %v8724_v1  ;;  %8726 = vst [vmem:[#allocation72_spill] sm:$0xff] %v7621_v31  ;;  %v7635_v1 = vsel %vm3368_vm2, 1.0, %v8368_v8 }
 0x4df   :  { %v3228_v62 = vsel %vm8725_vm10, %v8656_v23, 0.0  ;;  %v3576_v4 = vadd.f32 %v3575_v5, %v3574_v45  ;;  %v3577_v23 = vsel %vm1694_vm14, %v7621_v31, 0.0  ;;  %8729 = vst [vmem:[#allocation79_spill] sm:$0xff] %v7635_v1  ;;  %v2995_v5 = vsub.f32 %v7264_v9, %v7468_v19 }
 0x4e0   :  { %3113 = vadd.xlane.f32.xlu0 %v4180_v32  ;;  %v8728_v32 = vld [vmem:[#allocation133_spill] sm:$0xff]  ;;  %v7639_v45 = vpop.xlane.xlu1 %3067  ;;  %8730 = vst [vmem:[#allocation82_spill] sm:$0xff] %v7643_v2  ;;  %v3579_v19 = vsel %vm1694_vm14, %v7643_v2, 0.0 }
 0x4e1   :  { %v2994_v58 = vsub.f32 %v8728_v32, %v7515_v0  ;;  %3115 = vadd.xlane.f32.xlu2 %v4182_v41  ;;  %v3578_v18 = vadd.f32 %v3577_v23, %v3576_v4  ;;  %v4283_v41 = vld [vmem:[%s7986_s1 + $0xa8] sm:$0xff]  ;;  %v7648_v0 = vpop.xlane.xlu0 %3071  ;;  %8731 = vst [vmem:[#allocation104_spill] sm:$0xff] %v7656_v54  ;;  %v3583_v4 = vsel %vm1694_vm14, %v7635_v1, 0.0  ;;  %v4284_v23 = vld [vmem:[%s7986_s1 + $0xb0] sm:$0xff]  ;;  %v3057_v2 = vmul.f32 1.442695, %v2995_v5 }
 0x4e2   :  { %vm3370_vm4 = vcmp.eq.s32.totalorder %v4283_v41, 2  ;;  %vm3371_vm7 = vcmp.eq.s32.totalorder %v4284_v23, 2  ;;  %v8733_v1 = vld [vmem:[#allocation148_spill] sm:$0xff]  ;;  %v8734_v23 = vld [vmem:[#allocation26_spill] sm:$0xff] }
 0x4e3   :  { %v7650_v31 = vpop.xlane.xlu2 %3075  ;;  %3267 = vadd.xlane.f32.xlu1 %v3228_v62  ;;  %v3580_v44 = vadd.f32 %v3579_v19, %v3578_v18  ;;  %v3055_v41 = vmul.f32 1.442695, %v2994_v58  ;;  %v3581_v62 = vsel %vm1694_vm14, %v7628_v24, 0.0  ;;  %v7666_v30 = vsel %vm3370_vm4, 1.0, %v8368_v8  ;;  %v4285_v18 = vld [vmem:[%s7986_s1 + $0xb8] sm:$0xff] }
 0x4e4   :  { %8732 = vst [vmem:[#allocation179_spill] sm:$0xff] %v7666_v30  ;;  %v3585_v19 = vsel %vm1694_vm14, %v7656_v54, 0.0  ;;  %vm3372_vm11 = vcmp.eq.s32.totalorder %v4285_v18, 2  ;;  %vm8735_vm6 = vcmp.eq.s32.totalorder %v8571_v36, %v8734_v23  ;;  %v7678_v24 = vsel %vm3371_vm7, 1.0, %v8368_v8  ;;  %v8737_v5 = vld [vmem:[#allocation24_spill] sm:$0xff] }
 0x4e5   :  { %v3582_v59 = vadd.f32 %v3581_v62, %v3580_v44  ;;  %v3243_v58 = vsel %vm8735_vm6, %v8733_v1, 0.0  ;;  %8736 = vst [vmem:[#allocation180_spill] sm:$0xff] %v7678_v24  ;;  %vm8738_vm3 = vcmp.eq.s32.totalorder %v8571_v36, %v8737_v5  ;;  %v3587_v54 = vsel %vm1694_vm14, %v7666_v30, 0.0 }
 0x4e6   :  { %v3244_v44 = vsel %vm8738_vm3, %v8699_v7, 0.0  ;;  %4183 = vpow2.f32 %v3055_v41  ;;  %v7687_v18 = vsel %vm3372_vm11, 1.0, %v8368_v8  ;;  %v3589_v7 = vsel %vm1694_vm14, %v7678_v24, 0.0 }
 0x4e7   :  { %v3584_v62 = vadd.f32 %v3583_v4, %v3582_v59  ;;  %8739 = vst [vmem:[#allocation78_spill] sm:$0xff] %v7687_v18  ;;  %4185 = vpow2.f32 %v3057_v2  ;;  %v4286_v4 = vld [vmem:[%s7986_s1 + $0xc0] sm:$0xff]  ;;  %v2984_v59 = vsub.f32 %v8713_v47, %v7402_v29  ;;  %v8744_v47 = vld [vmem:[#allocation22_spill] sm:$0xff]  ;;  %vm3379_vm6 = vcmp.eq.s32.totalorder %v7223_v34, 2 }
 0x4e8   :  { %3297 = vadd.xlane.f32.xlu0 %v3243_v58  ;;  %v7689_v23 = vpop.xlane.xlu1 %3073  ;;  %v8740_v58 = vld [vmem:[#allocation14_spill] sm:$0xff]  ;;  %vm3373_vm13 = vcmp.eq.s32.totalorder %v4286_v4, 2  ;;  %vm8745_vm2 = vcmp.eq.s32.totalorder %v8571_v36, %v8744_v47  ;;  %v8760_v34 = vld [vmem:[#allocation53_spill] sm:$0xff] }
 0x4e9   :  { %3299 = vadd.xlane.f32.xlu2 %v3244_v44  ;;  %vm8741_vm9 = vcmp.eq.s32.totalorder %v8571_v36, %v8740_v58  ;;  %v3586_v40 = vadd.f32 %v3585_v19, %v3584_v62  ;;  %v7709_v19 = vsel %vm3373_vm13, 1.0, %v8368_v8  ;;  %v3035_v4 = vmul.f32 1.442695, %v2984_v59  ;;  %v8747_v47 = vld [vmem:[#allocation50_spill] sm:$0xff] }
 0x4ea   :  { %v3231_v25 = vsel %vm8741_vm9, %v8657_v17, 0.0  ;;  %v3591_v17 = vsel %vm1694_vm14, %v7687_v18, 0.0  ;;  %8742 = vst [vmem:[#allocation100_spill] sm:$0xff] %v7709_v19 }
 0x4eb   :  { %3273 = vadd.xlane.f32.xlu1 %v3231_v25  ;;  %v7700_v41 = vpop.xlane.xlu2 %3081  ;;  %v7702_v2 = vpop.xlane.xlu0 %3077  ;;  %v3588_v5 = vadd.f32 %v3587_v54, %v3586_v40  ;;  %v4287_v25 = vld [vmem:[%s7986_s1 + $0xc8] sm:$0xff]  ;;  %v3593_v54 = vsel %vm1694_vm14, %v7709_v19, 0.0  ;;  %4187 = vpow2.f32 %v3035_v4  ;;  %v3247_v4 = vsel %vm918_vm5, %v8709_v3, 0.0 }
 0x4ec   :  { %v4184_v62 = vpop.eup %4183  ;;  %vm3374_vm1 = vcmp.eq.s32.totalorder %v4287_v25, 2  ;;  %4189 = vlog2.f32 %v7573_v55  ;;  %v2987_v55 = vsub.f32 %v8733_v1, %v7412_v11  ;;  %vm3378_vm5 = vcmp.eq.s32.totalorder %v7169_v38, 2 }
 0x4ed   :  { %v3590_v44 = vadd.f32 %v3589_v7, %v3588_v5  ;;  %v4186_v58 = vpop.eup %4185  ;;  %v7717_v40 = vsel %vm3374_vm1, 1.0, %v8368_v8  ;;  %v3233_v7 = vsel %vm8745_vm2, %v6968_v12, 0.0  ;;  %v4288_v5 = vld [vmem:[%s7986_s1 + $0xd0] sm:$0xff]  ;;  %v4289_v12 = vld [vmem:[%s7986_s1 + $0xd8] sm:$0xff]  ;;  %4191 = vlog2.f32 %v7582_v53 }
 0x4ee   :  { %8743 = vst [vmem:[#allocation85_spill] sm:$0xff] %v7717_v40  ;;  %vm3375_vm8 = vcmp.eq.s32.totalorder %v4288_v5, 2  ;;  %v3595_v25 = vsel %vm1694_vm14, %v7717_v40, 0.0  ;;  %vm3376_vm10 = vcmp.eq.s32.totalorder %v4289_v12, 2  ;;  %4193 = vlog2.f32 %v7524_v61 }
 0x4ef   :  { %v3592_v24 = vadd.f32 %v3591_v17, %v3590_v44  ;;  %v7752_v12 = vsel %vm3376_vm10, 1.0, %v8368_v8  ;;  %4195 = vlog2.f32 %v7639_v45  ;;  %v3041_v61 = vmul.f32 1.442695, %v2987_v55 }
 0x4f0   :  { %3119 = vadd.xlane.f32.xlu0 %v4184_v62  ;;  %8751 = vst [vmem:[#allocation76_spill] sm:$0xff] %v7752_v12  ;;  %v3250_v45 = vsel %vm921_vm0, %v8728_v32, 0.0  ;;  %v7785_v38 = vsel %vm3378_vm5, 1.0, %v8368_v8  ;;  %v1827_v32 = vrot.slane %v7273_v52, 4  ;;  %vm3380_vm0 = vcmp.eq.s32.totalorder %v7198_v33, 2 }
 0x4f1   :  { %3121 = vadd.xlane.f32.xlu2 %v4186_v58  ;;  %v3594_v62 = vadd.f32 %v3593_v54, %v3592_v24  ;;  %v7735_v58 = vsel %vm3375_vm8, 1.0, %v8368_v8  ;;  %v4188_v19 = vpop.eup %4187  ;;  %8756 = vst [vmem:[#allocation110_spill] sm:$0xff] %v7785_v38  ;;  %4197 = vpow2.f32 %v3041_v61  ;;  %v3251_v61 = vsel %vm922_vm12, %v7264_v9, 0.0 }
 0x4f2   :  { %8746 = vst [vmem:[#allocation88_spill] sm:$0xff] %v7735_v58  ;;  %v3597_v40 = vsel %vm1694_vm14, %v7735_v58, 0.0  ;;  %v7815_v9 = vsel %vm3380_vm0, 1.0, %v8368_v8  ;;  %vm1833_vm2 = vcmp.eq.s32.totalorder %v8571_v36, 0  ;;  %vm1840_vm8 = vcmp.eq.s32.totalorder %v8571_v36, 3 }
 0x4f3   :  { %3277 = vadd.xlane.f32.xlu1 %v3233_v7  ;;  %v7726_v59 = vpop.xlane.xlu1 %3079  ;;  %v7728_v17 = vpop.xlane.xlu0 %3083  ;;  %v8748_v7 = vld [vmem:[#allocation29_spill] sm:$0xff]  ;;  %v3596_v54 = vadd.f32 %v3595_v25, %v3594_v62  ;;  %v3599_v25 = vsel %vm1694_vm14, %v7752_v12, 0.0  ;;  %vm2724_vm10 = vcmp.eq.s32.totalorder %v8571_v36, 1 }
 0x4f4   :  { %v7730_v44 = vpop.xlane.xlu2 %3087  ;;  %vm8749_vm15 = vcmp.eq.s32.totalorder %v8571_v36, %v8748_v7  ;;  %v4290_v7 = vld [vmem:[%s7986_s1 + $0xe0] sm:$0xff]  ;;  %s4319_s1 = smov [#allocation2]  }
 0x4f5   :  { %v3246_v5 = vsel %vm8749_vm15, %v8747_v47, 0.0  ;;  %vm3377_vm4 = vcmp.eq.s32.totalorder %v4290_v7, 2  ;;  %v3598_v62 = vadd.f32 %v3597_v40, %v3596_v54  ;;  %vm3615_vm15 = vcmp.eq.s32.totalorder %v8571_v36, 2  ;;  %s3635_s22 = sshll.u32 %s4319_s1, 4  ;;  %s3636_s22 = int_to_ptr.vmem [resolvable:$true] %s3635_s22 }
 0x4f6   :  { %v7771_v53 = vsel %vm3377_vm4, 1.0, %v8368_v8  ;;  %vm3622_vm4 = vcmp.eq.s32.totalorder %v8571_v36, 5 }
 0x4f7   :  { %8752 = vst [vmem:[#allocation170_spill] sm:$0xff] %v7771_v53  ;;  %v3600_v54 = vadd.f32 %v3599_v25, %v3598_v62  ;;  %v3601_v12 = vsel %vm1694_vm14, %v7771_v53, 0.0  ;;  %v1758_v62 = vrot.slane %v7312_v10, 4 }
 0x4f8   :  { %3303 = vadd.xlane.f32.xlu0 %v3246_v5 }
 0x4f9   :  { %3305 = vadd.xlane.f32.xlu2 %v3247_v4  ;;  %v4190_v4 = vpop.eup %4189 }
 0x4fa   :  { %v4192_v7 = vpop.eup %4191  ;;  %v3126_v18 = vmul.f32 0.6931472, %v4190_v4  ;;  %v3603_v4 = vsel %vm1694_vm14, %v7785_v38, 0.0 }
 0x4fb   :  { %v7758_v5 = vpop.xlane.xlu1 %3085  ;;  %3099 = vadd.xlane.f32.xlu1 %v4188_v19  ;;  %v7760_v3 = vpop.xlane.xlu0 %3089  ;;  %v8753_v19 = vld [vmem:[#allocation35_spill] sm:$0xff]  ;;  %v3130_v40 = vmul.f32 0.6931472, %v4192_v7  ;;  %v8762_v7 = vld [vmem:[#allocation153_spill] sm:$0xff] }
 0x4fc   :  { %v7768_v24 = vpop.xlane.xlu2 %3093  ;;  %vm8754_vm7 = vcmp.eq.s32.totalorder %v8571_v36, %v8753_v19  ;;  %v4194_v58 = vpop.eup %4193  ;;  %v3189_v30 = vadd.f32 %v3126_v18, %v8760_v34 }
 0x4fd   :  { %v3248_v1 = vsel %vm8754_vm7, %v7242_v39, 0.0  ;;  %v8757_v39 = vld [vmem:[#allocation25_spill] sm:$0xff]  ;;  %v4196_v19 = vpop.eup %4195  ;;  %v3191_v38 = vadd.f32 %v3130_v40, %v8762_v7 }
 0x4fe   :  { %vm8758_vm11 = vcmp.eq.s32.totalorder %v8571_v36, %v8757_v39  ;;  %v7799_v39 = vsel %vm3379_vm6, 1.0, %v8368_v8  ;;  %v3132_v53 = vmul.f32 0.6931472, %v4196_v19  ;;  %v4198_v19 = vpop.eup %4197 }
 0x4ff   :  { %v3236_v55 = vsel %vm8758_vm11, %v7066_v43, 0.0  ;;  %v3128_v43 = vmul.f32 0.6931472, %v4194_v58  ;;  %v3605_v18 = vsel %vm1694_vm14, %v7799_v39, 0.0 }
 0x500   :  { %3307 = vadd.xlane.f32.xlu0 %v3248_v1 }
 0x501   :  { %3311 = vadd.xlane.f32.xlu2 %v3250_v45  ;;  %v3602_v45 = vadd.f32 %v3601_v12, %v3600_v54  ;;  %v1759_v12 = vadd.f32 %v1758_v62, %v7312_v10  ;;  %v1828_v54 = vadd.f32 %v1827_v32, %v7273_v52  ;;  %v3190_v34 = vadd.f32 %v3128_v43, %v6683_v63 }
 0x502   :  { %v2990_v52 = vsub.f32 %v8747_v47, %v7426_v22 }
 0x503   :  { %v7794_v25 = vpop.xlane.xlu1 %3091  ;;  %3283 = vadd.xlane.f32.xlu1 %v3236_v55  ;;  %v3254_v1 = vpop.xlane.xlu0 %3253  ;;  %v3604_v58 = vadd.f32 %v3603_v4, %v3602_v45  ;;  %v1760_v32 = vrot.slane %v1759_v12, 2  ;;  %v1829_v62 = vrot.slane %v1828_v54, 2 }
 0x504   :  { %8759 = vst [vmem:[#allocation86_spill] sm:$0xff] %v7794_v25  ;;  %v3258_v11 = vpop.xlane.xlu2 %3257  ;;  %v3317_v29 = vsub.f32 %v3189_v30, %v3254_v1  ;;  %v3192_v25 = vadd.f32 %v3132_v53, %v7283_v16  ;;  %v2718_v1 = vrot.slane %v7251_v46, 4  ;;  %v3607_v16 = vsel %vm1694_vm14, %v7815_v9, 0.0 }
 0x505   :  { %v3319_v33 = vsub.f32 %v3191_v38, %v3258_v11  ;;  %v3606_v63 = vadd.f32 %v3605_v18, %v3604_v58  ;;  %v3047_v47 = vmul.f32 1.442695, %v2990_v52  ;;  %v1761_v45 = vadd.f32 %v1760_v32, %v1759_v12 }
 0x506   :  { %v3445_v40 = vmul.f32 %v7441_v37, %v3317_v29  ;;  %v1830_v4 = vadd.f32 %v1829_v62, %v1828_v54  ;;  %v2719_v43 = vadd.f32 %v2718_v1, %v7251_v46 }
 0x507   :  { %v3447_v8 = vmul.f32 %v7454_v21, %v3319_v33  ;;  %v3608_v37 = vadd.f32 %v3607_v16, %v3606_v63  ;;  %v8763_v21 = vld [vmem:[#allocation28_spill] sm:$0xff]  ;;  %4199 = vpow2.f32 %v3047_v47  ;;  %v1762_v54 = vrot.slane %v1761_v45, 1  ;;  %v8766_v63 = vld [vmem:[#allocation31_spill] sm:$0xff] }
 0x508   :  { %3313 = vadd.xlane.f32.xlu0 %v3251_v61  ;;  %v3477_v55 = vsel %vm1694_vm14, %v3445_v40, 0.0  ;;  %vm8764_vm12 = vcmp.eq.s32.totalorder %v8571_v36, %v8763_v21  ;;  %v1831_v58 = vrot.slane %v1830_v4, 1  ;;  %v2720_v18 = vrot.slane %v2719_v43, 2 }
 0x509   :  { %v3480_v7 = vsel %vm1694_vm14, %v3447_v8, 0.0  ;;  %vm8767_vm3 = vcmp.eq.s32.totalorder %v8571_v36, %v8766_v63 }
 0x50a   :  { %v2721_v52 = vadd.f32 %v2720_v18, %v2719_v43  ;;  %v3242_v16 = vsel %vm8767_vm3, %v7182_v6, 0.0  ;;  %v8772_v18 = vld [vmem:[#allocation34_spill] sm:$0xff] }
 0x50b   :  { %v3256_v10 = vpop.xlane.xlu1 %3255  ;;  %3105 = vadd.xlane.f32.xlu1 %v4198_v19  ;;  %v3260_v30 = vpop.xlane.xlu0 %3259  ;;  %v3609_v19 = vrot.slane %v3608_v37, 4  ;;  %vm8773_vm1 = vcmp.eq.s32.totalorder %v8571_v36, %v8772_v18  ;;  %v8779_v18 = vld [vmem:[#allocation54_spill] sm:$0xff] }
 0x50c   :  { %v3318_v11 = vsub.f32 %v3190_v34, %v3256_v10  ;;  %v3320_v38 = vsub.f32 %v3192_v25, %v3260_v30  ;;  %v1832_v34 = vadd.f32 %v1831_v58, %v1830_v4  ;;  %v2722_v62 = vrot.slane %v2721_v52, 1  ;;  %v3264_v4 = vpop.xlane.xlu2 %3263 }
 0x50d   :  { %v3610_v10 = vadd.f32 %v3609_v19, %v3608_v37  ;;  %v4200_v30 = vpop.eup %4199  ;;  %v3252_v19 = vsel %vm8773_vm1, %v7085_v51, 0.0 }
 0x50e   :  { %v3446_v53 = vmul.f32 %v7444_v57, %v3318_v11  ;;  %v3448_v29 = vmul.f32 %v7464_v14, %v3320_v38  ;;  %v3239_v57 = vsel %vm8764_vm12, %v7158_v60, 0.0  ;;  %v1763_v14 = vadd.f32 %v1762_v54, %v1761_v45  ;;  %v8765_v60 = vld [vmem:[#allocation68_spill] sm:$0xff] }
 0x50f   :  { %v2993_v32 = vsub.f32 %v8765_v60, %v7466_v56  ;;  %v3611_v1 = vrot.slane %v3610_v10, 2  ;;  %v2723_v11 = vadd.f32 %v2722_v62, %v2721_v52  ;;  %v2996_v45 = vsub.f32 %v7085_v51, %v7522_v49 }
 0x510   :  { %v3478_v61 = vsel %vm1694_vm14, %v3446_v53, 0.0  ;;  %v3482_v46 = vsel %vm1694_vm14, %v3448_v29, 0.0 }
 0x511   :  { %v3479_v25 = vadd.f32 %v3478_v61, %v3477_v55  ;;  %v3053_v40 = vmul.f32 1.442695, %v2993_v32  ;;  %v3612_v38 = vadd.f32 %v3611_v1, %v3610_v10  ;;  %v3059_v43 = vmul.f32 1.442695, %v2996_v45  ;;  %v8768_v55 = vld [vmem:[#allocation33_spill] sm:$0xff] }
 0x512   :  { %vm8769_vm9 = vcmp.eq.s32.totalorder %v8571_v36, %v8768_v55 }
 0x513   :  { %v3481_v12 = vadd.f32 %v3480_v7, %v3479_v25  ;;  %3289 = vadd.xlane.f32.xlu1 %v3239_v57  ;;  %4201 = vpow2.f32 %v3053_v40  ;;  %v3613_v8 = vrot.slane %v3612_v38, 1  ;;  %v3245_v61 = vsel %vm8769_vm9, %v7206_v50, 0.0  ;;  %v3266_v6 = vpop.xlane.xlu0 %3265  ;;  %v8770_v7 = vld [vmem:[#allocation32_spill] sm:$0xff] }
 0x514   :  { %4203 = vpow2.f32 %v3059_v43  ;;  %v7849_v29 = vpop.xlane.xlu2 %3269  ;;  %vm8771_vm13 = vcmp.eq.s32.totalorder %v8571_v36, %v8770_v7 }
 0x515   :  { %v7835_v33 = vadd.f32 %v3482_v46, %v3481_v12  ;;  %v3614_v53 = vadd.f32 %v3613_v8, %v3612_v38  ;;  %4205 = vlog2.f32 %v7648_v0  ;;  %v3249_v50 = vsel %vm8771_vm13, %v8765_v60, 0.0 }
 0x516   :  { %4207 = vlog2.f32 %v7584_v48 }
 0x517   :  { %4209 = vlog2.f32 %v7689_v23 }
 0x518   :  { %4211 = vlog2.f32 %v7702_v2 }
 0x519   :  { %1836 = vperm.xlu2 %3809, %v1763_v14   ;;  %v4202_v47 = vpop.eup %4201  ;;  %4213 = vlog2.f32 %v7650_v31 }
 0x51a   :  { %v4204_v37 = vpop.eup %4203  ;;  %4215 = vlog2.f32 %v7726_v59 }
 0x51b   :  { %3111 = vadd.xlane.f32.xlu1 %v4200_v30  ;;  %v7852_v25 = vpop.xlane.xlu0 %3271  ;;  %v4206_v57 = vpop.eup %4205  ;;  %4217 = vlog2.f32 %v7728_v17 }
 0x51c   :  { %1843 = vperm.xlu0 %3810, %v1832_v34   ;;  %v7860_v21 = vpop.xlane.xlu2 %3275  ;;  %v4208_v12 = vpop.eup %4207  ;;  %v3136_v46 = vmul.f32 0.6931472, %v4206_v57  ;;  %4219 = vlog2.f32 %v7700_v41  ;;  %v8778_v57 = vld [vmem:[#allocation67_spill] sm:$0xff] }
 0x51d   :  { %v4210_v54 = vpop.eup %4209  ;;  %v3134_v23 = vmul.f32 0.6931472, %v4208_v12  ;;  %4221 = vlog2.f32 %v7730_v44 }
 0x51e   :  { %v3138_v58 = vmul.f32 0.6931472, %v4210_v54  ;;  %v3194_v14 = vadd.f32 %v3136_v46, %v7299_v28  ;;  %v4212_v2 = vpop.eup %4211  ;;  %4223 = vlog2.f32 %v7758_v5 }
 0x51f   :  { %v4214_v34 = vpop.eup %4213  ;;  %v3193_v59 = vadd.f32 %v3134_v23, %v7275_v35  ;;  %v3142_v32 = vmul.f32 0.6931472, %v4212_v2  ;;  %4225 = vlog2.f32 %v7760_v3 }
 0x520   :  { %v3322_v52 = vsub.f32 %v3194_v14, %v3264_v4  ;;  %v3195_v10 = vadd.f32 %v3138_v58, %v7310_v15  ;;  %v4216_v30 = vpop.eup %4215  ;;  %v3140_v51 = vmul.f32 0.6931472, %v4214_v34  ;;  %4227 = vlog2.f32 %v7768_v24 }
 0x521   :  { %v3144_v28 = vmul.f32 0.6931472, %v4216_v30  ;;  %v3197_v38 = vadd.f32 %v3142_v32, %v7326_v26  ;;  %v4218_v17 = vpop.eup %4217 }
 0x522   :  { %v3323_v62 = vsub.f32 %v3195_v10, %v3266_v6  ;;  %v3450_v40 = vmul.f32 %v7492_v13, %v3322_v52  ;;  %v3196_v8 = vadd.f32 %v3140_v51, %v7318_v42  ;;  %v3148_v45 = vmul.f32 0.6931472, %v4218_v17  ;;  %v8783_v17 = vld [vmem:[#allocation134_spill] sm:$0xff] }
 0x523   :  { %3295 = vadd.xlane.f32.xlu1 %v3242_v16  ;;  %v7863_v0 = vpop.permute.xlu1 %2727  ;;  %v7867_v48 = vpop.xlane.xlu0 %3095  ;;  %v3325_v13 = vsub.f32 %v3197_v38, %v7849_v29  ;;  %v8776_v29 = vld [vmem:[#allocation75_spill] sm:$0xff] }
 0x524   :  { %2734 = vperm.xlu0 %3810, %v2723_v11   ;;  %v7875_v31 = vpop.xlane.xlu2 %3097  ;;  %v3451_v35 = vmul.f32 %v7500_v27, %v3323_v62  ;;  %v3486_v41 = vsel %vm1694_vm14, %v3450_v40, 0.0  ;;  %v8780_v62 = vld [vmem:[#allocation142_spill] sm:$0xff] }
 0x526   :  { %v3488_v4 = vsel %vm1694_vm14, %v3451_v35, 0.0 }
 0x52b   :  { %3117 = vadd.xlane.f32.xlu1 %v4202_v47  ;;  %v3280_v15 = vpop.xlane.xlu0 %3279  ;;  %v4220_v47 = vpop.eup %4219 }
 0x52c   :  { %3625 = vperm.xlu0 %3810, %v3614_v53   ;;  %v8774_v53 = vld [vmem:[#allocation65_spill] sm:$0xff]  ;;  %v3282_v43 = vpop.xlane.xlu2 %3281  ;;  %v3146_v55 = vmul.f32 0.6931472, %v4220_v47  ;;  %v4222_v7 = vpop.eup %4221 }
 0x52d   :  { %v4224_v46 = vpop.eup %4223  ;;  %v3152_v52 = vmul.f32 0.6931472, %v4222_v7 }
 0x52e   :  { %v4226_v14 = vpop.eup %4225 }
 0x52f   :  { %v3154_v32 = vmul.f32 0.6931472, %v4226_v14 }
 0x533   :  { %3301 = vadd.xlane.f32.xlu1 %v3245_v61  ;;  %v8775_v61 = vld [vmem:[#allocation139_spill] sm:$0xff]  ;;  %v7900_v23 = vpop.xlane.xlu0 %3101 }
 0x534   :  { %v3453_v6 = vmul.f32 %v8775_v61, %v3325_v13  ;;  %v3104_v51 = vpop.xlane.xlu2 %3103 }
 0x536   :  { %v3492_v58 = vsel %vm1694_vm14, %v3453_v6, 0.0 }
 0x53b   :  { %3123 = vadd.xlane.f32.xlu1 %v4204_v37 }
 0x53c   :  { %v3288_v6 = vpop.xlane.xlu2 %3287 }
 0x543   :  { %3309 = vadd.xlane.f32.xlu1 %v3249_v50  ;;  %v8777_v50 = vld [vmem:[#allocation109_spill] sm:$0xff] }
 0x544   :  { %v3200_v5 = vadd.f32 %v3148_v45, %v8777_v50  ;;  %v8785_v45 = vld [vmem:[#allocation86_spill] sm:$0xff] }
 0x545   :  { %4229 = vlog2.f32 %v8785_v45 }
 0x546   :  { %v3328_v3 = vsub.f32 %v3200_v5, %v7860_v21  ;;  %4231 = vlog2.f32 %v7867_v48 }
 0x547   :  { %4233 = vlog2.f32 %v7875_v31 }
 0x54b   :  { %3315 = vadd.xlane.f32.xlu1 %v3252_v19  ;;  %v3199_v19 = vadd.f32 %v3146_v55, %v8779_v18  ;;  %v8788_v55 = vld [vmem:[#allocation84_spill] sm:$0xff]  ;;  %v3110_v18 = vpop.xlane.xlu2 %3109 }
 0x54e   :  { %v3262_v60 = vpop.xlane.xlu1 %3261 }
 0x54f   :  { %v3321_v1 = vsub.f32 %v3193_v59, %v3262_v60  ;;  %v3150_v60 = vmul.f32 0.6931472, %v4224_v46 }
 0x551   :  { %v3449_v11 = vmul.f32 %v7484_v20, %v3321_v1  ;;  %v3198_v20 = vadd.f32 %v3144_v28, %v8774_v53  ;;  %v3456_v1 = vmul.f32 %v8780_v62, %v3328_v3  ;;  %v8781_v28 = vld [vmem:[#allocation91_spill] sm:$0xff]  ;;  %v3286_v53 = vpop.xlane.xlu0 %3285 }
 0x553   :  { %v3484_v63 = vsel %vm1694_vm14, %v3449_v11, 0.0  ;;  %v8782_v11 = vld [vmem:[#allocation151_spill] sm:$0xff] }
 0x554   :  { %v3485_v16 = vadd.f32 %v3484_v63, %v7835_v33  ;;  %v3326_v33 = vsub.f32 %v3198_v20, %v7852_v25  ;;  %v3202_v38 = vadd.f32 %v3152_v52, %v8782_v11  ;;  %v3498_v63 = vsel %vm1694_vm14, %v3456_v1, 0.0  ;;  %v8791_v52 = vld [vmem:[#allocation72_spill] sm:$0xff]  ;;  %v3294_v11 = vpop.xlane.xlu2 %3293 }
 0x556   :  { %v3487_v26 = vadd.f32 %v3486_v41, %v3485_v16  ;;  %v3268_v27 = vpop.xlane.xlu1 %3267  ;;  %v3454_v12 = vmul.f32 %v8778_v57, %v3326_v33  ;;  %v3203_v16 = vadd.f32 %v3154_v32, %v8783_v17  ;;  %v8784_v41 = vld [vmem:[#allocation71_spill] sm:$0xff] }
 0x557   :  { %v3324_v42 = vsub.f32 %v3196_v8, %v3268_v27  ;;  %v3330_v8 = vsub.f32 %v3202_v38, %v3280_v15  ;;  %v3201_v13 = vadd.f32 %v3150_v60, %v8784_v41 }
 0x558   :  { %v3489_v44 = vadd.f32 %v3488_v4, %v3487_v26  ;;  %v3494_v10 = vsel %vm1694_vm14, %v3454_v12, 0.0  ;;  %v3331_v26 = vsub.f32 %v3203_v16, %v3282_v43  ;;  %v8786_v4 = vld [vmem:[#allocation94_spill] sm:$0xff] }
 0x559   :  { %v3452_v37 = vmul.f32 %v8776_v29, %v3324_v42  ;;  %v3458_v33 = vmul.f32 %v8786_v4, %v3330_v8  ;;  %v8787_v42 = vld [vmem:[#allocation146_spill] sm:$0xff]  ;;  %v4228_v29 = vpop.eup %4227  ;;  %v3108_v12 = vpop.xlane.xlu0 %3107 }
 0x55a   :  { %v3459_v61 = vmul.f32 %v8788_v55, %v3331_v26  ;;  %v4230_v7 = vpop.eup %4229  ;;  %v3158_v43 = vmul.f32 0.6931472, %v4228_v29  ;;  %v8797_v29 = vld [vmem:[#allocation157_spill] sm:$0xff] }
 0x55b   :  { %v3490_v54 = vsel %vm1694_vm14, %v3452_v37, 0.0  ;;  %v3502_v24 = vsel %vm1694_vm14, %v3458_v33, 0.0  ;;  %v3156_v46 = vmul.f32 0.6931472, %v4230_v7 }
 0x55c   :  { %v3491_v25 = vadd.f32 %v3490_v54, %v3489_v44  ;;  %v3504_v57 = vsel %vm1694_vm14, %v3459_v61, 0.0  ;;  %v3116_v8 = vpop.xlane.xlu2 %3115  ;;  %v8796_v61 = vld [vmem:[#allocation82_spill] sm:$0xff] }
 0x55e   :  { %v3493_v2 = vadd.f32 %v3492_v58, %v3491_v25  ;;  %v3274_v34 = vpop.xlane.xlu1 %3273  ;;  %v8789_v25 = vld [vmem:[#allocation66_spill] sm:$0xff] }
 0x55f   :  { %v3327_v59 = vsub.f32 %v3199_v19, %v3274_v34  ;;  %v3205_v58 = vadd.f32 %v3158_v43, %v8789_v25  ;;  %v8790_v19 = vld [vmem:[#allocation77_spill] sm:$0xff]  ;;  %v8799_v43 = vld [vmem:[#allocation59_spill] sm:$0xff] }
 0x560   :  { %v3495_v30 = vadd.f32 %v3494_v10, %v3493_v2  ;;  %v3204_v14 = vadd.f32 %v3156_v46, %v8790_v19 }
 0x561   :  { %v3455_v40 = vmul.f32 %v8781_v28, %v3327_v59  ;;  %v3333_v3 = vsub.f32 %v3205_v58, %v3286_v53  ;;  %v8792_v59 = vld [vmem:[#allocation97_spill] sm:$0xff]  ;;  %v3292_v60 = vpop.xlane.xlu0 %3291 }
 0x563   :  { %v3496_v21 = vsel %vm1694_vm14, %v3455_v40, 0.0  ;;  %v3461_v10 = vmul.f32 %v8791_v52, %v3333_v3 }
 0x564   :  { %v3497_v35 = vadd.f32 %v3496_v21, %v3495_v30  ;;  %v4232_v21 = vpop.eup %4231 }
 0x565   :  { %v3508_v1 = vsel %vm1694_vm14, %v3461_v10, 0.0  ;;  %v3160_v16 = vmul.f32 0.6931472, %v4232_v21  ;;  %v8801_v10 = vld [vmem:[#allocation87_spill] sm:$0xff] }
 0x566   :  { %v3278_v20 = vpop.xlane.xlu1 %3277  ;;  %v3499_v47 = vadd.f32 %v3498_v63, %v3497_v35  ;;  %v4234_v35 = vpop.eup %4233 }
 0x567   :  { %v3329_v27 = vsub.f32 %v3201_v13, %v3278_v20  ;;  %v3162_v17 = vmul.f32 0.6931472, %v4234_v35  ;;  %v8793_v13 = vld [vmem:[#allocation121_spill] sm:$0xff] }
 0x568   :  { %v3206_v53 = vadd.f32 %v3160_v16, %v8793_v13 }
 0x569   :  { %v3457_v44 = vmul.f32 %v8787_v42, %v3329_v27  ;;  %v3114_v38 = vpop.xlane.xlu0 %3113  ;;  %v8795_v42 = vld [vmem:[#allocation70_spill] sm:$0xff] }
 0x56a   :  { %v3334_v4 = vsub.f32 %v3206_v53, %v3288_v6 }
 0x56b   :  { %v3500_v15 = vsel %vm1694_vm14, %v3457_v44, 0.0 }
 0x56c   :  { %v3501_v37 = vadd.f32 %v3500_v15, %v3499_v47  ;;  %v8794_v47 = vld [vmem:[#allocation74_spill] sm:$0xff]  ;;  %v3300_v15 = vpop.xlane.xlu2 %3299 }
 0x56d   :  { %v3207_v48 = vadd.f32 %v3162_v17, %v8794_v47 }
 0x56e   :  { %v3503_v50 = vadd.f32 %v3502_v24, %v3501_v37  ;;  %v3100_v5 = vpop.xlane.xlu1 %3099 }
 0x56f   :  { %4235 = vlog2.f32 %v3100_v5 }
 0x570   :  { %v3505_v54 = vadd.f32 %v3504_v57, %v3503_v50  ;;  %4237 = vlog2.f32 %v7900_v23  ;;  %v8798_v50 = vld [vmem:[#allocation73_spill] sm:$0xff] }
 0x571   :  { %4239 = vlog2.f32 %v3104_v51  ;;  %v3298_v27 = vpop.xlane.xlu0 %3297  ;;  %v3462_v51 = vmul.f32 %v8796_v61, %v3334_v4 }
 0x573   :  { %v3510_v6 = vsel %vm1694_vm14, %v3462_v51, 0.0 }
 0x575   :  { %v4236_v41 = vpop.eup %4235 }
 0x576   :  { %v3284_v2 = vpop.xlane.xlu1 %3283  ;;  %v3164_v20 = vmul.f32 0.6931472, %v4236_v41  ;;  %v4238_v26 = vpop.eup %4237  ;;  %v8804_v41 = vld [vmem:[#allocation62_spill] sm:$0xff] }
 0x577   :  { %v3332_v34 = vsub.f32 %v3204_v14, %v3284_v2  ;;  %v4240_v45 = vpop.eup %4239  ;;  %v3166_v55 = vmul.f32 0.6931472, %v4238_v26  ;;  %v8800_v14 = vld [vmem:[#allocation79_spill] sm:$0xff] }
 0x578   :  { %v3208_v44 = vadd.f32 %v3164_v20, %v8795_v42  ;;  %v3168_v23 = vmul.f32 0.6931472, %v4240_v45 }
 0x579   :  { %v3460_v30 = vmul.f32 %v8792_v59, %v3332_v34  ;;  %v3209_v5 = vadd.f32 %v3166_v55, %v8798_v50  ;;  %v3120_v58 = vpop.xlane.xlu0 %3119  ;;  %v8807_v55 = vld [vmem:[#allocation78_spill] sm:$0xff] }
 0x57a   :  { %v3336_v7 = vsub.f32 %v3208_v44, %v3292_v60  ;;  %v3210_v57 = vadd.f32 %v3168_v23, %v8799_v43 }
 0x57b   :  { %v3506_v32 = vsel %vm1694_vm14, %v3460_v30, 0.0  ;;  %v3337_v19 = vsub.f32 %v3209_v5, %v3294_v11 }
 0x57c   :  { %v3507_v62 = vadd.f32 %v3506_v32, %v3505_v54  ;;  %v3464_v2 = vmul.f32 %v8800_v14, %v3336_v7  ;;  %v8802_v32 = vld [vmem:[#allocation104_spill] sm:$0xff] }
 0x57d   :  { %v8808_v7 = vld [vmem:[#allocation100_spill] sm:$0xff] }
 0x57e   :  { %v3509_v28 = vadd.f32 %v3508_v1, %v3507_v62  ;;  %v3106_v40 = vpop.xlane.xlu1 %3105  ;;  %v3465_v62 = vmul.f32 %v8802_v32, %v3337_v19  ;;  %v3122_v1 = vpop.xlane.xlu2 %3121 }
 0x57f   :  { %4241 = vlog2.f32 %v3106_v40  ;;  %v8803_v40 = vld [vmem:[#allocation179_spill] sm:$0xff] }
 0x580   :  { %4243 = vlog2.f32 %v3108_v12  ;;  %v3511_v3 = vadd.f32 %v3510_v6, %v3509_v28  ;;  %v3516_v16 = vsel %vm1694_vm14, %v3465_v62, 0.0 }
 0x581   :  { %4245 = vlog2.f32 %v3110_v18  ;;  %v3514_v18 = vsel %vm1694_vm14, %v3464_v2, 0.0  ;;  %v3304_v47 = vpop.xlane.xlu0 %3303 }
 0x585   :  { %v4242_v24 = vpop.eup %4241 }
 0x586   :  { %v3290_v63 = vpop.xlane.xlu1 %3289  ;;  %v3170_v46 = vmul.f32 0.6931472, %v4242_v24  ;;  %v4244_v12 = vpop.eup %4243 }
 0x587   :  { %v3335_v33 = vsub.f32 %v3207_v48, %v3290_v63  ;;  %v4246_v30 = vpop.eup %4245  ;;  %v3172_v60 = vmul.f32 0.6931472, %v4244_v12  ;;  %v3306_v51 = vpop.xlane.xlu2 %3305 }
 0x588   :  { %v3211_v59 = vadd.f32 %v3170_v46, %v8801_v10  ;;  %v3174_v17 = vmul.f32 0.6931472, %v4246_v30  ;;  %v8812_v30 = vld [vmem:[#allocation88_spill] sm:$0xff] }
 0x589   :  { %v3463_v37 = vmul.f32 %v8797_v29, %v3335_v33  ;;  %v3212_v13 = vadd.f32 %v3172_v60, %v8804_v41  ;;  %v3308_v46 = vpop.xlane.xlu0 %3307 }
 0x58a   :  { %v3339_v63 = vsub.f32 %v3211_v59, %v3298_v27  ;;  %v8806_v27 = vld [vmem:[#allocation158_spill] sm:$0xff] }
 0x58b   :  { %v3512_v25 = vsel %vm1694_vm14, %v3463_v37, 0.0  ;;  %v3340_v26 = vsub.f32 %v3212_v13, %v3300_v15  ;;  %v3213_v42 = vadd.f32 %v3174_v17, %v8806_v27  ;;  %v8814_v17 = vld [vmem:[#allocation76_spill] sm:$0xff] }
 0x58c   :  { %v3513_v52 = vadd.f32 %v3512_v25, %v3511_v3  ;;  %v8810_v3 = vld [vmem:[#allocation85_spill] sm:$0xff] }
 0x58d   :  { %v3468_v61 = vmul.f32 %v8807_v55, %v3340_v26 }
 0x58e   :  { %v3112_v31 = vpop.xlane.xlu1 %3111  ;;  %v3515_v28 = vadd.f32 %v3514_v18, %v3513_v52  ;;  %v8811_v52 = vld [vmem:[#allocation80_spill] sm:$0xff] }
 0x58f   :  { %4247 = vlog2.f32 %v3112_v31  ;;  %v8805_v31 = vld [vmem:[#allocation180_spill] sm:$0xff]  ;;  %v3312_v32 = vpop.xlane.xlu2 %3311 }
 0x590   :  { %4249 = vlog2.f32 %v3114_v38  ;;  %v3517_v48 = vadd.f32 %v3516_v16, %v3515_v28  ;;  %v3467_v45 = vmul.f32 %v8805_v31, %v3339_v63 }
 0x591   :  { %4251 = vlog2.f32 %v3116_v8 }
 0x592   :  { %4253 = vlog2.f32 %v3120_v58  ;;  %v3520_v29 = vsel %vm1694_vm14, %v3467_v45, 0.0  ;;  %v8816_v45 = vld [vmem:[#allocation110_spill] sm:$0xff] }
 0x595   :  { %v4248_v35 = vpop.eup %4247 }
 0x596   :  { %v3296_v54 = vpop.xlane.xlu1 %3295  ;;  %v3176_v53 = vmul.f32 0.6931472, %v4248_v35  ;;  %v4250_v4 = vpop.eup %4249 }
 0x597   :  { %v3338_v34 = vsub.f32 %v3210_v57, %v3296_v54  ;;  %v3178_v23 = vmul.f32 0.6931472, %v4250_v4  ;;  %v4252_v37 = vpop.eup %4251  ;;  %v8809_v57 = vld [vmem:[#allocation69_spill] sm:$0xff] }
 0x598   :  { %v3214_v38 = vadd.f32 %v3176_v53, %v7426_v22  ;;  %v4254_v5 = vpop.eup %4253  ;;  %v3180_v43 = vmul.f32 0.6931472, %v4252_v37  ;;  %v3522_v22 = vsel %vm1694_vm14, %v3468_v61, 0.0  ;;  %v3314_v53 = vpop.xlane.xlu0 %3313 }
 0x599   :  { %v3466_v21 = vmul.f32 %v8803_v40, %v3338_v34  ;;  %v3215_v54 = vadd.f32 %v3178_v23, %v8809_v57  ;;  %v3184_v2 = vmul.f32 0.6931472, %v4254_v5  ;;  %v8813_v40 = vld [vmem:[#allocation159_spill] sm:$0xff] }
 0x59a   :  { %v3342_v15 = vsub.f32 %v3214_v38, %v3304_v47  ;;  %v3216_v10 = vadd.f32 %v3180_v43, %v8811_v52 }
 0x59b   :  { %v3518_v20 = vsel %vm1694_vm14, %v3466_v21, 0.0  ;;  %v3343_v58 = vsub.f32 %v3215_v54, %v3306_v51  ;;  %v3218_v21 = vadd.f32 %v3184_v2, %v8813_v40 }
 0x59c   :  { %v3519_v33 = vadd.f32 %v3518_v20, %v3517_v48  ;;  %v3470_v19 = vmul.f32 %v8810_v3, %v3342_v15  ;;  %v3344_v62 = vsub.f32 %v3216_v10, %v3308_v46  ;;  %v8815_v48 = vld [vmem:[#allocation132_spill] sm:$0xff] }
 0x59d   :  { %v3471_v60 = vmul.f32 %v8812_v30, %v3343_v58  ;;  %v1837_v58 = vpop.permute.xlu2 %1836 }
 0x59e   :  { %v3118_v11 = vpop.xlane.xlu1 %3117  ;;  %v3521_v24 = vadd.f32 %v3520_v29, %v3519_v33  ;;  %v3526_v18 = vsel %vm1694_vm14, %v3470_v19, 0.0  ;;  %v3472_v16 = vmul.f32 %v8814_v17, %v3344_v62  ;;  %v1839_v3 = vsel %vm1833_vm2, %v1837_v58, 0.0 }
 0x59f   :  { %4255 = vlog2.f32 %v3118_v11  ;;  %v3346_v11 = vsub.f32 %v3218_v21, %v3312_v32  ;;  %v3528_v63 = vsel %vm1694_vm14, %v3471_v60, 0.0 }
 0x5a0   :  { %4257 = vlog2.f32 %v3122_v1  ;;  %v3523_v25 = vadd.f32 %v3522_v22, %v3521_v24  ;;  %v3530_v33 = vsel %vm1694_vm14, %v3472_v16, 0.0 }
 0x5a1   :  { %v3474_v4 = vmul.f32 %v8816_v45, %v3346_v11 }
 0x5a5   :  { %v4256_v14 = vpop.eup %4255 }
 0x5a6   :  { %v3302_v44 = vpop.xlane.xlu1 %3301  ;;  %v4258_v59 = vpop.eup %4257  ;;  %v3182_v1 = vmul.f32 0.6931472, %v4256_v14 }
 0x5a7   :  { %v3341_v8 = vsub.f32 %v3213_v42, %v3302_v44  ;;  %v3186_v28 = vmul.f32 0.6931472, %v4258_v59  ;;  %v8817_v42 = vld [vmem:[#allocation170_spill] sm:$0xff] }
 0x5a8   :  { %v3217_v41 = vadd.f32 %v3182_v1, %v7466_v56  ;;  %v3534_v56 = vsel %vm1694_vm14, %v3474_v4, 0.0 }
 0x5a9   :  { %v3469_v50 = vmul.f32 %v8808_v7, %v3341_v8  ;;  %v3219_v26 = vadd.f32 %v3186_v28, %v8815_v48 }
 0x5ab   :  { %v3524_v6 = vsel %vm1694_vm14, %v3469_v50, 0.0  ;;  %v3347_v38 = vsub.f32 %v3219_v26, %v3314_v53 }
 0x5ac   :  { %v3525_v34 = vadd.f32 %v3524_v6, %v3523_v25 }
 0x5ad   :  { %v3475_v51 = vmul.f32 %v7799_v39, %v3347_v38  ;;  %v1844_v39 = vpop.permute.xlu0 %1843 }
 0x5ae   :  { %v3124_v12 = vpop.xlane.xlu1 %3123  ;;  %v3527_v35 = vadd.f32 %v3526_v18, %v3525_v34 }
 0x5af   :  { %4259 = vlog2.f32 %v3124_v12  ;;  %v3536_v15 = vsel %vm1694_vm14, %v3475_v51, 0.0 }
 0x5b0   :  { %v3529_v47 = vadd.f32 %v3528_v63, %v3527_v35 }
 0x5b2   :  { %v3531_v23 = vadd.f32 %v3530_v33, %v3529_v47 }
 0x5b5   :  { %v4260_v13 = vpop.eup %4259 }
 0x5b6   :  { %v3310_v20 = vpop.xlane.xlu1 %3309  ;;  %v3188_v27 = vmul.f32 0.6931472, %v4260_v13 }
 0x5b7   :  { %v3345_v31 = vsub.f32 %v3217_v41, %v3310_v20 }
 0x5b8   :  { %v3220_v29 = vadd.f32 %v3188_v27, %v7522_v49  ;;  %v2735_v49 = vpop.permute.xlu0 %2734 }
 0x5b9   :  { %v3473_v44 = vmul.f32 %v8817_v42, %v3345_v31 }
 0x5bb   :  { %v3532_v55 = vsel %vm1694_vm14, %v3473_v44, 0.0 }
 0x5bc   :  { %v3533_v61 = vadd.f32 %v3532_v55, %v3531_v23 }
 0x5be   :  { %v3535_v8 = vadd.f32 %v3534_v56, %v3533_v61  ;;  %v3316_v37 = vpop.xlane.xlu1 %3315 }
 0x5bf   :  { %v3348_v24 = vsub.f32 %v3220_v29, %v3316_v37 }
 0x5c0   :  { %v3537_v50 = vadd.f32 %v3536_v15, %v3535_v8  ;;  %v3626_v34 = vpop.permute.xlu0 %3625 }
 0x5c1   :  { %v3476_v7 = vmul.f32 %v7815_v9, %v3348_v24  ;;  %v1846_v9 = vsel %vm1840_vm8, %v1844_v39, %v1839_v3 }
 0x5c2   :  { %v2730_v19 = vsel %vm2724_vm10, %v7863_v0, %v1846_v9 }
 0x5c3   :  { %v3538_v5 = vsel %vm1694_vm14, %v3476_v7, 0.0  ;;  %vm2731_vm14 = vcmp.eq.s32.totalorder %v8571_v36, 4 }
 0x5c4   :  { %v3539_v43 = vadd.f32 %v3538_v5, %v3537_v50  ;;  %v2737_v14 = vsel %vm2731_vm14, %v2735_v49, %v2730_v19 }
 0x5c6   :  { %v3540_v22 = vrot.slane %v3539_v43, 4 }
 0x5c8   :  { %v3541_v57 = vadd.f32 %v3540_v22, %v3539_v43 }
 0x5ca   :  { %v3542_v54 = vrot.slane %v3541_v57, 2 }
 0x5cc   :  { %v3543_v6 = vadd.f32 %v3542_v54, %v3541_v57 }
 0x5ce   :  { %v3544_v46 = vrot.slane %v3543_v6, 1 }
 0x5d0   :  { %v3545_v25 = vadd.f32 %v3544_v46, %v3543_v6 }
 0x5d2   :  { %3618 = vperm.xlu2 %3809, %v3545_v25  }
 0x62c   :  { %v3619_v2 = vpop.permute.xlu2 %3618 }
 0x62d   :  { %v3621_v12 = vsel %vm3615_vm15, %v3619_v2, %v2737_v14 }
 0x62e   :  { %v3628_v52 = vsel %vm3622_vm4, %v3626_v34, %v3621_v12 }
 0x62f   :  { %3629 = vst [vmem:[#allocation2] sm:$0x1] %v3628_v52 }
 0x630   :  { %3640 = dma.vmem_to_hbm [thread:$0]  %s3636_s22, 16, %s3638_s24, [#allocation3]  }
 0x631   :  { %4315 = dma.done.wait [#allocation3], 16  }
 0x632   :  { %4316 = vsyncadd [#allocation3], 4294967280 }
 0x633   :  { %3645 = vsyncpa [#allocation3], 1 }

</bundles_post_ra>
